<compile_context>
chip_gen: v5e
topology: v5e:2x2
jax: 0.10.0
libtpu: 0.0.40
codegen_flags: <defaults>
</compile_context>

<pallas_src>
import functools

import jax
import jax.numpy as jnp
from jax.experimental import pallas as pl
from jax.experimental.pallas import tpu as pltpu


# --------------------------------------------------------------------------
# Hyperparameters (small, consistent with the module)
# --------------------------------------------------------------------------
X_DIM = 4          # x_dim (coordinate dimension)
H_DIM = 32         # h_dim
N_LAYERS = 2       # n_layers of the BaseNet MLP
Y_DIM = 16         # y_dim
X_SCALE = 2.0      # x_scale != 1 -> exercises the scaling branch
ALPHA = 3.0        # sin frequency
GAMMA = 1.0        # TODO(synk): unused in this forward path (see header note)

N_ROWS = 256       # number of input points (x1.shape[0]); must be a multiple of TM
TM = 128           # rows per grid step (fills the MXU M dimension)
LANE = 128         # TPU lane width


def _align8(n):
    return (n + 7) // 8 * 8


# --------------------------------------------------------------------------
# Packed parameter slab layout: one (TOTAL_ROWS, 128) f32 array, every section
# starting at an 8-aligned sublane offset.  Weights are stored pre-transposed
# as (in_features, out_features); biases as (1, out_features).
#   wbd : (2*X_DIM, 2*H)  block-diag [ws1 0; 0 ws2]
#   bbd : (1, 2*H)        [bs1 | bs2]
#   wst : (2*H, H)        stacked [wl1; wl2]
#   bst : (1, H)          bl1 + bl2
#   wm0/bm0, wh*/bh*, wout/bout : BaseNet softplus MLP (wout/bout padded to 128 lanes)
# --------------------------------------------------------------------------
def _build_offsets():
    off = {}
    cur = 0

    def take(name, rows):
        nonlocal cur
        off[name] = cur
        cur += _align8(rows)

    take("wbd", 2 * X_DIM); take("bbd", 1)     # fused Sin layers of netA1/netA2
    take("wst", 2 * H_DIM); take("bst", 1)     # fused Linear layers + y1+y2 add
    take("wm0", H_DIM); take("bm0", 1)         # BaseNet input Linear
    for n in range(N_LAYERS):                  # BaseNet hidden Linear+Softplus
        take(f"wh{n}", H_DIM); take(f"bh{n}", 1)
    take("wout", H_DIM); take("bout", 1)       # BaseNet output Linear (cols padded)
    return off, cur


_OFF, TOTAL_ROWS = _build_offsets()            # 248 rows x 128 lanes x f32 = 124 KiB


def _softplus(x):
    # Numerically stable softplus (matches torch.nn.Softplus to ~2e-9).
    return jnp.maximum(x, 0.0) + jnp.log1p(jnp.exp(-jnp.abs(x)))


# --------------------------------------------------------------------------
# Kernel: one 128-row tile end-to-end, reduced to a per-tile column sum.
# --------------------------------------------------------------------------
def _encoder0_kernel(x_ref, p_ref, out_ref, *, x_scale, alpha, n_layers):
    f32 = jnp.float32
    H2 = 2 * H_DIM

    x = x_ref[...]                                            # (TM, 2*X_DIM) = [x1|x2]
    if x_scale != 1.0:                                        # static branch
        x = x * x_scale

    # Fused Sin stage of both branches: block-diag weight -> [x1@ws1 | x2@ws2]
    w_bd = p_ref[_OFF["wbd"]:_OFF["wbd"] + 2 * X_DIM, 0:H2]   # (8, 64)
    b_bd = p_ref[_OFF["bbd"]:_OFF["bbd"] + 1, 0:H2]           # (1, 64)
    s12 = jnp.sin(alpha * (jnp.dot(x, w_bd, preferred_element_type=f32) + b_bd))

    # Fused branch Linears + (y1 + y2): [s1|s2] @ [[wl1],[wl2]] + (bl1+bl2)
    w_st = p_ref[_OFF["wst"]:_OFF["wst"] + H2, 0:H_DIM]       # (64, 32)
    b_st = p_ref[_OFF["bst"]:_OFF["bst"] + 1, 0:H_DIM]        # (1, 32)
    z = jnp.dot(s12, w_st, preferred_element_type=f32) + b_st  # (TM, H)

    # BaseNet (softplus MLP): Linear -> [Linear+Softplus]*n_layers -> Linear
    w = p_ref[_OFF["wm0"]:_OFF["wm0"] + H_DIM, 0:H_DIM]
    b = p_ref[_OFF["bm0"]:_OFF["bm0"] + 1, 0:H_DIM]
    h = jnp.dot(z, w, preferred_element_type=f32) + b
    for n in range(n_layers):                                 # static unroll
        w = p_ref[_OFF[f"wh{n}"]:_OFF[f"wh{n}"] + H_DIM, 0:H_DIM]
        b = p_ref[_OFF[f"bh{n}"]:_OFF[f"bh{n}"] + 1, 0:H_DIM]
        h = _softplus(jnp.dot(h, w, preferred_element_type=f32) + b)

    # Output layer: weight/bias are zero-padded to 128 lanes in the slab, so the
    # result is lane-dense and columns >= Y_DIM are exactly zero.
    w_out = p_ref[_OFF["wout"]:_OFF["wout"] + H_DIM, :]       # (H, 128)
    b_out = p_ref[_OFF["bout"]:_OFF["bout"] + 1, :]           # (1, 128)
    y = jnp.dot(h, w_out, preferred_element_type=f32) + b_out  # (TM, 128)

    # Per-tile partial sum over rows (the wrapper finishes mean + expand).
    colsum = jnp.sum(y, axis=0, keepdims=True)                # (1, 128)
    out_ref[0] = jnp.broadcast_to(colsum, (8, LANE))          # unmasked (8,128) store


# --------------------------------------------------------------------------
# Wrapper
# --------------------------------------------------------------------------
@jax.jit
def encoder0_forward(x1, x2, packed_params):
    n_rows = x1.shape[0]
    assert n_rows % TM == 0, "row count must be a multiple of the row tile"
    num_tiles = n_rows // TM

    # Layout plumbing only: present one lane-contiguous input slab [x1 | x2].
    x12 = jnp.concatenate([x1, x2], axis=1)                   # (N, 2*X_DIM)

    kernel = functools.partial(_encoder0_kernel, x_scale=X_SCALE, alpha=ALPHA,
                               n_layers=N_LAYERS)
    partial_sums = pl.pallas_call(
        kernel,
        out_shape=jax.ShapeDtypeStruct((num_tiles, 8, LANE), jnp.float32),
        grid_spec=pltpu.PrefetchScalarGridSpec(
            num_scalar_prefetch=0,
            grid=(num_tiles,),
            in_specs=[
                pl.BlockSpec((TM, 2 * X_DIM), lambda i: (i, 0)),       # [x1|x2] tile
                pl.BlockSpec((TOTAL_ROWS, LANE), lambda i: (0, 0)),    # weights, resident
            ],
            out_specs=pl.BlockSpec((1, 8, LANE), lambda i: (i, 0, 0)),
        ),
        compiler_params=pltpu.CompilerParams(
            dimension_semantics=("parallel",)),
    )(x12, packed_params)

    # y.mean(dim=0, keepdim=True).expand(N, y_dim)
    mean = partial_sums[:, 0, :Y_DIM].sum(axis=0) / jnp.float32(n_rows)
    return jnp.broadcast_to(mean[None, :], (n_rows, Y_DIM))


# --------------------------------------------------------------------------
# Deterministic parameter init (PyTorch-Linear style uniform(+-1/sqrt(fan_in)))
# and slab packing.
# --------------------------------------------------------------------------
def init_params(key):
    def lin(k, fan_in, fan_out):
        kw, kb = jax.random.split(k)
        bound = 1.0 / float(fan_in) ** 0.5
        w = jax.random.uniform(kw, (fan_in, fan_out), jnp.float32, -bound, bound)
        b = jax.random.uniform(kb, (1, fan_out), jnp.float32, -bound, bound)
        return w, b

    ks = jax.random.split(key, 6 + N_LAYERS)
    ws1, bs1 = lin(ks[0], X_DIM, H_DIM)
    wl1, bl1 = lin(ks[1], H_DIM, H_DIM)
    ws2, bs2 = lin(ks[2], X_DIM, H_DIM)
    wl2, bl2 = lin(ks[3], H_DIM, H_DIM)
    wm0, bm0 = lin(ks[4], H_DIM, H_DIM)
    whs, bhs = [], []
    for n in range(N_LAYERS):
        w, b = lin(ks[5 + n], H_DIM, H_DIM)
        whs.append(w); bhs.append(b)
    wout, bout = lin(ks[5 + N_LAYERS], H_DIM, Y_DIM)
    return (ws1, bs1, wl1, bl1, ws2, bs2, wl2, bl2, wm0, bm0, whs, bhs, wout, bout)


def pack_params(raw):
    (ws1, bs1, wl1, bl1, ws2, bs2, wl2, bl2, wm0, bm0, whs, bhs, wout, bout) = raw
    slab = jnp.zeros((TOTAL_ROWS, LANE), jnp.float32)

    def put(s, name, arr, row0=0, col0=0):
        r, c = arr.shape
        r0 = _OFF[name] + row0
        return s.at[r0:r0 + r, col0:col0 + c].set(arr.astype(jnp.float32))

    # Fused Sin stage: block-diag [ws1 0; 0 ws2], bias [bs1 | bs2]
    slab = put(slab, "wbd", ws1, 0, 0)
    slab = put(slab, "wbd", ws2, X_DIM, H_DIM)
    slab = put(slab, "bbd", bs1, 0, 0)
    slab = put(slab, "bbd", bs2, 0, H_DIM)
    # Fused branch Linears: stacked [wl1; wl2], bias (bl1 + bl2)
    slab = put(slab, "wst", wl1, 0, 0)
    slab = put(slab, "wst", wl2, H_DIM, 0)
    slab = put(slab, "bst", bl1 + bl2)
    # BaseNet
    slab = put(slab, "wm0", wm0); slab = put(slab, "bm0", bm0)
    for n in range(N_LAYERS):
        slab = put(slab, f"wh{n}", whs[n]); slab = put(slab, f"bh{n}", bhs[n])
    slab = put(slab, "wout", wout); slab = put(slab, "bout", bout)
    return slab


# --------------------------------------------------------------------------
# Pure-JAX reference for sanity checking (unfused, mirrors the PyTorch module)
# --------------------------------------------------------------------------
def encoder0_ref(x1, x2, raw):
    (ws1, bs1, wl1, bl1, ws2, bs2, wl2, bl2, wm0, bm0, whs, bhs, wout, bout) = raw
    if X_SCALE != 1.0:
        x1 = x1 * X_SCALE
        x2 = x2 * X_SCALE
    y1 = jnp.sin(ALPHA * (x1 @ ws1 + bs1)) @ wl1 + bl1
    y2 = jnp.sin(ALPHA * (x2 @ ws2 + bs2)) @ wl2 + bl2
    h = (y1 + y2) @ wm0 + bm0
    for n in range(N_LAYERS):
        h = _softplus(h @ whs[n] + bhs[n])
    y = h @ wout + bout                        # (N, Y_DIM)
    m = y.mean(axis=0, keepdims=True)          # (1, Y_DIM)
    return jnp.broadcast_to(m, (x1.shape[0], Y_DIM))


if __name__ == "__main__":
    key = jax.random.PRNGKey(0)
    k_p, k_x1, k_x2 = jax.random.split(key, 3)

    raw_params = init_params(k_p)
    packed = pack_params(raw_params)
    x1 = jax.random.normal(k_x1, (N_ROWS, X_DIM), jnp.float32)
    x2 = jax.random.normal(k_x2, (N_ROWS, X_DIM), jnp.float32)

    y = encoder0_forward(x1, x2, packed)
    jax.block_until_ready(y)

    y_ref = encoder0_ref(x1, x2, raw_params)
    assert y.shape == (N_ROWS, Y_DIM), y.shape
    max_err = float(jnp.max(jnp.abs(y - y_ref)))
    assert jnp.allclose(y, y_ref, atol=2e-4, rtol=2e-4), f"mismatch vs reference: {max_err}"

    print("KERNEL_OK")
</pallas_src>

<mosaic_0001>
module attributes {stable_mosaic.version = 11 : i64} {
  func.func @_encoder0_kernel(%arg0: i32, %arg1: memref<128x8xf32, #tpu.memory_space<vmem>>, %arg2: memref<248x128xf32, #tpu.memory_space<vmem>>, %arg3: memref<1x8x128xf32, #tpu.memory_space<vmem>>) attributes {dimension_semantics = [#tpu.dimension_semantics<parallel>], iteration_bounds = array<i64: 2>, scalar_prefetch = 0 : i64, scratch_operands = 0 : i64, tpu.core_type = #tpu.core_type<tc>, window_params = [{transform_indices = @transform_0, window_bounds = array<i64: 128, 8>}, {pipeline_mode = #tpu.pipeline_mode<synchronous>, transform_indices = @transform_1, window_bounds = array<i64: 248, 128>}, {transform_indices = @transform_2, window_bounds = array<i64: 1, 8, 128>}]} {
    %c0 = arith.constant 0 : index
    %c0_0 = arith.constant 0 : index
    %0 = vector.load %arg1[%c0, %c0_0] : memref<128x8xf32, #tpu.memory_space<vmem>>, vector<128x8xf32>
    %cst = arith.constant 2.000000e+00 : f32
    %1 = vector.broadcast %cst : f32 to vector<128x8xf32>
    %2 = arith.mulf %0, %1 : vector<128x8xf32>
    %c0_1 = arith.constant 0 : index
    %c0_2 = arith.constant 0 : index
    %3 = vector.load %arg2[%c0_1, %c0_2] : memref<248x128xf32, #tpu.memory_space<vmem>>, vector<8x64xf32>
    %c8 = arith.constant 8 : index
    %c0_3 = arith.constant 0 : index
    %4 = vector.load %arg2[%c8, %c0_3] : memref<248x128xf32, #tpu.memory_space<vmem>>, vector<1x64xf32>
    %cst_4 = arith.constant dense<0.000000e+00> : vector<128x64xf32>
    %5 = tpu.matmul %2, %3, %cst_4 {dimension_numbers = #tpu.dot_dimension_numbers<[1], [0], [0], [1], [0, 0, 1, 1], [], []>} : vector<128x8xf32>, vector<8x64xf32>, vector<128x64xf32> -> vector<128x64xf32>
    %6 = vector.broadcast %4 : vector<1x64xf32> to vector<128x64xf32>
    %7 = arith.addf %5, %6 : vector<128x64xf32>
    %cst_5 = arith.constant 3.000000e+00 : f32
    %8 = vector.broadcast %cst_5 : f32 to vector<128x64xf32>
    %9 = arith.mulf %8, %7 : vector<128x64xf32>
    %10 = math.sin %9 : vector<128x64xf32>
    %c16 = arith.constant 16 : index
    %c0_6 = arith.constant 0 : index
    %11 = vector.load %arg2[%c16, %c0_6] : memref<248x128xf32, #tpu.memory_space<vmem>>, vector<64x32xf32>
    %c80 = arith.constant 80 : index
    %c0_7 = arith.constant 0 : index
    %12 = vector.load %arg2[%c80, %c0_7] : memref<248x128xf32, #tpu.memory_space<vmem>>, vector<1x32xf32>
    %cst_8 = arith.constant dense<0.000000e+00> : vector<128x32xf32>
    %13 = tpu.matmul %10, %11, %cst_8 {dimension_numbers = #tpu.dot_dimension_numbers<[1], [0], [0], [1], [0, 0, 1, 1], [], []>} : vector<128x64xf32>, vector<64x32xf32>, vector<128x32xf32> -> vector<128x32xf32>
    %14 = vector.broadcast %12 : vector<1x32xf32> to vector<128x32xf32>
    %15 = arith.addf %13, %14 : vector<128x32xf32>
    %c88 = arith.constant 88 : index
    %c0_9 = arith.constant 0 : index
    %16 = vector.load %arg2[%c88, %c0_9] : memref<248x128xf32, #tpu.memory_space<vmem>>, vector<32x32xf32>
    %c120 = arith.constant 120 : index
    %c0_10 = arith.constant 0 : index
    %17 = vector.load %arg2[%c120, %c0_10] : memref<248x128xf32, #tpu.memory_space<vmem>>, vector<1x32xf32>
    %cst_11 = arith.constant dense<0.000000e+00> : vector<128x32xf32>
    %18 = tpu.matmul %15, %16, %cst_11 {dimension_numbers = #tpu.dot_dimension_numbers<[1], [0], [0], [1], [0, 0, 1, 1], [], []>} : vector<128x32xf32>, vector<32x32xf32>, vector<128x32xf32> -> vector<128x32xf32>
    %19 = vector.broadcast %17 : vector<1x32xf32> to vector<128x32xf32>
    %20 = arith.addf %18, %19 : vector<128x32xf32>
    %c128 = arith.constant 128 : index
    %c0_12 = arith.constant 0 : index
    %21 = vector.load %arg2[%c128, %c0_12] : memref<248x128xf32, #tpu.memory_space<vmem>>, vector<32x32xf32>
    %c160 = arith.constant 160 : index
    %c0_13 = arith.constant 0 : index
    %22 = vector.load %arg2[%c160, %c0_13] : memref<248x128xf32, #tpu.memory_space<vmem>>, vector<1x32xf32>
    %cst_14 = arith.constant dense<0.000000e+00> : vector<128x32xf32>
    %23 = tpu.matmul %20, %21, %cst_14 {dimension_numbers = #tpu.dot_dimension_numbers<[1], [0], [0], [1], [0, 0, 1, 1], [], []>} : vector<128x32xf32>, vector<32x32xf32>, vector<128x32xf32> -> vector<128x32xf32>
    %24 = vector.broadcast %22 : vector<1x32xf32> to vector<128x32xf32>
    %25 = arith.addf %23, %24 : vector<128x32xf32>
    %cst_15 = arith.constant 0.000000e+00 : f32
    %26 = vector.broadcast %cst_15 : f32 to vector<128x32xf32>
    %27 = arith.maximumf %25, %26 : vector<128x32xf32>
    %28 = math.absf %25 : vector<128x32xf32>
    %cst_16 = arith.constant 0.000000e+00 : f32
    %29 = vector.broadcast %cst_16 : f32 to vector<128x32xf32>
    %30 = arith.subf %29, %28 : vector<128x32xf32>
    %31 = math.exp %30 : vector<128x32xf32>
    %32 = math.log1p %31 : vector<128x32xf32>
    %33 = arith.addf %27, %32 : vector<128x32xf32>
    %c168 = arith.constant 168 : index
    %c0_17 = arith.constant 0 : index
    %34 = vector.load %arg2[%c168, %c0_17] : memref<248x128xf32, #tpu.memory_space<vmem>>, vector<32x32xf32>
    %c200 = arith.constant 200 : index
    %c0_18 = arith.constant 0 : index
    %35 = vector.load %arg2[%c200, %c0_18] : memref<248x128xf32, #tpu.memory_space<vmem>>, vector<1x32xf32>
    %cst_19 = arith.constant dense<0.000000e+00> : vector<128x32xf32>
    %36 = tpu.matmul %33, %34, %cst_19 {dimension_numbers = #tpu.dot_dimension_numbers<[1], [0], [0], [1], [0, 0, 1, 1], [], []>} : vector<128x32xf32>, vector<32x32xf32>, vector<128x32xf32> -> vector<128x32xf32>
    %37 = vector.broadcast %35 : vector<1x32xf32> to vector<128x32xf32>
    %38 = arith.addf %36, %37 : vector<128x32xf32>
    %cst_20 = arith.constant 0.000000e+00 : f32
    %39 = vector.broadcast %cst_20 : f32 to vector<128x32xf32>
    %40 = arith.maximumf %38, %39 : vector<128x32xf32>
    %41 = math.absf %38 : vector<128x32xf32>
    %cst_21 = arith.constant 0.000000e+00 : f32
    %42 = vector.broadcast %cst_21 : f32 to vector<128x32xf32>
    %43 = arith.subf %42, %41 : vector<128x32xf32>
    %44 = math.exp %43 : vector<128x32xf32>
    %45 = math.log1p %44 : vector<128x32xf32>
    %46 = arith.addf %40, %45 : vector<128x32xf32>
    %c208 = arith.constant 208 : index
    %c0_22 = arith.constant 0 : index
    %47 = vector.load %arg2[%c208, %c0_22] : memref<248x128xf32, #tpu.memory_space<vmem>>, vector<32x128xf32>
    %c240 = arith.constant 240 : index
    %c0_23 = arith.constant 0 : index
    %48 = vector.load %arg2[%c240, %c0_23] : memref<248x128xf32, #tpu.memory_space<vmem>>, vector<1x128xf32>
    %cst_24 = arith.constant dense<0.000000e+00> : vector<128x128xf32>
    %49 = tpu.matmul %46, %47, %cst_24 {dimension_numbers = #tpu.dot_dimension_numbers<[1], [0], [0], [1], [0, 0, 1, 1], [], []>} : vector<128x32xf32>, vector<32x128xf32>, vector<128x128xf32> -> vector<128x128xf32>
    %50 = vector.broadcast %48 : vector<1x128xf32> to vector<128x128xf32>
    %51 = arith.addf %49, %50 : vector<128x128xf32>
    %cst_25 = arith.constant dense<0.000000e+00> : vector<128xf32>
    %52 = vector.multi_reduction <add>, %51, %cst_25 [0] : vector<128x128xf32> to vector<128xf32>
    %53 = vector.shape_cast %52 : vector<128xf32> to vector<1x128xf32>
    %54 = vector.shape_cast %53 : vector<1x128xf32> to vector<1x128xf32>
    %55 = vector.broadcast %54 : vector<1x128xf32> to vector<8x128xf32>
    %c0_26 = arith.constant 0 : index
    %c0_27 = arith.constant 0 : index
    %c0_28 = arith.constant 0 : index
    %56 = vector.load %arg3[%c0_26, %c0_27, %c0_28] : memref<1x8x128xf32, #tpu.memory_space<vmem>>, vector<1x8x128xf32>
    %57 = vector.shape_cast %56 : vector<1x8x128xf32> to vector<8x128xf32>
    %58 = vector.shape_cast %55 : vector<8x128xf32> to vector<1x8x128xf32>
    tpu.vector_store %arg3[%c0_26, %c0_27, %c0_28], %58 {strides = array<i32>} : memref<1x8x128xf32, #tpu.memory_space<vmem>>, vector<1x8x128xf32>,
    return
  }
  func.func @transform_0(%arg0: i32) -> (i32, i32) {
    %c0_i32 = arith.constant 0 : i32
    %c0_i32_0 = arith.constant 0 : i32
    return %arg0, %c0_i32 : i32, i32
  }
  func.func @transform_1(%arg0: i32) -> (i32, i32) {
    %c0_i32 = arith.constant 0 : i32
    %c0_i32_0 = arith.constant 0 : i32
    %c0_i32_1 = arith.constant 0 : i32
    return %c0_i32, %c0_i32_0 : i32, i32
  }
  func.func @transform_2(%arg0: i32) -> (i32, i32, i32) {
    %c0_i32 = arith.constant 0 : i32
    %c0_i32_0 = arith.constant 0 : i32
    %c0_i32_1 = arith.constant 0 : i32
    return %arg0, %c0_i32, %c0_i32_0 : i32, i32, i32
  }
}

</mosaic_0001>

<bundles_post_ra>
// kernel: encoder0_forward.1
= control target key start
LH: loop header
LB: loop body
LE: loop exit
PB: predicated region body
PF: predicated region fallthrough
CT: control target
= control target key end

     0   :  { %s4283_s9 = smov 0   ;;  %s7131_s0 = inlined_call_operand.vmem [shape: f32[256,8], index: 0, kind: input, shape index: {}]   ;;  %s7132_s1 = inlined_call_operand.vmem [shape: f32[248,128], index: 1, kind: input, shape index: {}]   ;;  %s7133_s2 = inlined_call_operand.vmem [shape: f32[2,8,128], index: 2, kind: output, shape index: {}]  }
   0x1 LB: > { %s4289_s10 = sadd.s32 4294967295, %s4259_s9   ;;  %p3949_p0 = scmp.ge.s32.totalorder %s4259_s9, 1  ;;  %s4259_s9 = sphi %s4283_s9, %s12_s9  }
   0x2   : > { %p113_p1 = scmp.lt.s32.totalorder %s4259_s9, 3 }
   0x4   : > { %p114_p2 = pnand %p3949_p0, %p113_p1 }
   0x6   : > { %117 = sbr.rel (%p114_p2) target bundleno = 1524 (0x5f4), region = 28 }
   0xb   : > { %v176_v0 = vld [vmem:[%s7132_s1] sm:$0xff]  ;;  %s3950_s13 = sshll.u32 %s4289_s10, 4  ;;  %vm179_vm0 = vcmask 64512   ;;  %v4337_v34 = vld [vmem:[%s7132_s1 + $0x8] ss:$0 sm:$0xff]  ;;  %p140_p4 = scmp.lt.s32.totalorder %s4289_s10, 1 }
   0xc   : > { %243 = vmatpush.msra.mxu0 %v176_v0  ;;  %4099 = vmatpush.msra.mxu1 %v176_v0  ;;  %p135_p3 = scmp.lt.s32.totalorder %s3950_s13, 31 }
   0xd   : > { %s7387_s10 = smov (!%p140_p4, %s4289_s10), 1 }
   0xe   : > { %s7385_s13 = smov (!%p135_p3, %s3950_s13), 31  ;;  %s3952_s26 = sshll.u32 %s7387_s10, 3 }
   0xf   : > { %s3951_s14 = sshll.u32 %s7385_s13, 3  ;;  %s143_s29 = scalar_lea.vmem %s7133_s2, %s3952_s26 }
  0x10   : > { %s4300_s17 = scalar_lea.vmem %s7131_s0, %s3951_s14 }
  0x11   : > { %v144_v1 = vld [vmem:[%s4300_s17] sm:$0xff]  ;;  %v153_v2 = vld [vmem:[%s4300_s17 + $0x48] sm:$0xff]  ;;  %v154_v6 = vld [vmem:[%s4300_s17 + $0x50] sm:$0xff] }
  0x12   : > { %v160_v3 = vmul.f32 2.0, %v144_v1  ;;  %v169_v4 = vmul.f32 2.0, %v153_v2  ;;  %v145_v5 = vld [vmem:[%s4300_s17 + $0x8] sm:$0xff]  ;;  %v170_v8 = vmul.f32 2.0, %v154_v6  ;;  %v146_v9 = vld [vmem:[%s4300_s17 + $0x10] sm:$0xff]  ;;  %v155_v10 = vld [vmem:[%s4300_s17 + $0x58] sm:$0xff] }
  0x13   : > { %v161_v7 = vmul.f32 2.0, %v145_v5  ;;  %v162_v11 = vmul.f32 2.0, %v146_v9  ;;  %v171_v12 = vmul.f32 2.0, %v155_v10  ;;  %v147_v13 = vld [vmem:[%s4300_s17 + $0x18] sm:$0xff]  ;;  %v156_v14 = vld [vmem:[%s4300_s17 + $0x60] sm:$0xff]  ;;  %v157_v18 = vld [vmem:[%s4300_s17 + $0x68] sm:$0xff] }
  0x14   : > { %3953 = vmatmul.msk.f32.vlgmr.msra.gmra.mxu0 %vm179_vm0, %v160_v3  ;;  %3962 = vmatmul.msk.f32.vlgmr.msra.gmra.mxu1 %vm179_vm0, %v169_v4  ;;  %v163_v15 = vmul.f32 2.0, %v147_v13  ;;  %v172_v16 = vmul.f32 2.0, %v156_v14  ;;  %v148_v17 = vld [vmem:[%s4300_s17 + $0x20] sm:$0xff]  ;;  %v173_v20 = vmul.f32 2.0, %v157_v18  ;;  %v149_v21 = vld [vmem:[%s4300_s17 + $0x28] sm:$0xff]  ;;  %v158_v22 = vld [vmem:[%s4300_s17 + $0x70] sm:$0xff] }
  0x15   : > { %v164_v19 = vmul.f32 2.0, %v148_v17  ;;  %v165_v23 = vmul.f32 2.0, %v149_v21  ;;  %v174_v24 = vmul.f32 2.0, %v158_v22  ;;  %v150_v25 = vld [vmem:[%s4300_s17 + $0x30] sm:$0xff]  ;;  %v159_v26 = vld [vmem:[%s4300_s17 + $0x78] sm:$0xff]  ;;  %v152_v31 = vld [vmem:[%s4300_s17 + $0x40] sm:$0xff] }
  0x16   : > { %v166_v27 = vmul.f32 2.0, %v150_v25  ;;  %v175_v28 = vmul.f32 2.0, %v159_v26  ;;  %v151_v29 = vld [vmem:[%s4300_s17 + $0x38] sm:$0xff]  ;;  %v168_v32 = vmul.f32 2.0, %v152_v31  ;;  %v7137_v25 = vmov 2475754826  }
  0x17   : > { %v167_v30 = vmul.f32 2.0, %v151_v29  ;;  %v7135_v29 = vmov 2131351028   ;;  %v7143_v31 = vmov 2102212464  }
  0x1c   : > { %3954 = vmatmul.msk.f32.gmra.mxu0 %vm179_vm0, %v161_v7  ;;  %3963 = vmatmul.msk.f32.gmra.mxu1 %vm179_vm0, %v170_v8 }
  0x24   : > { %3955 = vmatmul.msk.f32.gmra.mxu0 %vm179_vm0, %v162_v11  ;;  %3964 = vmatmul.msk.f32.gmra.mxu1 %vm179_vm0, %v171_v12 }
  0x2c   : > { %3956 = vmatmul.msk.f32.gmra.mxu0 %vm179_vm0, %v163_v15  ;;  %3965 = vmatmul.msk.f32.gmra.mxu1 %vm179_vm0, %v172_v16 }
  0x34   : > { %3957 = vmatmul.msk.f32.gmra.mxu0 %vm179_vm0, %v164_v19  ;;  %3966 = vmatmul.msk.f32.gmra.mxu1 %vm179_vm0, %v173_v20 }
  0x3c   : > { %3958 = vmatmul.msk.f32.gmra.mxu0 %vm179_vm0, %v165_v23  ;;  %3967 = vmatmul.msk.f32.gmra.mxu1 %vm179_vm0, %v174_v24  ;;  %v7147_v23 = vmov 683565275  }
  0x44   : > { %3959 = vmatmul.msk.f32.gmra.mxu0 %vm179_vm0, %v166_v27  ;;  %3968 = vmatmul.msk.f32.gmra.mxu1 %vm179_vm0, %v175_v28 }
  0x4c   : > { %3960 = vmatmul.msk.f32.gmra.mxu0 %vm179_vm0, %v167_v30 }
  0x54   : > { %3961 = vmatmul.msk.f32.gmra.mxu0 %vm179_vm0, %v168_v32 }
  0x91   : > { %v245_v33 = vpop.f32.mrf.mxu0  ;;  %v272_v36 = vpop.f32.mrf.mxu1 }
  0x92   : > { %v246_v35 = vadd.f32 %v4337_v34, %v245_v33  ;;  %v273_v38 = vadd.f32 %v4337_v34, %v272_v36  ;;  %v7141_v33 = vmov 920167782  }
  0x94   : > { %v4340_v37 = vmul.f32 3.0, %v246_v35  ;;  %v4344_v41 = vmul.f32 3.0, %v273_v38 }
  0x96   : > { %v312_v40 = vand.u32 2139095040, %v4340_v37  ;;  %7226 = vst [vmem:[#allocation2_spill] sm:$0xff] %v4344_v41  ;;  %v1707_v44 = vand.u32 2139095040, %v4344_v41  ;;  %v7134_v50 = vand.u32 2147483647, %v4340_v37 }
  0x98   : > { %v313_v43 = vshrl.u32 %v312_v40, 23  ;;  %v1708_v49 = vshrl.u32 %v1707_v44, 23  ;;  %v316_v56 = vand.u32 8388607, %v7134_v50 }
  0x99   : > { %v248_v39 = vpop.f32.mrf.mxu0  ;;  %v275_v42 = vpop.f32.mrf.mxu1 }
  0x9a   : > { %v249_v45 = vadd.f32 %v4337_v34, %v248_v39  ;;  %v3969_v47 = vadd.s32 4294967169, %v313_v43  ;;  %v276_v48 = vadd.f32 %v4337_v34, %v275_v42  ;;  %v3996_v54 = vadd.s32 4294967169, %v1708_v49  ;;  %v2796_v49 = vld [vmem:[%s7132_s1 + $0x48] sm:$0xff] }
  0x9b   : > { %v317_v61 = vor.u32 8388608, %v316_v56  ;;  %v7139_v43 = vmov 1326507024   ;;  %2856 = vmatpush.msrb.mxu1 %v2796_v49 }
  0x9c   : > { %v4350_v51 = vmul.f32 3.0, %v249_v45  ;;  %v319_v52 = vadd.s32 1, %v3969_v47  ;;  %v4352_v53 = vmul.f32 3.0, %v276_v48  ;;  %v1714_v59 = vadd.s32 1, %v3996_v54 }
  0x9d   : > { %v4360_v4 = vshll.u32 %v317_v61, 8 }
  0x9e   : > { %7227 = vst [vmem:[#allocation3_spill] sm:$0xff] %v4352_v53  ;;  %v467_v57 = vand.u32 2139095040, %v4350_v51  ;;  %vm320_vm1 = vcmp.gt.s32.totalorder %v319_v52, 0  ;;  %v1862_v58 = vand.u32 2139095040, %v4352_v53  ;;  %vm1715_vm2 = vcmp.gt.s32.totalorder %v1714_v59, 0  ;;  %v2790_v53 = vld [vmem:[%s7132_s1 + $0x18] sm:$0xff] }
  0x9f   : > { %v321_v62 = vsel %vm320_vm1, %v319_v52, 0  ;;  %v1716_v8 = vsel %vm1715_vm2, %v1714_v59, 0  ;;  %v4371_v14 = vand.u32 65535, %v4360_v4  ;;  %v4379_v20 = vshrl.u32 %v4360_v4, 16 }
  0xa0   : > { %v468_v63 = vshrl.u32 %v467_v57, 23  ;;  %v1863_v1 = vshrl.u32 %v1862_v58, 23  ;;  %v323_v3 = vand.u32 31, %v321_v62  ;;  %v4373_v15 = vand.u32 31, %v1716_v8 }
  0xa1   : > { %v251_v46 = vpop.f32.mrf.mxu0  ;;  %v278_v55 = vpop.f32.mrf.mxu1  ;;  %v4376_v19 = vshrl.u32 %v321_v62, 5  ;;  %v4384_v27 = vshrl.u32 %v1716_v8, 5 }
  0xa2   : > { %v252_v0 = vadd.f32 %v4337_v34, %v251_v46  ;;  %v279_v2 = vadd.f32 %v4337_v34, %v278_v55  ;;  %v3972_v5 = vadd.s32 4294967169, %v468_v63  ;;  %v3999_v9 = vadd.s32 4294967169, %v1863_v1  ;;  %7229 = vst [vmem:[#allocation5_spill] sm:$0xff] %v4373_v15 }
  0xa3   : > { %v4367_v12 = vsub.s32 32, %v323_v3  ;;  %v326_v24 = vshll.u32 %v7147_v23, %v323_v3  ;;  %v329_v26 = vshll.u32 %v7137_v25, %v323_v3  ;;  %7230 = vst [vmem:[#allocation6_spill] sm:$0xff] %v4384_v27  ;;  %v332_v30 = vshll.u32 %v7135_v29, %v323_v3 }
  0xa4   : > { %v4362_v6 = vmul.f32 3.0, %v252_v0  ;;  %v4364_v10 = vmul.f32 3.0, %v279_v2  ;;  %v474_v16 = vadd.s32 1, %v3972_v5  ;;  %v1869_v21 = vadd.s32 1, %v3999_v9 }
  0xa5   : > { %v335_v32 = vshll.u32 %v7143_v31, %v323_v3  ;;  %v336_v35 = vshrl.u32 %v7141_v33, %v4367_v12  ;;  %v338_v38 = vshll.u32 %v7141_v33, %v323_v3  ;;  %v4396_v39 = vsub.s32 32, %v4373_v15 }
  0xa6   : > { %7228 = vst [vmem:[#allocation4_spill] sm:$0xff] %v4364_v10  ;;  %v622_v17 = vand.u32 2139095040, %v4362_v6  ;;  %v2017_v22 = vand.u32 2139095040, %v4364_v10  ;;  %vm475_vm3 = vcmp.gt.s32.totalorder %v474_v16, 0  ;;  %v327_v42 = vshrl.u32 %v7137_v25, %v4367_v12 }
  0xa7   : > { %7232 = vst [vmem:[#allocation8_spill] sm:$0xff] %v4396_v39  ;;  %v339_v44 = vshrl.u32 %v7139_v43, %v4367_v12  ;;  %vm341_vm4 = vcmp.lt.s32.totalorder %v4376_v19, 1  ;;  %vm1870_vm5 = vcmp.gt.s32.totalorder %v1869_v21, 0  ;;  %v330_v46 = vshrl.u32 %v7135_v29, %v4367_v12 }
  0xa8   : > { %v623_v40 = vshrl.u32 %v622_v17, 23  ;;  %v2018_v45 = vshrl.u32 %v2017_v22, 23  ;;  %v333_v47 = vshrl.u32 %v7143_v31, %v4367_v12  ;;  %vm343_vm6 = vcmp.lt.s32.totalorder %v4376_v19, 3 }
  0xa9   : > { %v254_v60 = vpop.f32.mrf.mxu0  ;;  %v281_v7 = vpop.f32.mrf.mxu1  ;;  %v337_v52 = vor.u32 %v336_v35, %v335_v32  ;;  %v1730_v54 = vshll.u32 %v7143_v31, %v4373_v15  ;;  %v476_v55 = vsel %vm475_vm3, %v474_v16, 0  ;;  %v1731_v57 = vshrl.u32 %v7141_v33, %v4396_v39 }
  0xaa   : > { %v255_v11 = vadd.f32 %v4337_v34, %v254_v60  ;;  %v282_v13 = vadd.f32 %v4337_v34, %v281_v7  ;;  %v1871_v58 = vsel %vm1870_vm5, %v1869_v21, 0  ;;  %v3975_v59 = vadd.s32 4294967169, %v623_v40 }
  0xab   : > { %v4418_v61 = vor.u32 %v327_v42, %v326_v24  ;;  %v340_v62 = vor.u32 %v339_v44, %v338_v38  ;;  %vm344_vm7 = vcmp.lt.s32.totalorder %v4376_v19, 4  ;;  %v4002_v63 = vadd.s32 4294967169, %v2018_v45 }
  0xac   : > { %v4386_v28 = vmul.f32 3.0, %v255_v11  ;;  %v4392_v36 = vmul.f32 3.0, %v282_v13  ;;  %v4421_v1 = vor.u32 %v330_v46, %v329_v26  ;;  %v4423_v2 = vor.u32 %v333_v47, %v332_v30 }
  0xad   : > { %v4425_v3 = vand.u32 31, %v476_v55  ;;  %v1733_v8 = vshll.u32 %v7141_v33, %v4373_v15  ;;  %v1734_v9 = vshrl.u32 %v7139_v43, %v4396_v39  ;;  %v4431_v11 = vand.u32 31, %v1871_v58 }
  0xae   : > { %7231 = vst [vmem:[#allocation7_spill] sm:$0xff] %v4392_v36  ;;  %v777_v48 = vand.u32 2139095040, %v4386_v28  ;;  %v2172_v56 = vand.u32 2139095040, %v4392_v36  ;;  %v350_v16 = vsel %vm344_vm7, %v337_v52, 920167782  ;;  %v4435_v17 = vor.u32 %v1731_v57, %v1730_v54 }
  0xaf   : > { %7233 = vst [vmem:[#allocation9_spill] sm:$0xff] %v4431_v11  ;;  %v354_v22 = vsel %vm344_vm7, %v340_v62, 1326507024  ;;  %vm1739_vm8 = vcmp.lt.s32.totalorder %v4384_v27, 4  ;;  %v2024_v24 = vadd.s32 1, %v4002_v63  ;;  %v4447_v30 = vsel %vm341_vm4, %v4418_v61, %v4421_v1 }
  0xb0   : > { %v778_v5 = vshrl.u32 %v777_v48, 23  ;;  %v2173_v13 = vshrl.u32 %v2172_v56, 23  ;;  %7234 = vst [vmem:[#allocation10_spill] sm:$0xff] %v4435_v17  ;;  %v4453_v32 = vsel %vm341_vm4, %v4421_v1, %v4423_v2  ;;  %v4456_v35 = vsub.s32 32, %v4425_v3 }
  0xb1   : > { %v257_v18 = vpop.f32.mrf.mxu0  ;;  %v284_v0 = vpop.f32.mrf.mxu1  ;;  %v4461_v40 = vsel %vm343_vm6, %v4423_v2, %v350_v16  ;;  %v1735_v42 = vor.u32 %v1734_v9, %v1733_v8  ;;  %v4464_v44 = vsub.s32 32, %v4431_v11  ;;  %v4468_v46 = vsel %vm343_vm6, %v337_v52, %v354_v22 }
  0xb2   : > { %v258_v60 = vadd.f32 %v4337_v34, %v257_v18  ;;  %v629_v18 = vadd.s32 1, %v3975_v59  ;;  %v3978_v38 = vadd.s32 4294967169, %v778_v5  ;;  %v4005_v45 = vadd.s32 4294967169, %v2173_v13 }
  0xb3   : > { %7236 = vst [vmem:[#allocation12_spill] sm:$0xff] %v4464_v44  ;;  %v4473_v47 = vsel %vm1739_vm8, %v4435_v17, 920167782  ;;  %v4476_v49 = vshrl.u32 %v1871_v58, 5  ;;  %vm2025_vm10 = vcmp.gt.s32.totalorder %v2024_v24, 0  ;;  %v285_v54 = vadd.f32 %v4337_v34, %v284_v0  ;;  %v2795_v58 = vld [vmem:[%s7132_s1 + $0x40] sm:$0xff] }
  0xb4   : > { %v4437_v21 = vmul.f32 3.0, %v258_v60  ;;  %7237 = vst [vmem:[#allocation13_spill] sm:$0xff] %v4473_v47  ;;  %vm630_vm9 = vcmp.gt.s32.totalorder %v629_v18, 0  ;;  %v490_v57 = vshll.u32 %v7143_v31, %v4425_v3  ;;  %v491_v52 = vshrl.u32 %v7141_v33, %v4456_v35  ;;  %2857 = vmatpush.msrb.mxu1 %v2795_v58 }
  0xb5   : > { %7238 = vst [vmem:[#allocation14_spill] sm:$0xff] %v4476_v49  ;;  %v1885_v59 = vshll.u32 %v7143_v31, %v4431_v11  ;;  %v784_v60 = vadd.s32 1, %v3978_v38  ;;  %v494_v62 = vshrl.u32 %v7139_v43, %v4456_v35  ;;  %v1886_v63 = vshrl.u32 %v7141_v33, %v4464_v44 }
  0xb6   : > { %7235 = vst [vmem:[#allocation11_spill] sm:$0xff] %v4437_v21  ;;  %v932_v48 = vand.u32 2139095040, %v4437_v21  ;;  %v631_v0 = vsel %vm630_vm9, %v629_v18, 0  ;;  %v2179_v5 = vadd.s32 1, %v4005_v45  ;;  %v1888_v8 = vshll.u32 %v7141_v33, %v4431_v11 }
  0xb7   : > { %v1889_v9 = vshrl.u32 %v7139_v43, %v4464_v44  ;;  %v2026_v13 = vsel %vm2025_vm10, %v2024_v24, 0  ;;  %v4499_v22 = vshrl.u32 %v476_v55, 5  ;;  %v4503_v38 = vmul.f32 3.0, %v285_v54 }
  0xb8   : > { %v933_v16 = vshrl.u32 %v932_v48, 23  ;;  %v4506_v45 = vor.u32 %v491_v52, %v490_v57  ;;  %v4508_v58 = vand.u32 31, %v631_v0  ;;  %vm785_vm11 = vcmp.gt.s32.totalorder %v784_v60, 0 }
  0xb9   : > { %v260_v7 = vpop.f32.mrf.mxu0  ;;  %7240 = vst [vmem:[#allocation16_spill] sm:$0xff] %v4503_v38  ;;  %v4511_v25 = vor.u32 %v1886_v63, %v1885_v59  ;;  %v4513_v24 = vand.u32 31, %v2026_v13  ;;  %vm2180_vm12 = vcmp.gt.s32.totalorder %v2179_v5, 0  ;;  %v4517_v55 = vsel %vm1739_vm8, %v1735_v42, 1326507024  ;;  %v2794_v59 = vld [vmem:[%s7132_s1 + $0x38] sm:$0xff] }
  0xba   : > { %v261_v26 = vadd.f32 %v4337_v34, %v260_v7  ;;  %v287_v7 = vpop.f32.mrf.mxu1  ;;  %7243 = vst [vmem:[#allocation19_spill] sm:$0xff] %v4517_v55  ;;  %v1890_v48 = vor.u32 %v1889_v9, %v1888_v8  ;;  %vm1894_vm13 = vcmp.lt.s32.totalorder %v4476_v49, 4  ;;  %v3981_v54 = vadd.s32 4294967169, %v933_v16  ;;  %2858 = vmatpush.msrb.mxu1 %v2794_v59  ;;  %v2791_v49 = vld [vmem:[%s7132_s1 + $0x20] sm:$0xff] }
  0xbb   : > { %v288_v50 = vadd.f32 %v4337_v34, %v287_v7  ;;  %7241 = vst [vmem:[#allocation17_spill] sm:$0xff] %v4511_v25  ;;  %vm499_vm14 = vcmp.lt.s32.totalorder %v4499_v22, 4  ;;  %v786_v57 = vsel %vm785_vm11, %v784_v60, 0  ;;  %v2327_v52 = vand.u32 2139095040, %v4503_v38 }
  0xbc   : > { %v4479_v56 = vmul.f32 3.0, %v261_v26  ;;  %v493_v26 = vshll.u32 %v7141_v33, %v4425_v3  ;;  %7242 = vst [vmem:[#allocation18_spill] sm:$0xff] %v4513_v24  ;;  %v4531_v42 = vsub.s32 32, %v4508_v58  ;;  %v2181_v63 = vsel %vm2180_vm12, %v2179_v5, 0 }
  0xbd   : > { %v4533_v8 = vmul.f32 3.0, %v288_v50  ;;  %v4542_v9 = vsel %vm1894_vm13, %v4511_v25, 920167782  ;;  %v4545_v16 = vsub.s32 32, %v4513_v24  ;;  %v4553_v50 = vsel %vm1894_vm13, %v1890_v48, 1326507024 }
  0xbe   : > { %7239 = vst [vmem:[#allocation15_spill] sm:$0xff] %v4479_v56  ;;  %v1087_v18 = vand.u32 2139095040, %v4479_v56  ;;  %v495_v29 = vor.u32 %v494_v62, %v493_v26  ;;  %v4528_v62 = vsel %vm499_vm14, %v4506_v45, 920167782  ;;  %v4549_v26 = vshrl.u32 %v7147_v23, %v4367_v12  ;;  %v2793_v12 = vld [vmem:[%s7132_s1 + $0x30] sm:$0xff]  ;;  %v2792_v48 = vld [vmem:[%s7132_s1 + $0x28] sm:$0xff] }
  0xbf   : > { %7244 = vst [vmem:[#allocation20_spill] sm:$0xff] %v4533_v8  ;;  %v4555_v5 = vshrl.u32 %v631_v0, 5  ;;  %v4559_v59 = vshrl.u32 %v2026_v13, 5  ;;  %v4561_v43 = vand.u32 31, %v2181_v63  ;;  %v2328_v33 = vshrl.u32 %v2327_v52, 23  ;;  %2859 = vmatpush.msrb.mxu1 %v2793_v12 }
  0xc0   : > { %v1088_v7 = vshrl.u32 %v1087_v18, 23  ;;  %v4537_v60 = vsel %vm499_vm14, %v495_v29, 1326507024  ;;  %7245 = vst [vmem:[#allocation21_spill] sm:$0xff] %v4542_v9  ;;  %v4557_v29 = vand.u32 31, %v786_v57  ;;  %v939_v18 = vadd.s32 1, %v3981_v54 }
  0xc1   : > { %7246 = vst [vmem:[#allocation22_spill] sm:$0xff] %v4545_v16  ;;  %v263_v38 = vpop.f32.mrf.mxu0  ;;  %v7250_v0 = vmov 2102212464   ;;  %v7251_v54 = vmov 920167782   ;;  %v2482_v52 = vand.u32 2139095040, %v4533_v8  ;;  %2860 = vmatpush.msrb.mxu1 %v2792_v48 }
  0xc2   : > { %7247 = vst [vmem:[#allocation23_spill] sm:$0xff] %v4553_v50  ;;  %v3984_v31 = vadd.s32 4294967169, %v1088_v7  ;;  %v645_v23 = vshll.u32 %v7250_v0, %v4508_v58  ;;  %v646_v13 = vshrl.u32 %v7251_v54, %v4531_v42  ;;  %v2040_v36 = vshll.u32 %v7250_v0, %v4513_v24 }
  0xc3   : > { %7248 = vst [vmem:[#allocation24_spill] sm:$0xff] %v4559_v59  ;;  %v7252_v7 = vmov 1326507024   ;;  %v2041_v9 = vshrl.u32 %v7251_v54, %v4545_v16  ;;  %v2043_v25 = vshll.u32 %v7251_v54, %v4513_v24  ;;  %v648_v8 = vshll.u32 %v7251_v54, %v4508_v58  ;;  %2861 = vmatpush.msrb.mxu1 %v2791_v49 }
  0xc4   : > { %7249 = vst [vmem:[#allocation25_spill] sm:$0xff] %v4561_v43  ;;  %v649_v10 = vshrl.u32 %v7252_v7, %v4531_v42  ;;  %v2044_v50 = vshrl.u32 %v7252_v7, %v4545_v16  ;;  %v4590_v12 = vsub.s32 32, %v4557_v29  ;;  %vm940_vm15 = vcmp.gt.s32.totalorder %v939_v18, 0 }
  0xc5   : > { %v264_v44 = vadd.f32 %v4337_v34, %v263_v38  ;;  %vm654_vm0 = vcmp.lt.s32.totalorder %v4555_v5, 4  ;;  %v4595_v24 = vsub.s32 32, %v4561_v43  ;;  %v4008_v16 = vadd.s32 4294967169, %v2328_v33  ;;  %v290_v38 = vpop.f32.mrf.mxu1  ;;  %2862 = vmatpush.msrb.mxu1 %v2790_v53 }
  0xc6   : > { %v1094_v11 = vadd.s32 1, %v3984_v31  ;;  %v4600_v47 = vor.u32 %v646_v13, %v645_v23  ;;  %vm2049_vm1 = vcmp.lt.s32.totalorder %v4559_v59, 4  ;;  %v4603_v17 = vshrl.u32 %v786_v57, 5  ;;  %v2789_v23 = vld [vmem:[%s7132_s1 + $0x10] sm:$0xff] }
  0xc7   : > { %7253 = vst [vmem:[#allocation26_spill] sm:$0xff] %v4595_v24  ;;  %v2483_v55 = vshrl.u32 %v2482_v52, 23  ;;  %vm342_vm2 = vcmp.lt.s32.totalorder %v4376_v19, 2  ;;  %v650_v48 = vor.u32 %v649_v10, %v648_v8  ;;  %v4606_v27 = vor.u32 %v2041_v9, %v2040_v36  ;;  %2863 = vmatpush.msrb.mxu1 %v2789_v23 }
  0xc8   : > { %v2045_v33 = vor.u32 %v2044_v50, %v2043_v25  ;;  %v941_v31 = vsel %vm940_vm15, %v939_v18, 0  ;;  %v801_v13 = vshrl.u32 %v7251_v54, %v4590_v12  ;;  %v804_v57 = vshrl.u32 %v7252_v7, %v4590_v12 }
  0xc9   : > { %7254 = vst [vmem:[#allocation27_spill] sm:$0xff] %v4606_v27  ;;  %v2195_v49 = vshll.u32 %v7250_v0, %v4561_v43  ;;  %v4618_v52 = vmul.f32 3.0, %v264_v44  ;;  %v2196_v10 = vshrl.u32 %v7251_v54, %v4595_v24  ;;  %v2334_v25 = vadd.s32 1, %v4008_v16  ;;  %v266_v15 = vpop.f32.mrf.mxu0 }
  0xca   : > { %vm1095_vm3 = vcmp.gt.s32.totalorder %v1094_v11, 0  ;;  %v291_v36 = vadd.f32 %v4337_v34, %v290_v38  ;;  %v800_v8 = vshll.u32 %v7250_v0, %v4557_v29  ;;  %v4625_v9 = vshrl.u32 %v2181_v63, 5 }
  0xcb   : > { %7255 = vst [vmem:[#allocation28_spill] sm:$0xff] %v4618_v52  ;;  %v4627_v50 = vand.u32 31, %v941_v31  ;;  %v4011_v18 = vadd.s32 4294967169, %v2483_v55  ;;  %v4632_v53 = vsel %vm654_vm0, %v4600_v47, 920167782  ;;  %v803_v44 = vshll.u32 %v7251_v54, %v4557_v29 }
  0xcc   : > { %7256 = vst [vmem:[#allocation29_spill] sm:$0xff] %v4625_v9  ;;  %v2198_v16 = vshll.u32 %v7251_v54, %v4561_v43  ;;  %v2199_v38 = vshrl.u32 %v7252_v7, %v4595_v24  ;;  %v4642_v63 = vsel %vm654_vm0, %v650_v48, 1326507024  ;;  %v4644_v55 = vor.u32 %v801_v13, %v800_v8 }
  0xcd   : > { %7257 = vst [vmem:[#allocation30_spill] sm:$0xff] %v4627_v50  ;;  %v1096_v23 = vsel %vm1095_vm3, %v1094_v11, 0  ;;  %v1242_v39 = vand.u32 2139095040, %v4618_v52  ;;  %v805_v41 = vor.u32 %v804_v57, %v803_v44  ;;  %v4647_v56 = vor.u32 %v2196_v10, %v2195_v49 }
  0xce   : > { %vm2335_vm5 = vcmp.gt.s32.totalorder %v2334_v25, 0  ;;  %v4649_v21 = vmul.f32 3.0, %v291_v36  ;;  %vm809_vm9 = vcmp.lt.s32.totalorder %v4603_v17, 4  ;;  %vm7224_vm10 = vcmp.lt.s32.totalorder %v4625_v9, 4 }
  0xcf   : > { %7258 = vst [vmem:[#allocation31_spill] sm:$0xff] %v4647_v56  ;;  %v4654_v24 = vsub.s32 32, %v4627_v50  ;;  %v2489_v48 = vadd.s32 1, %v4011_v18  ;;  %v4659_v11 = vsel %vm2049_vm1, %v4606_v27, 920167782  ;;  %v2200_v13 = vor.u32 %v2199_v38, %v2198_v16 }
  0xd0   : > { %7259 = vst [vmem:[#allocation32_spill] sm:$0xff] %v4649_v21  ;;  %v4661_v57 = vand.u32 31, %v1096_v23  ;;  %v356_v49 = vsel %vm342_vm2, %v4453_v32, %v4468_v46  ;;  %v4669_v10 = vsel %vm2049_vm1, %v2045_v33, 1326507024  ;;  %v4674_v36 = vsel %vm809_vm9, %v4644_v55, 920167782 }
  0xd1   : > { %7260 = vst [vmem:[#allocation33_spill] sm:$0xff] %v4659_v11  ;;  %v2336_v8 = vsel %vm2335_vm5, %v2334_v25, 0  ;;  %v1243_v18 = vshrl.u32 %v1242_v39, 23  ;;  %v4678_v44 = vsel %vm809_vm9, %v805_v41, 1326507024  ;;  %v4685_v32 = vshrl.u32 %v941_v31, 5  ;;  %v269_v59 = vpop.f32.mrf.mxu0 }
  0xd2   : > { %7261 = vst [vmem:[#allocation34_spill] sm:$0xff] %v4661_v57  ;;  %v4683_v16 = vsel %vm7224_vm10, %v4647_v56, 920167782  ;;  %v2637_v46 = vand.u32 2139095040, %v4649_v21  ;;  %v956_v33 = vshrl.u32 %v7251_v54, %v4654_v24  ;;  %v959_v25 = vshrl.u32 %v7252_v7, %v4654_v24 }
  0xd3   : > { %7262 = vst [vmem:[#allocation35_spill] sm:$0xff] %v4669_v10  ;;  %vm2490_vm11 = vcmp.gt.s32.totalorder %v2489_v48, 0  ;;  %v361_v39 = vshrl.u32 %v356_v49, 16  ;;  %v4694_v41 = vsel %vm7224_vm10, %v2200_v13, 1326507024  ;;  %v4696_v38 = vand.u32 31, %v2336_v8 }
  0xd4   : > { %7263 = vst [vmem:[#allocation36_spill] sm:$0xff] %v4683_v16  ;;  %v4699_v16 = vsub.s32 32, %v4661_v57  ;;  %v267_v31 = vadd.f32 %v4337_v34, %v266_v15  ;;  %v955_v21 = vshll.u32 %v7250_v0, %v4627_v50  ;;  %v958_v56 = vshll.u32 %v7251_v54, %v4627_v50 }
  0xd5   : > { %7264 = vst [vmem:[#allocation37_spill] sm:$0xff] %v4694_v41  ;;  %v3987_v43 = vadd.s32 4294967169, %v1243_v18  ;;  %v360_v27 = vand.u32 65535, %v356_v49  ;;  %vm964_vm12 = vcmp.lt.s32.totalorder %v4685_v32, 4  ;;  %v4707_v9 = vshrl.u32 %v2336_v8, 5 }
  0xd6   : > { %7265 = vst [vmem:[#allocation38_spill] sm:$0xff] %v4696_v38  ;;  %v4709_v13 = vsel %vm2490_vm11, %v2489_v48, 0  ;;  %v4711_v41 = vshrl.u32 %v2637_v46, 23  ;;  %v4713_v10 = vor.u32 %v956_v33, %v955_v21  ;;  %v960_v11 = vor.u32 %v959_v25, %v958_v56 }
  0xd7   : > { %7266 = vst [vmem:[#allocation39_spill] sm:$0xff] %v4699_v16  ;;  %v4715_v15 = vshrl.u32 %v1096_v23, 5  ;;  %v363_v52 = vmul.u32 %v361_v39, %v4371_v14  ;;  %v4719_v50 = vsub.s32 32, %v4696_v38  ;;  %v4723_v49 = vshll.u32 %v7250_v0, %v4696_v38 }
  0xd8   : > { %7267 = vst [vmem:[#allocation40_spill] sm:$0xff] %v4707_v9  ;;  %v1111_v48 = vshrl.u32 %v7251_v54, %v4699_v16  ;;  %v4727_v8 = vmul.f32 3.0, %v267_v31  ;;  %v4731_v21 = vshll.u32 %v7251_v54, %v4696_v38  ;;  %v1249_v56 = vadd.s32 1, %v3987_v43 }
  0xd9   : > { %7268 = vst [vmem:[#allocation41_spill] sm:$0xff] %v4709_v13  ;;  %v4734_v23 = vmul.u32 %v360_v27, %v4379_v20  ;;  %v366_v18 = vshll.u32 %v363_v52, 16  ;;  %v1110_v46 = vshll.u32 %v7250_v0, %v4661_v57  ;;  %v1114_v33 = vshrl.u32 %v7252_v7, %v4699_v16 }
  0xda   : > { %7269 = vst [vmem:[#allocation42_spill] sm:$0xff] %v4711_v41  ;;  %v270_v25 = vadd.f32 %v4337_v34, %v269_v59  ;;  %v362_v31 = vmul.u32 %v360_v27, %v4371_v14  ;;  %v4745_v38 = vsel %vm964_vm12, %v4713_v10, 920167782  ;;  %v4749_v43 = vsel %vm964_vm12, %v960_v11, 1326507024 }
  0xdb   : > { %7270 = vst [vmem:[#allocation43_spill] sm:$0xff] %v4713_v10  ;;  %v1113_v41 = vshll.u32 %v7251_v54, %v4661_v57  ;;  %vm1119_vm15 = vcmp.lt.s32.totalorder %v4715_v15, 4  ;;  %v4754_v9 = vor.u32 %v1111_v48, %v1110_v46  ;;  %v1397_v34 = vand.u32 2139095040, %v4727_v8 }
  0xdc   : > { %7271 = vst [vmem:[#allocation44_spill] sm:$0xff] %v4715_v15  ;;  %v352_v27 = vsel %vm342_vm2, %v4447_v30, %v4461_v40  ;;  %vm370_vm3 = vc.u32 %v362_v31, %v366_v18  ;;  %vm1250_vm5 = vcmp.gt.s32.totalorder %v1249_v56, 0  ;;  %v368_v59 = vshll.u32 %v4734_v23, 16 }
  0xdd   : > { %7272 = vst [vmem:[#allocation45_spill] sm:$0xff] %v4719_v50  ;;  %v372_v11 = vadd.s32 %v366_v18, %v362_v31  ;;  %v346_v48 = vsel %vm344_vm7, %v4423_v2, 2102212464  ;;  %v365_v46 = vmul.u32 %v361_v39, %v4379_v20  ;;  %v7209_v13 = vmov 0  }
  0xde   : > { %7273 = vst [vmem:[#allocation46_spill] sm:$0xff] %v4723_v49  ;;  %v4762_v49 = vmul.f32 3.0, %v270_v25  ;;  %v371_v50 = vsel %vm370_vm3, 1, %v7209_v13  ;;  %v383_v30 = vshrl.u32 %v352_v27, 16  ;;  %v1251_v40 = vsel %vm1250_vm5, %v1249_v56, 0 }
  0xdf   : > { %7274 = vst [vmem:[#allocation47_spill] sm:$0xff] %v4727_v8  ;;  %vm374_vm11 = vc.u32 %v372_v11, %v368_v59  ;;  %v382_v8 = vand.u32 65535, %v352_v27  ;;  %v1398_v16 = vshrl.u32 %v1397_v34, 23  ;;  %v373_v57 = vadd.s32 %v371_v50, %v365_v46 }
  0xe0   : > { %7275 = vst [vmem:[#allocation48_spill] sm:$0xff] %v4731_v21  ;;  %v1115_v21 = vor.u32 %v1114_v33, %v1113_v41  ;;  %v375_v18 = vsel %vm374_vm11, 1, %v7209_v13  ;;  %v345_v41 = vsel %vm341_vm4, %v4549_v26, %v4418_v61  ;;  %v347_v2 = vsel %vm343_vm6, %v4421_v1, %v346_v48 }
  0xe1   : > { %7276 = vst [vmem:[#allocation49_spill] sm:$0xff] %v4745_v38  ;;  %v385_v39 = vmul.u32 %v383_v30, %v4371_v14  ;;  %v386_v33 = vmul.u32 %v382_v8, %v4379_v20  ;;  %v4782_v56 = vsel %vm1119_vm15, %v4754_v9, 920167782  ;;  %v1552_v25 = vand.u32 2139095040, %v4762_v49 }
  0xe2   : > { %7277 = vst [vmem:[#allocation50_spill] sm:$0xff] %v4749_v43  ;;  %v4786_v50 = vsel %vm1119_vm15, %v1115_v21, 1326507024  ;;  %v377_v61 = vadd.s32 %v375_v18, %v373_v57  ;;  %v4789_v26 = vshrl.u32 %v1251_v40, 5  ;;  %v4791_v31 = vand.u32 31, %v1251_v40 }
  0xe3   : > { %7278 = vst [vmem:[#allocation51_spill] sm:$0xff] %v4754_v9  ;;  %v384_v1 = vmul.u32 %v382_v8, %v4371_v14  ;;  %v388_v34 = vshll.u32 %v385_v39, 16  ;;  %v3990_v27 = vadd.s32 4294967169, %v1398_v16  ;;  %v348_v59 = vsel %vm342_vm2, %v345_v41, %v347_v2 }
  0xe4   : > { %7279 = vst [vmem:[#allocation52_spill] sm:$0xff] %v4762_v49  ;;  %v367_v11 = vshrl.u32 %v363_v52, 16  ;;  %v7213_v48 = vand.u32 2147483647, %v4350_v51  ;;  %v387_v21 = vmul.u32 %v383_v30, %v4379_v20  ;;  %v390_v46 = vshll.u32 %v386_v33, 16 }
  0xe5   : > { %7280 = vst [vmem:[#allocation53_spill] sm:$0xff] %v4782_v56  ;;  %vm392_vm4 = vc.u32 %v384_v1, %v388_v34  ;;  %v394_v13 = vadd.s32 %v388_v34, %v384_v1  ;;  %v369_v57 = vshrl.u32 %v4734_v23, 16  ;;  %v7283_v40 = vmov 0  }
  0xe6   : > { %7281 = vst [vmem:[#allocation54_spill] sm:$0xff] %v4786_v50  ;;  %v378_v18 = vadd.s32 %v377_v61, %v367_v11  ;;  %v393_v49 = vsel %vm392_vm4, 1, %v7283_v40  ;;  %v471_v14 = vand.u32 8388607, %v7213_v48  ;;  %v7284_v19 = vmov 683565275  }
  0xe7   : > { %7282 = vst [vmem:[#allocation55_spill] sm:$0xff] %v4791_v31  ;;  %v395_v16 = vadd.s32 %v393_v49, %v387_v21  ;;  %vm396_vm6 = vc.u32 %v394_v13, %v390_v46  ;;  %v481_v52 = vshll.u32 %v7284_v19, %v4425_v3  ;;  %v7285_v8 = vmov 2475754826  }
  0xe8   : > { %v482_v41 = vshrl.u32 %v7285_v8, %v4456_v35  ;;  %v397_v20 = vsel %vm396_vm6, 1, %v7283_v40  ;;  %v472_v30 = vor.u32 8388608, %v471_v14  ;;  %v484_v23 = vshll.u32 %v7285_v8, %v4425_v3 }
  0xe9   : > { %v7286_v2 = vmov 2131351028   ;;  %v389_v1 = vshrl.u32 %v385_v39, 16  ;;  %v391_v34 = vshrl.u32 %v386_v33, 16  ;;  %v399_v11 = vadd.s32 %v397_v20, %v395_v16 }
  0xea   : > { %v485_v61 = vshrl.u32 %v7286_v2, %v4456_v35  ;;  %v4811_v49 = vor.u32 %v482_v41, %v481_v52  ;;  %v4813_v21 = vadd.s32 %v378_v18, %v369_v57  ;;  %v487_v56 = vshll.u32 %v7286_v2, %v4425_v3 }
  0xeb   : > { %v488_v14 = vshrl.u32 %v7250_v0, %v4456_v35  ;;  %v4821_v9 = vadd.s32 %v394_v13, %v390_v46  ;;  %v400_v50 = vadd.s32 %v399_v11, %v389_v1  ;;  %vm496_vm7 = vcmp.lt.s32.totalorder %v4499_v22, 1 }
  0xec   : > { %v4815_v48 = vor.u32 %v485_v61, %v484_v23  ;;  %vm498_vm2 = vcmp.lt.s32.totalorder %v4499_v22, 3  ;;  %v4833_v57 = vshll.u32 %v472_v30, 8  ;;  %v4836_v13 = vsub.s32 32, %v4791_v31 }
  0xed   : > { %v489_v39 = vor.u32 %v488_v14, %v487_v56  ;;  %v510_v3 = vsel %vm498_vm2, %v4506_v45, %v4537_v60  ;;  %v1265_v46 = vshll.u32 %v7250_v0, %v4791_v31  ;;  %v1553_v18 = vshrl.u32 %v1552_v25, 23 }
  0xee   : > { %v504_v33 = vsel %vm496_vm7, %v4811_v49, %v4815_v48  ;;  %7287 = vst [vmem:[#allocation56_spill] sm:$0xff] %v4836_v13  ;;  %v401_v56 = vadd.s32 %v400_v50, %v391_v34  ;;  %vm404_vm3 = vc.u32 %v4813_v21, %v4821_v9  ;;  %vm497_vm5 = vcmp.lt.s32.totalorder %v4499_v22, 2 }
  0xef   : > { %v506_v16 = vsel %vm498_vm2, %v489_v39, %v4528_v62  ;;  %v508_v45 = vsel %vm496_vm7, %v4815_v48, %v489_v39  ;;  %v402_v60 = vmul.u32 %v4360_v4, %v348_v59  ;;  %v513_v41 = vand.u32 65535, %v4833_v57 }
  0xf0   : > { %v405_v52 = vadd.s32 1, %v401_v56  ;;  %v507_v25 = vsel %vm497_vm5, %v504_v33, %v506_v16  ;;  %v511_v50 = vsel %vm497_vm5, %v508_v45, %v510_v3  ;;  %v514_v20 = vshrl.u32 %v4833_v57, 16 }
  0xf1   : > { %v515_v30 = vand.u32 65535, %v511_v50  ;;  %v516_v23 = vshrl.u32 %v511_v50, 16  ;;  %v4858_v62 = vshll.u32 %v7251_v54, %v4791_v31  ;;  %v537_v1 = vand.u32 65535, %v507_v25 }
  0xf2   : > { %v406_v61 = vsel %vm404_vm3, %v405_v52, %v401_v56  ;;  %v538_v4 = vshrl.u32 %v507_v25, 16  ;;  %v1266_v59 = vshrl.u32 %v7251_v54, %v4836_v13  ;;  %v4864_v33 = vshrl.u32 %v7252_v7, %v4836_v13 }
  0xf3   : > { %v407_v34 = vadd.s32 %v406_v61, %v402_v60  ;;  %v518_v11 = vmul.u32 %v516_v23, %v513_v41  ;;  %v519_v14 = vmul.u32 %v515_v30, %v514_v20  ;;  %v4866_v3 = vadd.s32 1, %v3990_v27 }
  0xf4   : > { %v540_v16 = vmul.u32 %v538_v4, %v513_v41  ;;  %v541_v45 = vmul.u32 %v537_v1, %v514_v20  ;;  %v4868_v50 = vadd.s32 4294967169, %v1553_v18  ;;  %v517_v56 = vmul.u32 %v515_v30, %v513_v41 }
  0xf5   : > { %v408_v31 = vadd.s32 536870912, %v407_v34  ;;  %v521_v52 = vshll.u32 %v518_v11, 16  ;;  %v480_v25 = vshrl.u32 %v7284_v19, %v4456_v35  ;;  %v520_v15 = vmul.u32 %v516_v23, %v514_v20 }
  0xf6   : > { %v539_v60 = vmul.u32 %v537_v1, %v513_v41  ;;  %v543_v61 = vshll.u32 %v540_v16, 16  ;;  %v523_v54 = vshll.u32 %v519_v14, 16  ;;  %v545_v7 = vshll.u32 %v541_v45, 16 }
  0xf7   : > { %v409_v38 = vshrl.u32 %v408_v31, 30  ;;  %vm525_vm11 = vc.u32 %v517_v56, %v521_v52  ;;  %v527_v13 = vadd.s32 %v521_v52, %v517_v56  ;;  %vm311_vm6 = vcmp.lt.s32.totalorder %v4340_v37, 0 }
  0xf8   : > { %v526_v27 = vsel %vm525_vm11, 1, %v7283_v40  ;;  %vm547_vm4 = vc.u32 %v539_v60, %v543_v61  ;;  %v549_v10 = vadd.s32 %v543_v61, %v539_v60  ;;  %v542_v43 = vmul.u32 %v538_v4, %v514_v20 }
  0xf9   : > { %v410_v18 = vshll.u32 %v409_v38, 30  ;;  %v528_v30 = vadd.s32 %v526_v27, %v520_v15  ;;  %vm529_vm3 = vc.u32 %v527_v13, %v523_v54  ;;  %v501_v35 = vsel %vm499_vm14, %v489_v39, 2102212464 }
  0xfa   : > { %v530_v41 = vsel %vm529_vm3, 1, %v7283_v40  ;;  %v548_v31 = vsel %vm547_vm4, 1, %v7283_v40  ;;  %vm551_vm10 = vc.u32 %v549_v10, %v545_v7  ;;  %v522_v1 = vshrl.u32 %v518_v11, 16 }
  0xfb   : > { %v4878_v23 = vsub.s32 %v407_v34, %v410_v18  ;;  %v532_v56 = vadd.s32 %v530_v41, %v528_v30  ;;  %v550_v52 = vadd.s32 %v548_v31, %v542_v43  ;;  %v4880_v60 = vor.u32 %v1266_v59, %v1265_v46 }
  0xfc   : > { %v7288_v61 = vand.u32 2147483647, %v4340_v37  ;;  %v500_v15 = vsel %vm496_vm7, %v480_v25, %v4811_v49  ;;  %v552_v39 = vsel %vm551_vm10, 1, %v7283_v40  ;;  %v7225_v13 = vand.u32 2147483647, %v4362_v6 }
  0xfd   : > { %vm412_vm14 = vcmp.lt.s32.totalorder %v4878_v23, 0  ;;  %v413_v43 = vsub.s32 0, %v4878_v23  ;;  %v524_v46 = vshrl.u32 %v519_v14, 16  ;;  %v533_v20 = vadd.s32 %v532_v56, %v522_v1 }
  0xfe   : > { %vm4884_vm11 = vcmp.le.f32.partialorder %v7288_v61, 0.7853982  ;;  %v433_v4 = vsub.s32 4, %v409_v38  ;;  %v502_v59 = vsel %vm498_vm2, %v4815_v48, %v501_v35  ;;  %v544_v34 = vshrl.u32 %v540_v16, 16 }
  0xff   : > { %v554_v11 = vadd.s32 %v552_v39, %v550_v52  ;;  %vm1405_vm4 = vcmp.gt.s32.totalorder %v4866_v3, 0  ;;  %v414_v49 = vsel %vm412_vm14, %v413_v43, %v4878_v23  ;;  %v4900_v25 = vadd.s32 %v533_v20, %v524_v46 }
 0x100   : > { %v546_v27 = vshrl.u32 %v541_v45, 16  ;;  %v637_v18 = vshrl.u32 %v7285_v8, %v4531_v42  ;;  %v415_v30 = vclz %v414_v49  ;;  %v4904_v14 = vadd.s32 %v549_v10, %v545_v7 }
 0x101   : > { %v555_v41 = vadd.s32 %v554_v11, %v544_v34  ;;  %v640_v31 = vshrl.u32 %v7286_v2, %v4531_v42  ;;  %v503_v48 = vsel %vm497_vm5, %v500_v15, %v502_v59  ;;  %v626_v16 = vand.u32 8388607, %v7225_v13 }
 0x102   : > { %v636_v35 = vshll.u32 %v7284_v19, %v4508_v58  ;;  %v639_v45 = vshll.u32 %v7285_v8, %v4508_v58  ;;  %v3970_v1 = vadd.s32 4294967294, %v415_v30  ;;  %v434_v7 = vsel %vm311_vm6, %v433_v4, %v409_v38 }
 0x103   : > { %v556_v10 = vadd.s32 %v555_v41, %v546_v27  ;;  %vm559_vm10 = vc.u32 %v4900_v25, %v4904_v14  ;;  %v642_v52 = vshll.u32 %v7286_v2, %v4508_v58  ;;  %v643_v61 = vshrl.u32 %v7250_v0, %v4531_v42 }
 0x104   : > { %v4920_v56 = vor.u32 %v637_v18, %v636_v35  ;;  %v4922_v22 = vor.u32 %v640_v31, %v639_v45  ;;  %vm1274_vm7 = vcmp.lt.s32.totalorder %v4789_v26, 4  ;;  %v403_v15 = vadd.s32 %v4821_v9, %v4813_v21 }
 0x105   : > { %vm3971_vm2 = vcmp.lt.s32.totalorder %v3970_v1, 0  ;;  %v557_v38 = vmul.u32 %v4833_v57, %v503_v48  ;;  %v560_v39 = vadd.s32 1, %v556_v10  ;;  %v436_v46 = vsel %vm4884_vm11, 0, %v434_v7 }
 0x106   : > { %v418_v43 = vsel %vm3971_vm2, 0, %v3970_v1  ;;  %v627_v20 = vor.u32 8388608, %v626_v16  ;;  %v644_v4 = vor.u32 %v643_v61, %v642_v52  ;;  %vm651_vm5 = vcmp.lt.s32.totalorder %v4555_v5, 1 }
 0x107   : > { %v419_v59 = vsub.s32 32, %v418_v43  ;;  %v423_v58 = vsub.s32 4294967266, %v418_v43  ;;  %v561_v34 = vsel %vm559_vm10, %v560_v39, %v556_v10  ;;  %vm653_vm3 = vcmp.lt.s32.totalorder %v4555_v5, 3 }
 0x108   : > { %v562_v11 = vadd.s32 %v561_v34, %v557_v38  ;;  %v659_v9 = vsel %vm651_vm5, %v4920_v56, %v4922_v22  ;;  %v663_v21 = vsel %vm651_vm5, %v4922_v22, %v644_v4  ;;  %v420_v57 = vshll.u32 %v4878_v23, %v418_v43 }
 0x109   : > { %v421_v49 = vshrl.u32 %v403_v15, %v419_v59  ;;  %v424_v27 = vadd.s32 127, %v423_v58  ;;  %v661_v18 = vsel %vm653_vm3, %v644_v4, %v4632_v53  ;;  %vm652_vm14 = vcmp.lt.s32.totalorder %v4555_v5, 2 }
 0x10a   : > { %v563_v30 = vadd.s32 536870912, %v562_v11  ;;  %v665_v41 = vsel %vm653_vm3, %v4600_v47, %v4642_v63  ;;  %v4955_v31 = vshll.u32 %v627_v20, 8  ;;  %v4960_v23 = vsel %vm1405_vm4, %v4866_v3, 0 }
 0x10b   : > { %v422_v48 = vor.u32 %v421_v49, %v420_v57  ;;  %v425_v16 = vshll.u32 %v424_v27, 23  ;;  %v666_v53 = vsel %vm652_vm14, %v663_v21, %v665_v41  ;;  %v453_v35 = vadd.s32 3, %v436_v46 }
 0x10c   : > { %v4964_v45 = vshrl.u32 %v563_v30, 30  ;;  %v4968_v1 = vsel %vm652_vm14, %v659_v9, %v661_v18  ;;  %v670_v47 = vand.u32 65535, %v666_v53  ;;  %v668_v7 = vand.u32 65535, %v4955_v31 }
 0x10d   : > { %v426_v63 = vor.u32 4788187, %v425_v16  ;;  %v669_v10 = vshrl.u32 %v4955_v31, 16  ;;  %v671_v3 = vshrl.u32 %v666_v53, 16  ;;  %v4977_v61 = vsel %vm1274_vm7, %v4880_v60, 920167782 }
 0x10e   : > { %7291 = vst [vmem:[#allocation57_spill] sm:$0xff] %v4977_v61  ;;  %v4980_v15 = vadd.s32 1, %v4868_v50  ;;  %v565_v38 = vshll.u32 %v4964_v45, 30  ;;  %v429_v43 = vcvt.s32.f32 %v422_v48  ;;  %v4986_v59 = vand.u32 31, %v4960_v23 }
 0x10f   : > { %v427_v39 = vand.u32 2147483647, %v426_v63  ;;  %v673_v46 = vmul.u32 %v671_v3, %v668_v7  ;;  %v4983_v20 = vmul.u32 %v670_v47, %v669_v10  ;;  %v635_v34 = vshrl.u32 %v7284_v19, %v4531_v42 }
 0x110   : > { %v4988_v58 = vsub.s32 %v562_v11, %v565_v38  ;;  %v693_v9 = vshrl.u32 %v4968_v1, 16  ;;  %v4993_v50 = vand.u32 3, %v453_v35  ;;  %v672_v57 = vmul.u32 %v670_v47, %v668_v7 }
 0x111   : > { %v430_v21 = vmul.f32 %v429_v43, %v427_v39  ;;  %v676_v49 = vshll.u32 %v673_v46, 16  ;;  %v675_v18 = vmul.u32 %v671_v3, %v669_v10  ;;  %v692_v30 = vand.u32 65535, %v4968_v1 }
 0x112   : > { %vm567_vm4 = vcmp.lt.s32.totalorder %v4988_v58, 0  ;;  %v568_v27 = vsub.s32 0, %v4988_v58  ;;  %v678_v11 = vshll.u32 %v4983_v20, 16  ;;  %v656_v16 = vsel %vm654_vm0, %v644_v4, 2102212464 }
 0x113   : > { %v431_v41 = vxor.u32 2147483648, %v430_v21  ;;  %vm680_vm10 = vc.u32 %v672_v57, %v676_v49  ;;  %v682_v48 = vadd.s32 %v676_v49, %v672_v57  ;;  %v695_v35 = vmul.u32 %v693_v9, %v668_v7 }
 0x114   : > { %v569_v42 = vsel %vm567_vm4, %v568_v27, %v4988_v58  ;;  %v681_v53 = vsel %vm680_vm10, 1, %v7283_v40  ;;  %v558_v38 = vadd.s32 %v4904_v14, %v4900_v25  ;;  %v655_v4 = vsel %vm651_vm5, %v635_v34, %v4920_v56 }
 0x115   : > { %v432_v47 = vsel %vm311_vm6, %v431_v41, %v430_v21  ;;  %v570_v63 = vclz %v569_v42  ;;  %v683_v3 = vadd.s32 %v681_v53, %v675_v18  ;;  %vm684_vm2 = vc.u32 %v682_v48, %v678_v11 }
 0x116   : > { %v5008_v1 = vsel %vm4884_vm11, %v4340_v37, %v432_v47  ;;  %v696_v39 = vmul.u32 %v692_v30, %v669_v10  ;;  %vm466_vm0 = vcmp.lt.s32.totalorder %v4350_v51, 0  ;;  %v657_v54 = vsel %vm653_vm3, %v4922_v22, %v656_v16 }
 0x117   : > { %v437_v43 = vmul.f32 %v5008_v1, %v5008_v1  ;;  %v3973_v21 = vadd.s32 4294967294, %v570_v63  ;;  %v685_v57 = vsel %vm684_vm2, 1, %v7283_v40  ;;  %v588_v49 = vsub.s32 4, %v4964_v45 }
 0x118   : > { %v687_v25 = vadd.s32 %v685_v57, %v683_v3  ;;  %v694_v14 = vmul.u32 %v692_v30, %v668_v7  ;;  %v698_v27 = vshll.u32 %v695_v35, 16  ;;  %v677_v34 = vshrl.u32 %v673_v46, 16 }
 0x119   : > { %v438_v18 = vmul.f32 -0.001358992, %v437_v43  ;;  %v445_v56 = vmul.f32 -0.00019511016, %v437_v43  ;;  %vm3974_vm6 = vcmp.lt.s32.totalorder %v3973_v21, 0  ;;  %v700_v11 = vshll.u32 %v696_v39, 16 }
 0x11a   : > { %v573_v41 = vsel %vm3974_vm6, 0, %v3973_v21  ;;  %vm702_vm11 = vc.u32 %v694_v14, %v698_v27  ;;  %v704_v48 = vadd.s32 %v698_v27, %v694_v14  ;;  %v7292_v47 = vand.u32 2147483647, %v4350_v51 }
 0x11b   : > { %v439_v42 = vadd.f32 0.041655596, %v438_v18  ;;  %v446_v53 = vadd.f32 0.008332121, %v445_v56  ;;  %v574_v16 = vsub.s32 32, %v573_v41  ;;  %v697_v63 = vmul.u32 %v693_v9, %v669_v10 }
 0x11c   : > { %vm5025_vm5 = vcmp.le.f32.partialorder %v7292_v47, 0.7853982  ;;  %v578_v7 = vsub.s32 4294967266, %v573_v41  ;;  %v688_v30 = vadd.s32 %v687_v25, %v677_v34  ;;  %v703_v3 = vsel %vm702_vm11, 1, %v7283_v40 }
 0x11d   : > { %vm706_vm3 = vc.u32 %v704_v48, %v700_v11  ;;  %v440_v46 = vmul.f32 %v439_v42, %v437_v43  ;;  %v447_v21 = vmul.f32 %v446_v53, %v437_v43  ;;  %v576_v57 = vshrl.u32 %v558_v38, %v574_v16 }
 0x11e   : > { %v705_v13 = vadd.s32 %v703_v3, %v697_v63  ;;  %v575_v14 = vshll.u32 %v4988_v58, %v573_v41  ;;  %v579_v27 = vadd.s32 127, %v578_v7  ;;  %v679_v18 = vshrl.u32 %v4983_v20, 16 }
 0x11f   : > { %v707_v56 = vsel %vm706_vm3, 1, %v7283_v40  ;;  %v441_v47 = vadd.f32 -0.4999988, %v440_v46  ;;  %v448_v52 = vadd.f32 -0.16666654, %v447_v21  ;;  %v699_v61 = vshrl.u32 %v695_v35, 16 }
 0x120   : > { %v709_v10 = vadd.s32 %v707_v56, %v705_v13  ;;  %vm456_vm4 = vcmp.eq.s32.totalorder %v4993_v50, 0  ;;  %vm459_vm10 = vcmp.eq.s32.totalorder %v4993_v50, 2  ;;  %v577_v9 = vor.u32 %v576_v57, %v575_v14 }
 0x121   : > { %v580_v25 = vshll.u32 %v579_v27, 23  ;;  %v589_v38 = vsel %vm466_vm0, %v588_v49, %v4964_v45  ;;  %v5038_v58 = vadd.s32 %v688_v30, %v679_v18  ;;  %v442_v34 = vmul.f32 %v441_v47, %v437_v43 }
 0x122   : > { %v449_v20 = vmul.f32 %v448_v52, %v437_v43  ;;  %vm455_vm2 = vcmp.lt.s32.totalorder %v4993_v50, 2  ;;  %v701_v41 = vshrl.u32 %v696_v39, 16  ;;  %v710_v42 = vadd.s32 %v709_v10, %v699_v61 }
 0x123   : > { %vm452_vm6 = vweird.f32 %v4340_v37  ;;  %vm2799_vm11 = vcmask 523264   ;;  %v581_v13 = vor.u32 4788187, %v580_v25  ;;  %v658_v35 = vsel %vm652_vm14, %v655_v4, %v657_v54 }
 0x124   : > { %v5044_v53 = vadd.s32 %v704_v48, %v700_v11  ;;  %v443_v16 = vadd.f32 1.0, %v442_v34  ;;  %v450_v63 = vadd.f32 1.0, %v449_v20  ;;  %v711_v45 = vadd.s32 %v710_v42, %v701_v41 }
 0x125   : > { %v774_v49 = vand.u32 2147483647, %v4386_v28  ;;  %v582_v7 = vand.u32 2147483647, %v581_v13  ;;  %v584_v52 = vcvt.s32.f32 %v577_v9  ;;  %v591_v39 = vsel %vm5025_vm5, 0, %v589_v38 }
 0x126   : > { %vm714_vm3 = vc.u32 %v5038_v58, %v5044_v53  ;;  %v451_v61 = vmul.f32 %v450_v63, %v5008_v1  ;;  %v460_v43 = vxor.u32 2147483648, %v443_v16  ;;  %v715_v5 = vadd.s32 1, %v711_v45 }
 0x127   : > { %v792_v4 = vshrl.u32 %v7285_v8, %v4590_v12  ;;  %v585_v54 = vmul.f32 %v584_v52, %v582_v7  ;;  %v712_v11 = vmul.u32 %v4955_v31, %v658_v35  ;;  %v791_v48 = vshll.u32 %v7284_v19, %v4557_v29 }
 0x128   : > { %v795_v30 = vshrl.u32 %v7286_v2, %v4590_v12  ;;  %v457_v3 = vxor.u32 2147483648, %v451_v61  ;;  %v716_v46 = vsel %vm714_vm3, %v715_v5, %v711_v45  ;;  %v781_v21 = vand.u32 8388607, %v774_v49 }
 0x129   : > { %v794_v1 = vshll.u32 %v7285_v8, %v4557_v29  ;;  %v586_v57 = vxor.u32 2147483648, %v585_v54  ;;  %v717_v14 = vadd.s32 %v716_v46, %v712_v11  ;;  %v797_v27 = vshll.u32 %v7286_v2, %v4557_v29 }
 0x12a   : > { %v798_v31 = vshrl.u32 %v7250_v0, %v4590_v12  ;;  %v458_v18 = vsel %vm456_vm4, %v443_v16, %v457_v3  ;;  %v461_v56 = vsel %vm459_vm10, %v460_v43, %v451_v61  ;;  %v793_v47 = vor.u32 %v792_v4, %v791_v48 }
 0x12b   : > { %v796_v10 = vor.u32 %v795_v30, %v794_v1  ;;  %v462_v9 = vsel %vm455_vm2, %v458_v18, %v461_v56  ;;  %v587_v25 = vsel %vm466_vm0, %v586_v57, %v585_v54  ;;  %v718_v38 = vadd.s32 536870912, %v717_v14 }
 0x12c   : > { %v799_v34 = vor.u32 %v798_v31, %v797_v27  ;;  %v463_v29 = vsel %vm452_vm6, nan, %v462_v9  ;;  %v5080_v20 = vsel %vm5025_vm5, %v4350_v51, %v587_v25  ;;  %v608_v41 = vadd.s32 3, %v591_v39 }
 0x12d   : > { %v782_v42 = vor.u32 8388608, %v781_v21  ;;  %4017 = vmatmul.msk.f32.vlgmr.msrb.gmra.mxu1 %vm2799_vm11, %v463_v29  ;;  %v592_v50 = vmul.f32 %v5080_v20, %v5080_v20  ;;  %v5085_v13 = vshrl.u32 %v718_v38, 30  ;;  %vm806_vm14 = vcmp.lt.s32.totalorder %v4603_v17, 1 }
 0x12e   : > { %vm808_vm0 = vcmp.lt.s32.totalorder %v4603_v17, 3  ;;  %vm807_vm4 = vcmp.lt.s32.totalorder %v4603_v17, 2  ;;  %v814_v37 = vsel %vm806_vm14, %v793_v47, %v796_v10  ;;  %v818_v22 = vsel %vm806_vm14, %v796_v10, %v799_v34 }
 0x12f   : > { %v820_v35 = vsel %vm808_vm0, %v4644_v55, %v4678_v44  ;;  %v593_v16 = vmul.f32 -0.001358992, %v592_v50  ;;  %v600_v63 = vmul.f32 -0.00019511016, %v592_v50  ;;  %v720_v45 = vshll.u32 %v5085_v13, 30 }
 0x130   : > { %v816_v7 = vsel %vm808_vm0, %v799_v34, %v4674_v36  ;;  %v7295_v52 = vor.u32 %v4864_v33, %v4858_v62  ;;  %v5110_v61 = vshrl.u32 %v4960_v23, 5  ;;  %v821_v55 = vsel %vm807_vm4, %v818_v22, %v820_v35 }
 0x131   : > { %v5114_v44 = vshll.u32 %v782_v42, 8  ;;  %v5117_v43 = vsub.s32 32, %v4986_v59  ;;  %v594_v5 = vadd.f32 0.041655596, %v593_v16  ;;  %v601_v36 = vadd.f32 0.008332121, %v600_v63 }
 0x132   : > { %v5107_v39 = vsel %vm1274_vm7, %v7295_v52, 1326507024  ;;  %v5119_v4 = vsub.s32 %v717_v14, %v720_v45  ;;  %v5123_v62 = vshll.u32 %v7250_v0, %v4986_v59  ;;  %v609_v33 = vand.u32 3, %v608_v41 }
 0x133   : > { %v5127_v23 = vsel %vm807_vm4, %v814_v37, %v816_v7  ;;  %v825_v54 = vand.u32 65535, %v821_v55  ;;  %v595_v11 = vmul.f32 %v594_v5, %v592_v50  ;;  %v602_v48 = vmul.f32 %v601_v36, %v592_v50 }
 0x134   : > { %vm722_vm5 = vcmp.lt.s32.totalorder %v5119_v4, 0  ;;  %v723_v30 = vsub.s32 0, %v5119_v4  ;;  %v790_v3 = vshrl.u32 %v7284_v19, %v4590_v12  ;;  %v823_v46 = vand.u32 65535, %v5114_v44 }
 0x135   : > { %v824_v21 = vshrl.u32 %v5114_v44, 16  ;;  %v826_v1 = vshrl.u32 %v821_v55, 16  ;;  %v596_v57 = vadd.f32 -0.4999988, %v595_v11  ;;  %v603_v14 = vadd.f32 -0.16666654, %v602_v48 }
 0x136   : > { %v724_v27 = vsel %vm722_vm5, %v723_v30, %v5119_v4  ;;  %v811_v31 = vsel %vm809_vm9, %v799_v34, 2102212464  ;;  %vm611_vm10 = vcmp.eq.s32.totalorder %v609_v33, 0  ;;  %vm614_vm2 = vcmp.eq.s32.totalorder %v609_v33, 2 }
 0x137   : > { %v725_v18 = vclz %v724_v27  ;;  %v828_v56 = vmul.u32 %v826_v1, %v823_v46  ;;  %v5138_v9 = vmul.u32 %v825_v54, %v824_v21  ;;  %v848_v12 = vshrl.u32 %v5127_v23, 16 }
 0x138   : > { %v597_v25 = vmul.f32 %v596_v57, %v592_v50  ;;  %v604_v38 = vmul.f32 %v603_v14, %v592_v50  ;;  %vm610_vm6 = vcmp.lt.s32.totalorder %v609_v33, 2  ;;  %v713_v29 = vadd.s32 %v5044_v53, %v5038_v58 }
 0x139   : > { %v5145_v41 = vsel %vm806_vm14, %v790_v3, %v793_v47  ;;  %vm607_vm9 = vweird.f32 %v4350_v51  ;;  %v3976_v34 = vadd.s32 4294967294, %v725_v18  ;;  %v743_v42 = vsub.s32 4, %v5085_v13 }
 0x13a   : > { %v5151_v37 = vsel %vm808_vm0, %v796_v10, %v811_v31  ;;  %v847_v22 = vand.u32 65535, %v5127_v23  ;;  %v598_v50 = vadd.f32 1.0, %v597_v25  ;;  %v605_v35 = vadd.f32 1.0, %v604_v38 }
 0x13b   : > { %v827_v16 = vmul.u32 %v825_v54, %v823_v46  ;;  %v831_v63 = vshll.u32 %v828_v56, 16  ;;  %vm621_vm3 = vcmp.lt.s32.totalorder %v4362_v6, 0  ;;  %vm3977_vm5 = vcmp.lt.s32.totalorder %v3976_v34, 0 }
 0x13c   : > { %v830_v58 = vmul.u32 %v826_v1, %v824_v21  ;;  %v833_v53 = vshll.u32 %v5138_v9, 16  ;;  %v850_v47 = vmul.u32 %v848_v12, %v823_v46  ;;  %v606_v45 = vmul.f32 %v605_v35, %v5080_v20 }
 0x13d   : > { %v615_v7 = vxor.u32 2147483648, %v598_v50  ;;  %v728_v52 = vsel %vm3977_vm5, 0, %v3976_v34  ;;  %vm835_vm14 = vc.u32 %v827_v16, %v831_v63  ;;  %v832_v5 = vshrl.u32 %v828_v56, 16 }
 0x13e   : > { %v729_v10 = vsub.s32 32, %v728_v52  ;;  %v733_v55 = vsub.s32 4294967266, %v728_v52  ;;  %v836_v36 = vsel %vm835_vm14, 1, %v7283_v40  ;;  %v612_v23 = vxor.u32 2147483648, %v606_v45 }
 0x13f   : > { %v837_v54 = vadd.s32 %v831_v63, %v827_v16  ;;  %v838_v11 = vadd.s32 %v836_v36, %v830_v58  ;;  %v851_v48 = vmul.u32 %v847_v22, %v824_v21  ;;  %v730_v30 = vshll.u32 %v5119_v4, %v728_v52 }
 0x140   : > { %v731_v3 = vshrl.u32 %v713_v29, %v729_v10  ;;  %v734_v1 = vadd.s32 127, %v733_v55  ;;  %v853_v57 = vshll.u32 %v850_v47, 16  ;;  %v613_v14 = vsel %vm611_vm10, %v598_v50, %v612_v23 }
 0x141   : > { %v616_v20 = vsel %vm614_vm2, %v615_v7, %v606_v45  ;;  %vm839_vm0 = vc.u32 %v837_v54, %v833_v53  ;;  %v849_v27 = vmul.u32 %v847_v22, %v823_v46  ;;  %v852_v4 = vmul.u32 %v848_v12, %v824_v21  ;;  %v7296_v12 = vld [vmem:[#allocation11_spill] sm:$0xff] }
 0x142   : > { %v617_v31 = vsel %vm610_vm6, %v613_v14, %v616_v20  ;;  %v732_v18 = vor.u32 %v731_v3, %v730_v30  ;;  %v735_v56 = vshll.u32 %v734_v1, 23  ;;  %v840_v25 = vsel %vm839_vm0, 1, %v7283_v40  ;;  %v7300_v30 = vld [vmem:[#allocation30_spill] sm:$0xff] }
 0x143   : > { %v618_v38 = vsel %vm607_vm9, nan, %v617_v31  ;;  %v842_v34 = vadd.s32 %v840_v25, %v838_v11  ;;  %vm857_vm5 = vc.u32 %v849_v27, %v853_v57  ;;  %v855_v50 = vshll.u32 %v851_v48, 16 }
 0x144   : > { %4018 = vmatmul.msk.f32.gmra.mxu1 %vm2799_vm11, %v618_v38  ;;  %v736_v29 = vor.u32 4788187, %v735_v56  ;;  %v858_v35 = vsel %vm857_vm5, 1, %v7283_v40  ;;  %v859_v16 = vadd.s32 %v853_v57, %v849_v27  ;;  %v744_v33 = vsel %vm621_vm3, %v743_v42, %v5085_v13  ;;  %v7301_v38 = vld [vmem:[#allocation50_spill] sm:$0xff] }
 0x145   : > { %v834_v46 = vshrl.u32 %v5138_v9, 16  ;;  %v843_v22 = vadd.s32 %v842_v34, %v832_v5  ;;  %v860_v63 = vadd.s32 %v858_v35, %v852_v4  ;;  %vm1560_vm10 = vcmp.gt.s32.totalorder %v4980_v15, 0  ;;  %v7302_v34 = vld [vmem:[#allocation43_spill] sm:$0xff] }
 0x146   : > { %v737_v51 = vand.u32 2147483647, %v736_v29  ;;  %v739_v21 = vcvt.s32.f32 %v732_v18  ;;  %vm861_vm2 = vc.u32 %v859_v16, %v855_v50  ;;  %v929_v58 = vand.u32 2147483647, %v7296_v12 }
 0x147   : > { %v7297_v53 = vand.u32 2147483647, %v4362_v6  ;;  %v5179_v7 = vadd.s32 %v843_v22, %v834_v46  ;;  %v854_v13 = vshrl.u32 %v850_v47, 16  ;;  %v862_v9 = vsel %vm861_vm2, 1, %v7283_v40 }
 0x148   : > { %v740_v42 = vmul.f32 %v739_v21, %v737_v51  ;;  %v5182_v52 = vadd.s32 %v859_v16, %v855_v50  ;;  %v864_v10 = vadd.s32 %v862_v9, %v860_v63  ;;  %v936_v55 = vand.u32 8388607, %v929_v58  ;;  %v7304_v9 = vld [vmem:[#allocation49_spill] sm:$0xff] }
 0x149   : > { %vm5175_vm6 = vcmp.le.f32.partialorder %v7297_v53, 0.7853982  ;;  %v813_v36 = vsel %vm807_vm4, %v5145_v41, %v5151_v37  ;;  %v856_v23 = vshrl.u32 %v851_v48, 16  ;;  %v947_v47 = vshrl.u32 %v7285_v8, %v4654_v24 }
 0x14a   : > { %v746_v5 = vsel %vm5175_vm6, 0, %v744_v33  ;;  %v741_v54 = vxor.u32 2147483648, %v740_v42  ;;  %v865_v11 = vadd.s32 %v864_v10, %v854_v13  ;;  %vm869_vm9 = vc.u32 %v5179_v7, %v5182_v52 }
 0x14b   : > { %v946_v3 = vshll.u32 %v7284_v19, %v7300_v30  ;;  %v949_v1 = vshll.u32 %v7285_v8, %v7300_v30  ;;  %v950_v57 = vshrl.u32 %v7286_v2, %v4654_v24  ;;  %v952_v17 = vshll.u32 %v7286_v2, %v7300_v30 }
 0x14c   : > { %v953_v41 = vshrl.u32 %v7250_v0, %v4654_v24  ;;  %v742_v37 = vsel %vm621_vm3, %v741_v54, %v740_v42  ;;  %v866_v48 = vadd.s32 %v865_v11, %v856_v23  ;;  %v937_v14 = vor.u32 8388608, %v936_v55 }
 0x14d   : > { %v5208_v20 = vor.u32 %v947_v47, %v946_v3  ;;  %v745_v27 = vsel %vm5175_vm6, %v4362_v6, %v742_v37  ;;  %v5213_v31 = vor.u32 %v950_v57, %v949_v1  ;;  %vm963_vm4 = vcmp.lt.s32.totalorder %v4685_v32, 3 }
 0x14e   : > { %v954_v18 = vor.u32 %v953_v41, %v952_v17  ;;  %v747_v56 = vmul.f32 %v745_v27, %v745_v27  ;;  %v870_v25 = vadd.s32 1, %v866_v48  ;;  %vm961_vm14 = vcmp.lt.s32.totalorder %v4685_v32, 1 }
 0x14f   : > { %v975_v4 = vsel %vm963_vm4, %v7302_v34, %v7301_v38  ;;  %v7303_v29 = vmov 920167782   ;;  %v763_v35 = vadd.s32 3, %v746_v5  ;;  %v867_v16 = vmul.u32 %v5114_v44, %v813_v36 }
 0x150   : > { %v5223_v50 = vshll.u32 %v7303_v29, %v4986_v59  ;;  %v973_v33 = vsel %vm961_vm14, %v5213_v31, %v954_v18  ;;  %v748_v46 = vmul.f32 -0.001358992, %v747_v56  ;;  %v755_v22 = vmul.f32 -0.00019511016, %v747_v56 }
 0x151   : > { %v871_v63 = vsel %vm869_vm9, %v870_v25, %v866_v48  ;;  %vm962_vm3 = vcmp.lt.s32.totalorder %v4685_v32, 2  ;;  %v1561_v51 = vsel %vm1560_vm10, %v4980_v15, 0  ;;  %v969_v44 = vsel %vm961_vm14, %v5208_v20, %v5213_v31 }
 0x152   : > { %v872_v21 = vadd.s32 %v871_v63, %v867_v16  ;;  %v976_v53 = vsel %vm962_vm3, %v973_v33, %v975_v4  ;;  %v749_v45 = vadd.f32 0.041655596, %v748_v46  ;;  %v756_v13 = vadd.f32 0.008332121, %v755_v22 }
 0x153   : > { %v971_v42 = vsel %vm963_vm4, %v954_v18, %v7304_v9  ;;  %v5245_v10 = vshll.u32 %v937_v14, 8  ;;  %v764_v55 = vand.u32 3, %v763_v35  ;;  %v980_v15 = vand.u32 65535, %v976_v53 }
 0x154   : > { %v873_v5 = vadd.s32 536870912, %v872_v21  ;;  %v981_v36 = vshrl.u32 %v976_v53, 16  ;;  %v5249_v23 = vshrl.u32 %v7303_v29, %v5117_v43  ;;  %v750_v47 = vmul.f32 %v749_v45, %v747_v56 }
 0x155   : > { %v757_v54 = vmul.f32 %v756_v13, %v747_v56  ;;  %v978_v11 = vand.u32 65535, %v5245_v10  ;;  %v7305_v30 = vmov 1326507024   ;;  %v5256_v1 = vshrl.u32 %v1561_v51, 5 }
 0x156   : > { %v5254_v3 = vshrl.u32 %v7305_v30, %v5117_v43  ;;  %v5258_v57 = vshrl.u32 %v873_v5, 30  ;;  %v5262_v17 = vsel %vm962_vm3, %v969_v44, %v971_v42  ;;  %v751_v41 = vadd.f32 -0.4999988, %v750_v47 }
 0x157   : > { %v758_v37 = vadd.f32 -0.16666654, %v757_v54  ;;  %v979_v48 = vshrl.u32 %v5245_v10, 16  ;;  %v5265_v14 = vmul.u32 %v981_v36, %v978_v11  ;;  %v5267_v25 = vand.u32 31, %v1561_v51 }
 0x158   : > { %vm766_vm0 = vcmp.eq.s32.totalorder %v764_v55, 0  ;;  %v875_v38 = vshll.u32 %v5258_v57, 30  ;;  %v982_v34 = vmul.u32 %v980_v15, %v978_v11  ;;  %v752_v4 = vmul.f32 %v751_v41, %v747_v56 }
 0x159   : > { %v759_v35 = vmul.f32 %v758_v37, %v747_v56  ;;  %vm765_vm5 = vcmp.lt.s32.totalorder %v764_v55, 2  ;;  %v5270_v16 = vmul.u32 %v980_v15, %v979_v48  ;;  %v986_v33 = vshll.u32 %v5265_v14, 16 }
 0x15a   : > { %vm762_vm10 = vweird.f32 %v4362_v6  ;;  %vm769_vm2 = vcmp.eq.s32.totalorder %v764_v55, 2  ;;  %v5274_v46 = vsub.s32 %v872_v21, %v875_v38  ;;  %v966_v22 = vsel %vm964_vm12, %v954_v18, 2102212464  ;;  %v7306_v38 = vld [vmem:[#allocation15_spill] sm:$0xff] }
 0x15b   : > { %v1003_v63 = vshrl.u32 %v5262_v17, 16  ;;  %v753_v51 = vadd.f32 1.0, %v752_v4  ;;  %v760_v44 = vadd.f32 1.0, %v759_v35  ;;  %vm990_vm6 = vc.u32 %v982_v34, %v986_v33 }
 0x15c   : > { %v1002_v56 = vand.u32 65535, %v5262_v17  ;;  %vm877_vm9 = vcmp.lt.s32.totalorder %v5274_v46, 0  ;;  %v878_v53 = vsub.s32 0, %v5274_v46  ;;  %v985_v45 = vmul.u32 %v981_v36, %v979_v48 }
 0x15d   : > { %v991_v13 = vsel %vm990_vm6, 1, %v7283_v40  ;;  %v761_v9 = vmul.f32 %v760_v44, %v745_v27  ;;  %v770_v21 = vxor.u32 2147483648, %v753_v51  ;;  %v988_v42 = vshll.u32 %v5270_v16, 16 }
 0x15e   : > { %v992_v5 = vadd.s32 %v986_v33, %v982_v34  ;;  %v879_v18 = vsel %vm877_vm9, %v878_v53, %v5274_v46  ;;  %v945_v15 = vshrl.u32 %v7284_v19, %v4654_v24  ;;  %v993_v47 = vadd.s32 %v991_v13, %v985_v45 }
 0x15f   : > { %v1005_v54 = vmul.u32 %v1003_v63, %v978_v11  ;;  %v767_v17 = vxor.u32 2147483648, %v761_v9  ;;  %vm776_vm12 = vcmp.lt.s32.totalorder %v4386_v28, 0  ;;  %v868_v36 = vadd.s32 %v5182_v52, %v5179_v7 }
 0x160   : > { %v880_v41 = vclz %v879_v18  ;;  %vm994_vm6 = vc.u32 %v992_v5, %v988_v42  ;;  %v965_v27 = vsel %vm961_vm14, %v945_v15, %v5208_v20  ;;  %v967_v37 = vsel %vm963_vm4, %v5213_v31, %v966_v22 }
 0x161   : > { %v995_v24 = vsel %vm994_vm6, 1, %v7283_v40  ;;  %v1084_v34 = vand.u32 2147483647, %v7306_v38  ;;  %v768_v4 = vsel %vm766_vm0, %v753_v51, %v767_v17  ;;  %v771_v35 = vsel %vm769_vm2, %v770_v21, %v761_v9 }
 0x162   : > { %v3979_v33 = vadd.s32 4294967294, %v880_v41  ;;  %v1006_v7 = vmul.u32 %v1002_v56, %v979_v48  ;;  %v772_v52 = vsel %vm765_vm5, %v768_v4, %v771_v35  ;;  %v997_v44 = vadd.s32 %v995_v24, %v993_v47  ;;  %v7309_v4 = vld [vmem:[#allocation34_spill] sm:$0xff] }
 0x163   : > { %v1004_v53 = vmul.u32 %v1002_v56, %v978_v11  ;;  %v1008_v45 = vshll.u32 %v1005_v54, 16  ;;  %v773_v20 = vsel %vm762_vm10, nan, %v772_v52  ;;  %v898_v31 = vsub.s32 4, %v5258_v57 }
 0x164   : > { %vm3980_vm14 = vcmp.lt.s32.totalorder %v3979_v33, 0  ;;  %v987_v22 = vshrl.u32 %v5265_v14, 16  ;;  %4019 = vmatmul.msk.f32.gmra.mxu1 %vm2799_vm11, %v773_v20  ;;  %v1010_v13 = vshll.u32 %v1006_v7, 16  ;;  %v968_v11 = vsel %vm962_vm3, %v965_v27, %v967_v37 }
 0x165   : > { %v883_v51 = vsel %vm3980_vm14, 0, %v3979_v33  ;;  %vm1012_vm4 = vc.u32 %v1004_v53, %v1008_v45  ;;  %v1014_v9 = vadd.s32 %v1008_v45, %v1004_v53  ;;  %v1007_v56 = vmul.u32 %v1003_v63, %v979_v48  ;;  %v7310_v33 = vld [vmem:[#allocation39_spill] sm:$0xff] }
 0x166   : > { %v884_v21 = vsub.s32 32, %v883_v51  ;;  %v888_v55 = vsub.s32 4294967266, %v883_v51  ;;  %v885_v6 = vshll.u32 %v5274_v46, %v883_v51  ;;  %v998_v42 = vadd.s32 %v997_v44, %v987_v22 }
 0x167   : > { %v1013_v5 = vsel %vm1012_vm4, 1, %v7283_v40  ;;  %vm1016_vm0 = vc.u32 %v1014_v9, %v1010_v13  ;;  %vm5313_vm5 = vcmp.le.f32.partialorder %v774_v49, 0.7853982  ;;  %v899_v32 = vsel %vm776_vm12, %v898_v31, %v5258_v57 }
 0x168   : > { %v886_v18 = vshrl.u32 %v868_v36, %v884_v21  ;;  %v889_v14 = vadd.s32 127, %v888_v55  ;;  %v1015_v15 = vadd.s32 %v1013_v5, %v1007_v56  ;;  %v1017_v47 = vsel %vm1016_vm0, 1, %v7283_v40  ;;  %v7311_v56 = vld [vmem:[#allocation44_spill] sm:$0xff]  ;;  %v7313_v5 = vld [vmem:[#allocation51_spill] sm:$0xff] }
 0x169   : > { %v989_v48 = vshrl.u32 %v5270_v16, 16  ;;  %v1009_v46 = vshrl.u32 %v1005_v54, 16  ;;  %v1091_v63 = vand.u32 8388607, %v1084_v34  ;;  %v1011_v27 = vshrl.u32 %v1006_v7, 16 }
 0x16a   : > { %v887_v36 = vor.u32 %v886_v18, %v885_v6  ;;  %v890_v41 = vshll.u32 %v889_v14, 23  ;;  %v1019_v37 = vadd.s32 %v1017_v47, %v1015_v15  ;;  %v1101_v35 = vshll.u32 %v7284_v19, %v7309_v4  ;;  %v7314_v47 = vld [vmem:[#allocation53_spill] sm:$0xff] }
 0x16b   : > { %v5323_v24 = vadd.s32 %v998_v42, %v989_v48  ;;  %v1092_v49 = vor.u32 8388608, %v1091_v63  ;;  %v1102_v52 = vshrl.u32 %v7285_v8, %v7310_v33  ;;  %v1104_v16 = vshll.u32 %v7285_v8, %v7309_v4  ;;  %v7312_v42 = vld [vmem:[#allocation54_spill] sm:$0xff] }
 0x16c   : > { %v891_v57 = vor.u32 4788187, %v890_v41  ;;  %v1020_v44 = vadd.s32 %v1019_v37, %v1009_v46  ;;  %v1105_v54 = vshrl.u32 %v7286_v2, %v7310_v33  ;;  %v5333_v53 = vadd.s32 %v1014_v9, %v1010_v13 }
 0x16d   : > { %v5335_v7 = vor.u32 %v1102_v52, %v1101_v35  ;;  %v1107_v45 = vshll.u32 %v7286_v2, %v7309_v4  ;;  %v1108_v20 = vshrl.u32 %v7250_v0, %v7310_v33  ;;  %v894_v22 = vcvt.s32.f32 %v887_v36 }
 0x16e   : > { %v892_v31 = vand.u32 2147483647, %v891_v57  ;;  %v1021_v51 = vadd.s32 %v1020_v44, %v1011_v27  ;;  %v5341_v21 = vor.u32 %v1105_v54, %v1104_v16  ;;  %vm1024_vm3 = vc.u32 %v5323_v24, %v5333_v53 }
 0x16f   : > { %v1109_v55 = vor.u32 %v1108_v20, %v1107_v45  ;;  %vm1118_vm10 = vcmp.lt.s32.totalorder %v7311_v56, 3  ;;  %v5346_v13 = vshll.u32 %v1092_v49, 8  ;;  %vm1116_vm2 = vcmp.lt.s32.totalorder %v7311_v56, 1 }
 0x170   : > { %v895_v9 = vmul.f32 %v894_v22, %v892_v31  ;;  %v1025_v6 = vadd.s32 1, %v1021_v51  ;;  %v1130_v18 = vsel %vm1118_vm10, %v7313_v5, %v7312_v42  ;;  %v1022_v14 = vmul.u32 %v5245_v10, %v968_v11 }
 0x171   : > { %v1124_v15 = vsel %vm1116_vm2, %v5335_v7, %v5341_v21  ;;  %v1126_v48 = vsel %vm1118_vm10, %v1109_v55, %v7314_v47  ;;  %v1128_v46 = vsel %vm1116_vm2, %v5341_v21, %v1109_v55  ;;  %v901_v36 = vsel %vm5313_vm5, 0, %v899_v32 }
 0x172   : > { %v896_v63 = vxor.u32 2147483648, %v895_v9  ;;  %v1026_v41 = vsel %vm1024_vm3, %v1025_v6, %v1021_v51  ;;  %vm1117_vm9 = vcmp.lt.s32.totalorder %v7311_v56, 2  ;;  %v5369_v10 = vor.u32 %v5249_v23, %v5123_v62 }
 0x173   : > { %v1027_v11 = vadd.s32 %v1026_v41, %v1022_v14  ;;  %v1131_v27 = vsel %vm1117_vm9, %v1128_v46, %v1130_v18  ;;  %v1133_v37 = vand.u32 65535, %v5346_v13  ;;  %v5378_v4 = vsel %vm1117_vm9, %v1124_v15, %v1126_v48 }
 0x174   : > { %v897_v49 = vsel %vm776_vm12, %v896_v63, %v895_v9  ;;  %v1135_v32 = vand.u32 65535, %v1131_v27  ;;  %v1136_v35 = vshrl.u32 %v1131_v27, 16  ;;  %v918_v23 = vadd.s32 3, %v901_v36 }
 0x175   : > { %v5383_v62 = vsel %vm5313_vm5, %v4386_v28, %v897_v49  ;;  %v1028_v52 = vadd.s32 536870912, %v1027_v11  ;;  %v1134_v57 = vshrl.u32 %v5346_v13, 16  ;;  %v1425_v44 = vor.u32 %v5254_v3, %v5223_v50 }
 0x176   : > { %v5389_v16 = vsub.s32 32, %v5267_v25  ;;  %v902_v54 = vmul.f32 %v5383_v62, %v5383_v62  ;;  %v1138_v45 = vmul.u32 %v1136_v35, %v1133_v37  ;;  %v5395_v20 = vshll.u32 %v7250_v0, %v5267_v25 }
 0x177   : > { %v5397_v17 = vshrl.u32 %v1028_v52, 30  ;;  %v5399_v31 = vmul.u32 %v1135_v32, %v1134_v57  ;;  %v1158_v22 = vshrl.u32 %v5378_v4, 16  ;;  %v1137_v6 = vmul.u32 %v1135_v32, %v1133_v37 }
 0x178   : > { %v903_v51 = vmul.f32 -0.001358992, %v902_v54  ;;  %v910_v9 = vmul.f32 -0.00019511016, %v902_v54  ;;  %v1141_v42 = vshll.u32 %v1138_v45, 16  ;;  %v5402_v5 = vand.u32 3, %v918_v23 }
 0x179   : > { %v1030_v18 = vshll.u32 %v5397_v17, 30  ;;  %v1140_v14 = vmul.u32 %v1136_v35, %v1134_v57  ;;  %v1157_v15 = vand.u32 65535, %v5378_v4  ;;  %v1143_v36 = vshll.u32 %v5399_v31, 16 }
 0x17a   : > { %v904_v47 = vadd.f32 0.041655596, %v903_v51  ;;  %v911_v48 = vadd.f32 0.008332121, %v910_v9  ;;  %vm1145_vm12 = vc.u32 %v1137_v6, %v1141_v42  ;;  %v1147_v46 = vadd.s32 %v1141_v42, %v1137_v6 }
 0x17b   : > { %v5406_v63 = vsub.s32 %v1027_v11, %v1030_v18  ;;  %v1146_v41 = vsel %vm1145_vm12, 1, %v7283_v40  ;;  %v5410_v27 = vmul.u32 %v1158_v22, %v1133_v37  ;;  %v5414_v49 = vshll.u32 %v7303_v29, %v5267_v25 }
 0x17c   : > { %v905_v32 = vmul.f32 %v904_v47, %v902_v54  ;;  %v912_v35 = vmul.f32 %v911_v48, %v902_v54  ;;  %v1148_v23 = vadd.s32 %v1146_v41, %v1140_v14  ;;  %v1121_v11 = vsel %vm1119_vm15, %v1109_v55, 2102212464 }
 0x17d   : > { %vm1032_vm6 = vcmp.lt.s32.totalorder %v5406_v63, 0  ;;  %v1033_v4 = vsub.s32 0, %v5406_v63  ;;  %vm1149_vm14 = vc.u32 %v1147_v46, %v1143_v36  ;;  %v1100_v9 = vshrl.u32 %v7284_v19, %v7310_v33 }
 0x17e   : > { %v906_v52 = vadd.f32 -0.4999988, %v905_v32  ;;  %v913_v51 = vadd.f32 -0.16666654, %v912_v35  ;;  %v1150_v6 = vsel %vm1149_vm14, 1, %v7283_v40  ;;  %vm921_vm4 = vcmp.eq.s32.totalorder %v5402_v5, 0 }
 0x17f   : > { %vm924_vm0 = vcmp.eq.s32.totalorder %v5402_v5, 2  ;;  %v1034_v42 = vsel %vm1032_vm6, %v1033_v4, %v5406_v63  ;;  %v1152_v18 = vadd.s32 %v1150_v6, %v1148_v23  ;;  %v1161_v14 = vmul.u32 %v1157_v15, %v1134_v57 }
 0x180   : > { %v1163_v47 = vshll.u32 %v5410_v27, 16  ;;  %v907_v48 = vmul.f32 %v906_v52, %v902_v54  ;;  %v914_v55 = vmul.f32 %v913_v51, %v902_v54  ;;  %vm920_vm15 = vcmp.lt.s32.totalorder %v5402_v5, 2 }
 0x181   : > { %v1023_v46 = vadd.s32 %v5333_v53, %v5323_v24  ;;  %v1035_v33 = vclz %v1034_v42  ;;  %vm917_vm5 = vweird.f32 %v4386_v28  ;;  %v1120_v36 = vsel %vm1116_vm2, %v1100_v9, %v5335_v7  ;;  %v7318_v28 = vld [vmem:[#allocation56_spill] sm:$0xff] }
 0x182   : > { %v1122_v41 = vsel %vm1118_vm10, %v5341_v21, %v1121_v11  ;;  %v1142_v32 = vshrl.u32 %v1138_v45, 16  ;;  %v1159_v35 = vmul.u32 %v1157_v15, %v1133_v37  ;;  %v908_v23 = vadd.f32 1.0, %v907_v48 }
 0x183   : > { %v915_v54 = vadd.f32 1.0, %v914_v55  ;;  %v3982_v4 = vadd.s32 4294967294, %v1035_v33  ;;  %v1162_v52 = vmul.u32 %v1158_v22, %v1134_v57  ;;  %vm931_vm3 = vcmp.lt.s32.totalorder %v7296_v12, 0 }
 0x184   : > { %v1153_v24 = vadd.s32 %v1152_v18, %v1142_v32  ;;  %v1165_v53 = vshll.u32 %v1161_v14, 16  ;;  %vm1167_vm12 = vc.u32 %v1159_v35, %v1163_v47  ;;  %v1169_v51 = vadd.s32 %v1163_v47, %v1159_v35  ;;  %v7317_v32 = vld [vmem:[#allocation28_spill] sm:$0xff] }
 0x185   : > { %v916_v6 = vmul.f32 %v915_v54, %v5383_v62  ;;  %v925_v42 = vxor.u32 2147483648, %v908_v23  ;;  %vm3983_vm2 = vcmp.lt.s32.totalorder %v3982_v4, 0  ;;  %v1168_v7 = vsel %vm1167_vm12, 1, %v7283_v40 }
 0x186   : > { %v1038_v9 = vsel %vm3983_vm2, 0, %v3982_v4  ;;  %v1144_v21 = vshrl.u32 %v5399_v31, 16  ;;  %v1170_v37 = vadd.s32 %v1168_v7, %v1162_v52  ;;  %vm1171_vm10 = vc.u32 %v1169_v51, %v1165_v53 }
 0x187   : > { %v922_v45 = vxor.u32 2147483648, %v916_v6  ;;  %vm5443_vm6 = vcmp.le.f32.partialorder %v929_v58, 0.7853982  ;;  %v1039_v22 = vsub.s32 32, %v1038_v9  ;;  %v1053_v15 = vsub.s32 4, %v5397_v17 }
 0x188   : > { %v1123_v62 = vsel %vm1117_vm9, %v1120_v36, %v1122_v41  ;;  %v1043_v11 = vsub.s32 4294967266, %v1038_v9  ;;  %v5450_v18 = vadd.s32 %v1153_v24, %v1144_v21  ;;  %v1164_v31 = vshrl.u32 %v5410_v27, 16 }
 0x189   : > { %v1172_v47 = vsel %vm1171_vm10, 1, %v7283_v40  ;;  %v923_v48 = vsel %vm921_vm4, %v908_v23, %v922_v45  ;;  %v926_v58 = vsel %vm924_vm0, %v925_v42, %v916_v6  ;;  %v1041_v55 = vshrl.u32 %v1023_v46, %v1039_v22 }
 0x18a   : > { %v1174_v33 = vadd.s32 %v1172_v47, %v1170_v37  ;;  %vm1429_vm14 = vcmp.lt.s32.totalorder %v5110_v61, 4  ;;  %v927_v56 = vsel %vm920_vm15, %v923_v48, %v926_v58  ;;  %v1040_v36 = vshll.u32 %v5406_v63, %v1038_v9 }
 0x18b   : > { %v1044_v41 = vadd.s32 127, %v1043_v11  ;;  %v1239_v27 = vand.u32 2147483647, %v7317_v32  ;;  %v928_v35 = vsel %vm917_vm5, nan, %v927_v56  ;;  %v1166_v54 = vshrl.u32 %v1161_v14, 16 }
 0x18c   : > { %v5465_v23 = vadd.s32 %v1169_v51, %v1165_v53  ;;  %v1175_v4 = vadd.s32 %v1174_v33, %v1164_v31  ;;  %4020 = vmatmul.msk.f32.gmra.mxu1 %vm2799_vm11, %v928_v35  ;;  %v1042_v46 = vor.u32 %v1041_v55, %v1040_v36  ;;  %v1177_v24 = vmul.u32 %v5346_v13, %v1123_v62  ;;  %v7319_v51 = vld [vmem:[#allocation55_spill] sm:$0xff] }
 0x18d   : > { %v1045_v52 = vshll.u32 %v1044_v41, 23  ;;  %v1246_v5 = vand.u32 8388607, %v1239_v27  ;;  %v1054_v63 = vsel %vm931_vm3, %v1053_v15, %v5397_v17  ;;  %v1257_v14 = vshrl.u32 %v7285_v8, %v7318_v28 }
 0x18e   : > { %v1176_v6 = vadd.s32 %v1175_v4, %v1166_v54  ;;  %vm1179_vm9 = vc.u32 %v5450_v18, %v5465_v23  ;;  %v1256_v42 = vshll.u32 %v7284_v19, %v7319_v51  ;;  %v1259_v13 = vshll.u32 %v7285_v8, %v7319_v51 }
 0x18f   : > { %v1046_v53 = vor.u32 4788187, %v1045_v52  ;;  %v1260_v7 = vshrl.u32 %v7286_v2, %v7318_v28  ;;  %v1247_v21 = vor.u32 8388608, %v1246_v5  ;;  %v1262_v17 = vshll.u32 %v7286_v2, %v7319_v51 }
 0x190   : > { %v1180_v9 = vadd.s32 1, %v1176_v6  ;;  %v1263_v37 = vshrl.u32 %v7250_v0, %v7318_v28  ;;  %v1049_v22 = vcvt.s32.f32 %v1042_v46  ;;  %v1056_v15 = vsel %vm5443_vm6, 0, %v1054_v63  ;;  %v7320_v46 = vld [vmem:[#allocation57_spill] sm:$0xff] }
 0x191   : > { %v1047_v45 = vand.u32 2147483647, %v1046_v53  ;;  %v5490_v62 = vor.u32 %v1260_v7, %v1259_v13  ;;  %v5492_v31 = vor.u32 %v1257_v14, %v1256_v42  ;;  %vm1273_vm4 = vcmp.lt.s32.totalorder %v4789_v26, 3 }
 0x192   : > { %v1181_v11 = vsel %vm1179_vm9, %v1180_v9, %v1176_v6  ;;  %v1264_v47 = vor.u32 %v1263_v37, %v1262_v17  ;;  %vm1271_vm0 = vcmp.lt.s32.totalorder %v4789_v26, 1  ;;  %v1285_v55 = vsel %vm1273_vm4, %v4880_v60, %v5107_v39 }
 0x193   : > { %v1050_v48 = vmul.f32 %v1049_v22, %v1047_v45  ;;  %v1182_v58 = vadd.s32 %v1181_v11, %v1177_v24  ;;  %v5503_v33 = vsel %vm1429_vm14, %v5369_v10, 920167782  ;;  %v1576_v56 = vshrl.u32 %v7303_v29, %v5389_v16 }
 0x194   : > { %v1283_v36 = vsel %vm1271_vm0, %v5490_v62, %v1264_v47  ;;  %v5510_v41 = vshll.u32 %v1247_v21, 8  ;;  %v5514_v35 = vshrl.u32 %v7305_v30, %v5389_v16  ;;  %vm1272_vm15 = vcmp.lt.s32.totalorder %v4789_v26, 2 }
 0x195   : > { %v1051_v54 = vxor.u32 2147483648, %v1050_v48  ;;  %v1183_v60 = vadd.s32 536870912, %v1182_v58  ;;  %v1073_v39 = vadd.s32 3, %v1056_v15  ;;  %v1279_v4 = vsel %vm1271_vm0, %v5492_v31, %v5490_v62 }
 0x196   : > { %v1281_v52 = vsel %vm1273_vm4, %v1264_v47, %v7320_v46  ;;  %v1286_v24 = vsel %vm1272_vm15, %v1283_v36, %v1285_v55  ;;  %v5535_v53 = vsel %vm1429_vm14, %v1425_v44, 1326507024  ;;  %v1288_v42 = vand.u32 65535, %v5510_v41 }
 0x197   : > { %v1052_v5 = vsel %vm931_vm3, %v1051_v54, %v1050_v48  ;;  %v5528_v63 = vshrl.u32 %v1183_v60, 30  ;;  %v1290_v6 = vand.u32 65535, %v1286_v24  ;;  %v1291_v14 = vshrl.u32 %v1286_v24, 16 }
 0x198   : > { %v5540_v51 = vsel %vm5443_vm6, %v7296_v12, %v1052_v5  ;;  %v1289_v13 = vshrl.u32 %v5510_v41, 16  ;;  %v5545_v7 = vor.u32 %v1576_v56, %v5395_v20  ;;  %v1282_v3 = vsel %vm1272_vm15, %v1279_v4, %v1281_v52 }
 0x199   : > { %v1057_v9 = vmul.f32 %v5540_v51, %v5540_v51  ;;  %v1185_v50 = vshll.u32 %v5528_v63, 30  ;;  %v1580_v44 = vor.u32 %v5514_v35, %v5414_v49  ;;  %v5554_v57 = vand.u32 3, %v1073_v39 }
 0x19a   : > { %v1293_v21 = vmul.u32 %v1291_v14, %v1288_v42  ;;  %v5556_v17 = vmul.u32 %v1290_v6, %v1289_v13  ;;  %v1276_v22 = vsel %vm1274_vm7, %v1264_v47, 2102212464  ;;  %v1292_v15 = vmul.u32 %v1290_v6, %v1288_v42 }
 0x19b   : > { %v1058_v37 = vmul.f32 -0.001358992, %v1057_v9  ;;  %v1065_v45 = vmul.f32 -0.00019511016, %v1057_v9  ;;  %v5558_v20 = vsub.s32 %v1182_v58, %v1185_v50  ;;  %v1312_v48 = vand.u32 65535, %v1282_v3 }
 0x19c   : > { %v1296_v11 = vshll.u32 %v1293_v21, 16  ;;  %v1313_v55 = vshrl.u32 %v1282_v3, 16  ;;  %v1295_v60 = vmul.u32 %v1291_v14, %v1289_v13  ;;  %v1298_v39 = vshll.u32 %v5556_v17, 16 }
 0x19d   : > { %v1059_v56 = vadd.f32 0.041655596, %v1058_v37  ;;  %v1066_v36 = vadd.f32 0.008332121, %v1065_v45  ;;  %vm1187_vm5 = vcmp.lt.s32.totalorder %v5558_v20, 0  ;;  %v1188_v54 = vsub.s32 0, %v5558_v20 }
 0x19e   : > { %vm1300_vm3 = vc.u32 %v1292_v15, %v1296_v11  ;;  %v1302_v4 = vadd.s32 %v1296_v11, %v1292_v15  ;;  %v1255_v5 = vshrl.u32 %v7284_v19, %v7318_v28  ;;  %v1315_v37 = vmul.u32 %v1313_v55, %v1288_v42 }
 0x19f   : > { %v1060_v58 = vmul.f32 %v1059_v56, %v1057_v9  ;;  %v1067_v46 = vmul.f32 %v1066_v36, %v1057_v9  ;;  %v1189_v52 = vsel %vm1187_vm5, %v1188_v54, %v5558_v20  ;;  %v1301_v47 = vsel %vm1300_vm3, 1, %v7283_v40 }
 0x1a0   : > { %v1190_v24 = vclz %v1189_v52  ;;  %v1303_v6 = vadd.s32 %v1301_v47, %v1295_v60  ;;  %vm1304_vm7 = vc.u32 %v1302_v4, %v1298_v39  ;;  %vm1076_vm12 = vcmp.eq.s32.totalorder %v5554_v57, 0 }
 0x1a1   : > { %v1061_v50 = vadd.f32 -0.4999988, %v1060_v58  ;;  %v1068_v3 = vadd.f32 -0.16666654, %v1067_v46  ;;  %v1305_v14 = vsel %vm1304_vm7, 1, %v7283_v40  ;;  %vm1079_vm2 = vcmp.eq.s32.totalorder %v5554_v57, 2 }
 0x1a2   : > { %v1178_v45 = vadd.s32 %v5465_v23, %v5450_v18  ;;  %v3985_v15 = vadd.s32 4294967294, %v1190_v24  ;;  %v1275_v11 = vsel %vm1271_vm0, %v1255_v5, %v5492_v31  ;;  %v1277_v28 = vsel %vm1273_vm4, %v5490_v62, %v1276_v22 }
 0x1a3   : > { %v1062_v56 = vmul.f32 %v1061_v50, %v1057_v9  ;;  %v1069_v36 = vmul.f32 %v1068_v3, %v1057_v9  ;;  %vm1075_vm10 = vcmp.lt.s32.totalorder %v5554_v57, 2  ;;  %v1307_v54 = vadd.s32 %v1305_v14, %v1303_v6 }
 0x1a4   : > { %v1316_v60 = vmul.u32 %v1312_v48, %v1289_v13  ;;  %vm1072_vm6 = vweird.f32 %v7296_v12  ;;  %vm3986_vm9 = vcmp.lt.s32.totalorder %v3985_v15, 0  ;;  %v1208_v18 = vsub.s32 4, %v5528_v63 }
 0x1a5   : > { %v1297_v23 = vshrl.u32 %v1293_v21, 16  ;;  %v1318_v39 = vshll.u32 %v1315_v37, 16  ;;  %v1063_v4 = vadd.f32 1.0, %v1062_v56  ;;  %v1070_v58 = vadd.f32 1.0, %v1069_v36 }
 0x1a6   : > { %v1193_v31 = vsel %vm3986_vm9, 0, %v3985_v15  ;;  %v1314_v46 = vmul.u32 %v1312_v48, %v1288_v42  ;;  %v1317_v22 = vmul.u32 %v1313_v55, %v1289_v13  ;;  %v1320_v6 = vshll.u32 %v1316_v60, 16  ;;  %v7321_v42 = vld [vmem:[#allocation47_spill] sm:$0xff] }
 0x1a7   : > { %v1194_v52 = vsub.s32 32, %v1193_v31  ;;  %v1198_v47 = vsub.s32 4294967266, %v1193_v31  ;;  %v1308_v62 = vadd.s32 %v1307_v54, %v1297_v23  ;;  %v1071_v9 = vmul.f32 %v1070_v58, %v5540_v51 }
 0x1a8   : > { %v1080_v24 = vxor.u32 2147483648, %v1063_v4  ;;  %v1195_v5 = vshll.u32 %v5558_v20, %v1193_v31  ;;  %vm1322_vm4 = vc.u32 %v1314_v46, %v1318_v39  ;;  %v1324_v14 = vadd.s32 %v1318_v39, %v1314_v46 }
 0x1a9   : > { %v1196_v50 = vshrl.u32 %v1178_v45, %v1194_v52  ;;  %v1199_v3 = vadd.s32 127, %v1198_v47  ;;  %v1077_v21 = vxor.u32 2147483648, %v1071_v9  ;;  %v1299_v56 = vshrl.u32 %v5556_v17, 16 }
 0x1aa   : > { %v1323_v15 = vsel %vm1322_vm4, 1, %v7283_v40  ;;  %v1394_v48 = vand.u32 2147483647, %v7321_v42  ;;  %vm5590_vm0 = vcmp.le.f32.partialorder %v1084_v34, 0.7853982  ;;  %vm1326_vm5 = vc.u32 %v1324_v14, %v1320_v6 }
 0x1ab   : > { %v1197_v51 = vor.u32 %v1196_v50, %v1195_v5  ;;  %v1200_v20 = vshll.u32 %v1199_v3, 23  ;;  %v1325_v55 = vadd.s32 %v1323_v15, %v1317_v22  ;;  %vm1584_vm3 = vcmp.lt.s32.totalorder %v5256_v1, 4 }
 0x1ac   : > { %v1078_v45 = vsel %vm1076_vm12, %v1063_v4, %v1077_v21  ;;  %v1081_v17 = vsel %vm1079_vm2, %v1080_v24, %v1071_v9  ;;  %v1319_v36 = vshrl.u32 %v1315_v37, 16  ;;  %v1327_v54 = vsel %vm1326_vm5, 1, %v7283_v40 }
 0x1ad   : > { %v1082_v34 = vsel %vm1075_vm10, %v1078_v45, %v1081_v17  ;;  %v1201_v23 = vor.u32 4788187, %v1200_v20  ;;  %v5602_v39 = vadd.s32 %v1308_v62, %v1299_v56  ;;  %v1329_v58 = vadd.s32 %v1327_v54, %v1325_v55 }
 0x1ae   : > { %v1083_v31 = vsel %vm1072_vm6, nan, %v1082_v34  ;;  %vm1086_vm7 = vcmp.lt.s32.totalorder %v7306_v38, 0  ;;  %v1321_v46 = vshrl.u32 %v1316_v60, 16  ;;  %v5607_v4 = vadd.s32 %v1324_v14, %v1320_v6 }
 0x1af   : > { %4021 = vmatmul.msk.f32.gmra.mxu1 %vm2799_vm11, %v1083_v31  ;;  %v1202_v37 = vand.u32 2147483647, %v1201_v23  ;;  %v1204_v52 = vcvt.s32.f32 %v1197_v51  ;;  %v1330_v47 = vadd.s32 %v1329_v58, %v1319_v36  ;;  %v1401_v57 = vand.u32 8388607, %v1394_v48  ;;  %v7324_v23 = vld [vmem:[#allocation45_spill] sm:$0xff] }
 0x1b0   : > { %v1209_v62 = vsel %vm1086_vm7, %v1208_v18, %v5528_v63  ;;  %v1278_v12 = vsel %vm1272_vm15, %v1275_v11, %v1277_v28  ;;  %v1412_v60 = vshrl.u32 %v7285_v8, %v5117_v43  ;;  %v1415_v22 = vshrl.u32 %v7286_v2, %v5117_v43 }
 0x1b1   : > { %v1205_v9 = vmul.f32 %v1204_v52, %v1202_v37  ;;  %v1331_v24 = vadd.s32 %v1330_v47, %v1321_v46  ;;  %vm1334_vm12 = vc.u32 %v5602_v39, %v5607_v4  ;;  %v1414_v5 = vshll.u32 %v7285_v8, %v4986_v59 }
 0x1b2   : > { %v1402_v6 = vor.u32 8388608, %v1401_v57  ;;  %v1411_v63 = vshll.u32 %v7284_v19, %v4986_v59  ;;  %v1417_v26 = vshll.u32 %v7286_v2, %v4986_v59  ;;  %v1418_v11 = vshrl.u32 %v7250_v0, %v5117_v43 }
 0x1b3   : > { %v1206_v28 = vxor.u32 2147483648, %v1205_v9  ;;  %v1332_v18 = vmul.u32 %v5510_v41, %v1278_v12  ;;  %v1335_v50 = vadd.s32 1, %v1331_v24  ;;  %v5632_v3 = vor.u32 %v1415_v22, %v1414_v5 }
 0x1b4   : > { %v1211_v14 = vsel %vm5590_vm0, 0, %v1209_v62  ;;  %v5636_v21 = vor.u32 %v1412_v60, %v1411_v63  ;;  %v1419_v56 = vor.u32 %v1418_v11, %v1417_v26  ;;  %vm1428_vm15 = vcmp.lt.s32.totalorder %v5110_v61, 3 }
 0x1b5   : > { %v5642_v59 = vsel %vm1584_vm3, %v5545_v7, 920167782  ;;  %v1207_v15 = vsel %vm1086_vm7, %v1206_v28, %v1205_v9  ;;  %v1336_v41 = vsel %vm1334_vm12, %v1335_v50, %v1331_v24  ;;  %v1440_v51 = vsel %vm1428_vm15, %v5369_v10, %v5535_v53 }
 0x1b6   : > { %v5656_v20 = vsel %vm5590_vm0, %v7306_v38, %v1207_v15  ;;  %v1337_v55 = vadd.s32 %v1336_v41, %v1332_v18  ;;  %vm1426_vm2 = vcmp.lt.s32.totalorder %v5110_v61, 1  ;;  %v5659_v45 = vshll.u32 %v1402_v6, 8 }
 0x1b7   : > { %v1212_v17 = vmul.f32 %v5656_v20, %v5656_v20  ;;  %v1228_v36 = vadd.s32 3, %v1211_v14  ;;  %vm1427_vm10 = vcmp.lt.s32.totalorder %v5110_v61, 2  ;;  %v1438_v10 = vsel %vm1426_vm2, %v5632_v3, %v1419_v56 }
 0x1b8   : > { %v1338_v53 = vadd.s32 536870912, %v1337_v55  ;;  %v1434_v13 = vsel %vm1426_vm2, %v5636_v21, %v5632_v3  ;;  %v1436_v54 = vsel %vm1428_vm15, %v1419_v56, %v5503_v33  ;;  %v1441_v34 = vsel %vm1427_vm10, %v1438_v10, %v1440_v51 }
 0x1b9   : > { %v5678_v58 = vshrl.u32 %v7303_v29, %v7324_v23  ;;  %v1213_v31 = vmul.f32 -0.001358992, %v1212_v17  ;;  %v1220_v46 = vmul.f32 -0.00019511016, %v1212_v17  ;;  %v1445_v37 = vand.u32 65535, %v1441_v34 }
 0x1ba   : > { %v1339_v52 = vshrl.u32 %v1338_v53, 30  ;;  %v1443_v47 = vand.u32 65535, %v5659_v45  ;;  %v1444_v57 = vshrl.u32 %v5659_v45, 16  ;;  %v1446_v62 = vshrl.u32 %v1441_v34, 16 }
 0x1bb   : > { %v1214_v12 = vadd.f32 0.041655596, %v1213_v31  ;;  %v1221_v60 = vadd.f32 0.008332121, %v1220_v46  ;;  %v5682_v22 = vand.u32 3, %v1228_v36  ;;  %v1437_v33 = vsel %vm1427_vm10, %v1434_v13, %v1436_v54 }
 0x1bc   : > { %v5691_v9 = vsel %vm1584_vm3, %v1580_v44, 1326507024  ;;  %v1340_v24 = vshll.u32 %v1339_v52, 30  ;;  %v1448_v5 = vmul.u32 %v1446_v62, %v1443_v47  ;;  %v5693_v6 = vmul.u32 %v1445_v37, %v1444_v57 }
 0x1bd   : > { %v1215_v63 = vmul.f32 %v1214_v12, %v1212_v17  ;;  %v1222_v26 = vmul.f32 %v1221_v60, %v1212_v17  ;;  %v1410_v11 = vshrl.u32 %v7284_v19, %v5117_v43  ;;  %v1431_v28 = vsel %vm1429_vm14, %v1419_v56, 2102212464 }
 0x1be   : > { %vm1241_vm6 = vcmp.lt.s32.totalorder %v7317_v32, 0  ;;  %v5700_v18 = vsub.s32 %v1337_v55, %v1340_v24  ;;  %v1447_v49 = vmul.u32 %v1445_v37, %v1443_v47  ;;  %v1451_v35 = vshll.u32 %v1448_v5, 16 }
 0x1bf   : > { %v1468_v44 = vshrl.u32 %v1437_v33, 16  ;;  %v1216_v50 = vadd.f32 -0.4999988, %v1215_v63  ;;  %v1223_v14 = vadd.f32 -0.16666654, %v1222_v26  ;;  %vm1234_vm9 = vcmp.eq.s32.totalorder %v5682_v22, 2 }
 0x1c0   : > { %v1450_v15 = vmul.u32 %v1446_v62, %v1444_v57  ;;  %v1467_v41 = vand.u32 65535, %v1437_v33  ;;  %vm1231_vm4 = vcmp.eq.s32.totalorder %v5682_v22, 0  ;;  %vm1342_vm0 = vcmp.lt.s32.totalorder %v5700_v18, 0 }
 0x1c1   : > { %v1343_v43 = vsub.s32 0, %v5700_v18  ;;  %v1453_v56 = vshll.u32 %v5693_v6, 16  ;;  %vm1455_vm14 = vc.u32 %v1447_v49, %v1451_v35  ;;  %v1217_v51 = vmul.f32 %v1216_v50, %v1212_v17 }
 0x1c2   : > { %v1224_v55 = vmul.f32 %v1223_v14, %v1212_v17  ;;  %vm1230_vm5 = vcmp.lt.s32.totalorder %v5682_v22, 2  ;;  %v1456_v36 = vsel %vm1455_vm14, 1, %v7283_v40  ;;  %v1457_v10 = vadd.s32 %v1451_v35, %v1447_v49 }
 0x1c3   : > { %vm1227_vm7 = vweird.f32 %v7306_v38  ;;  %v1344_v53 = vsel %vm1342_vm0, %v1343_v43, %v5700_v18  ;;  %v1363_v13 = vsub.s32 4, %v1339_v52  ;;  %v1458_v54 = vadd.s32 %v1456_v36, %v1450_v15 }
 0x1c4   : > { %v1470_v34 = vmul.u32 %v1468_v44, %v1443_v47  ;;  %v1218_v31 = vadd.f32 1.0, %v1217_v51  ;;  %v1225_v46 = vadd.f32 1.0, %v1224_v55  ;;  %v1345_v37 = vclz %v1344_v53 }
 0x1c5   : > { %vm1459_vm12 = vc.u32 %v1457_v10, %v1453_v56  ;;  %v1333_v62 = vadd.s32 %v5607_v4, %v5602_v39  ;;  %v1430_v17 = vsel %vm1426_vm2, %v1410_v11, %v5636_v21  ;;  %v1432_v12 = vsel %vm1428_vm15, %v5632_v3, %v1431_v28 }
 0x1c6   : > { %v1460_v60 = vsel %vm1459_vm12, 1, %v7283_v40  ;;  %v1226_v33 = vmul.f32 %v1225_v46, %v5656_v20  ;;  %v1235_v24 = vxor.u32 2147483648, %v1218_v31  ;;  %v3988_v63 = vadd.s32 4294967294, %v1345_v37 }
 0x1c7   : > { %v1462_v26 = vadd.s32 %v1460_v60, %v1458_v54  ;;  %v1452_v49 = vshrl.u32 %v1448_v5, 16  ;;  %v1469_v35 = vmul.u32 %v1467_v41, %v1443_v47  ;;  %v1471_v50 = vmul.u32 %v1467_v41, %v1444_v57 }
 0x1c8   : > { %v1473_v14 = vshll.u32 %v1470_v34, 16  ;;  %v1232_v39 = vxor.u32 2147483648, %v1226_v33  ;;  %vm3989_vm0 = vcmp.lt.s32.totalorder %v3988_v63, 0  ;;  %v1364_v4 = vsel %vm1241_vm6, %v1363_v13, %v1339_v52 }
 0x1c9   : > { %v1472_v21 = vmul.u32 %v1468_v44, %v1444_v57  ;;  %v1236_v3 = vsel %vm1234_vm9, %v1235_v24, %v1226_v33  ;;  %v1348_v11 = vsel %vm3989_vm0, 0, %v3988_v63  ;;  %v1463_v28 = vadd.s32 %v1462_v26, %v1452_v49 }
 0x1ca   : > { %vm1477_vm15 = vc.u32 %v1469_v35, %v1473_v14  ;;  %v1233_v20 = vsel %vm1231_vm4, %v1218_v31, %v1232_v39  ;;  %v1349_v15 = vsub.s32 32, %v1348_v11  ;;  %v1353_v5 = vsub.s32 4294967266, %v1348_v11 }
 0x1cb   : > { %v1475_v47 = vshll.u32 %v1471_v50, 16  ;;  %v1237_v41 = vsel %vm1230_vm5, %v1233_v20, %v1236_v3  ;;  %v1350_v43 = vshll.u32 %v5700_v18, %v1348_v11  ;;  %v1478_v52 = vsel %vm1477_vm15, 1, %v7283_v40  ;;  %v7327_v18 = vld [vmem:[#allocation52_spill] sm:$0xff] }
 0x1cc   : > { %v1479_v57 = vadd.s32 %v1473_v14, %v1469_v35  ;;  %v1238_v44 = vsel %vm1227_vm7, nan, %v1237_v41  ;;  %v1351_v56 = vshrl.u32 %v1333_v62, %v1349_v15  ;;  %v1354_v51 = vadd.s32 127, %v1353_v5 }
 0x1cd   : > { %v1480_v55 = vadd.s32 %v1478_v52, %v1472_v21  ;;  %4022 = vmatmul.msk.f32.gmra.mxu1 %vm2799_vm11, %v1238_v44  ;;  %vm5736_vm2 = vcmp.le.f32.partialorder %v1239_v27, 0.7853982  ;;  %v1433_v22 = vsel %vm1427_vm10, %v1430_v17, %v1432_v12  ;;  %v1549_v10 = vand.u32 2147483647, %v7327_v18 }
 0x1ce   : > { %vm1481_vm9 = vc.u32 %v1479_v57, %v1475_v47  ;;  %v1352_v53 = vor.u32 %v1351_v56, %v1350_v43  ;;  %v1355_v38 = vshll.u32 %v1354_v51, 23  ;;  %v1454_v13 = vshrl.u32 %v5693_v6, 16 }
 0x1cf   : > { %v1482_v54 = vsel %vm1481_vm9, 1, %v7283_v40  ;;  %v1366_v31 = vsel %vm5736_vm2, 0, %v1364_v4  ;;  %v1474_v46 = vshrl.u32 %v1470_v34, 16  ;;  %v1476_v27 = vshrl.u32 %v1471_v50, 16 }
 0x1d0   : > { %v1484_v37 = vadd.s32 %v1482_v54, %v1480_v55  ;;  %v1356_v62 = vor.u32 4788187, %v1355_v38  ;;  %v1464_v60 = vadd.s32 %v1463_v28, %v1454_v13  ;;  %v1483_v33 = vadd.s32 %v1479_v57, %v1475_v47 }
 0x1d1   : > { %v1556_v61 = vand.u32 8388607, %v1549_v10  ;;  %v1359_v17 = vcvt.s32.f32 %v1352_v53  ;;  %v1566_v24 = vshll.u32 %v7284_v19, %v5267_v25  ;;  %v1567_v6 = vshrl.u32 %v7285_v8, %v5389_v16 }
 0x1d2   : > { %v1485_v12 = vadd.s32 %v1484_v37, %v1474_v46  ;;  %v1357_v63 = vand.u32 2147483647, %v1356_v62  ;;  %v1569_v34 = vshll.u32 %v7285_v8, %v5267_v25  ;;  %v1570_v49 = vshrl.u32 %v7286_v2, %v5389_v16 }
 0x1d3   : > { %v1557_v26 = vor.u32 8388608, %v1556_v61  ;;  %v5757_v50 = vor.u32 %v1567_v6, %v1566_v24  ;;  %v1572_v14 = vshll.u32 %v7286_v2, %v5267_v25  ;;  %v1573_v39 = vshrl.u32 %v7250_v0, %v5389_v16 }
 0x1d4   : > { %v1486_v35 = vadd.s32 %v1485_v12, %v1476_v27  ;;  %v1360_v4 = vmul.f32 %v1359_v17, %v1357_v63  ;;  %v1383_v21 = vadd.s32 3, %v1366_v31  ;;  %vm1489_vm10 = vc.u32 %v1464_v60, %v1483_v33 }
 0x1d5   : > { %v5763_v3 = vor.u32 %v1570_v49, %v1569_v34  ;;  %v1574_v28 = vor.u32 %v1573_v39, %v1572_v14  ;;  %vm1581_vm4 = vcmp.lt.s32.totalorder %v5256_v1, 1  ;;  %vm1583_vm14 = vcmp.lt.s32.totalorder %v5256_v1, 3 }
 0x1d6   : > { %v1490_v11 = vadd.s32 1, %v1486_v35  ;;  %v1361_v20 = vxor.u32 2147483648, %v1360_v4  ;;  %v1487_v15 = vmul.u32 %v5659_v45, %v1433_v22  ;;  %v1595_v5 = vsel %vm1583_vm14, %v5545_v7, %v5691_v9  ;;  %v7328_v7 = vld [vmem:[#allocation41_spill] sm:$0xff] }
 0x1d7   : > { %v1589_v25 = vsel %vm1581_vm4, %v5757_v50, %v5763_v3  ;;  %v1591_v41 = vsel %vm1583_vm14, %v1574_v28, %v5642_v59  ;;  %v1593_v43 = vsel %vm1581_vm4, %v5763_v3, %v1574_v28  ;;  %v5782_v45 = vshll.u32 %v1557_v26, 8 }
 0x1d8   : > { %v1491_v47 = vsel %vm1489_vm10, %v1490_v11, %v1486_v35  ;;  %v5786_v52 = vshrl.u32 %v7305_v30, %v7324_v23  ;;  %v1362_v57 = vsel %vm1241_vm6, %v1361_v20, %v1360_v4  ;;  %vm1582_vm5 = vcmp.lt.s32.totalorder %v5256_v1, 2 }
 0x1d9   : > { %v1492_v44 = vadd.s32 %v1491_v47, %v1487_v15  ;;  %v5792_v9 = vshrl.u32 %v7328_v7, 5  ;;  %v5795_v59 = vand.u32 31, %v7328_v7  ;;  %v5800_v56 = vsel %vm5736_vm2, %v7317_v32, %v1362_v57 }
 0x1da   : > { %v1596_v51 = vsel %vm1582_vm5, %v1593_v43, %v1595_v5  ;;  %v1367_v55 = vmul.f32 %v5800_v56, %v5800_v56  ;;  %v5808_v53 = vsel %vm1582_vm5, %v1589_v25, %v1591_v41  ;;  %v5810_v13 = vand.u32 3, %v1383_v21 }
 0x1db   : > { %v1493_v22 = vadd.s32 536870912, %v1492_v44  ;;  %v1600_v38 = vand.u32 65535, %v1596_v51  ;;  %v1598_v54 = vand.u32 65535, %v5782_v45  ;;  %v1599_v36 = vshrl.u32 %v5782_v45, 16 }
 0x1dc   : > { %v1601_v31 = vshrl.u32 %v1596_v51, 16  ;;  %v1368_v46 = vmul.f32 -0.001358992, %v1367_v55  ;;  %v1375_v27 = vmul.f32 -0.00019511016, %v1367_v55  ;;  %vm1396_vm6 = vcmp.lt.s32.totalorder %v7321_v42, 0 }
 0x1dd   : > { %v5815_v37 = vadd.s32 %v1483_v33, %v1464_v60  ;;  %v1494_v62 = vshrl.u32 %v1493_v22, 30  ;;  %v1586_v61 = vsel %vm1584_vm3, %v1574_v28, 2102212464  ;;  %v5819_v12 = vmul.u32 %v1600_v38, %v1599_v36 }
 0x1de   : > { %v1603_v17 = vmul.u32 %v1601_v31, %v1598_v54  ;;  %v1623_v24 = vshrl.u32 %v5808_v53, 16  ;;  %v1369_v6 = vadd.f32 0.041655596, %v1368_v46  ;;  %v1376_v63 = vadd.f32 0.008332121, %v1375_v27 }
 0x1df   : > { %v1495_v26 = vshll.u32 %v1494_v62, 30  ;;  %v1565_v34 = vshrl.u32 %v7284_v19, %v5389_v16  ;;  %vm5826_vm7 = vcmp.le.f32.partialorder %v1394_v48, 0.7853982  ;;  %v1602_v33 = vmul.u32 %v1600_v38, %v1598_v54 }
 0x1e0   : > { %v1605_v49 = vmul.u32 %v1601_v31, %v1599_v36  ;;  %v1606_v35 = vshll.u32 %v1603_v17, 16  ;;  %v1622_v14 = vand.u32 65535, %v5808_v53  ;;  %v1370_v39 = vmul.f32 %v1369_v6, %v1367_v55 }
 0x1e1   : > { %v1377_v4 = vmul.f32 %v1376_v63, %v1367_v55  ;;  %v5831_v21 = vsub.s32 %v1492_v44, %v1495_v26  ;;  %v1518_v11 = vsub.s32 4, %v1494_v62  ;;  %v1608_v28 = vshll.u32 %v5819_v12, 16 }
 0x1e2   : > { %vm1610_vm3 = vc.u32 %v1602_v33, %v1606_v35  ;;  %v1612_v16 = vadd.s32 %v1606_v35, %v1602_v33  ;;  %v5834_v20 = vmul.u32 %v1623_v24, %v1598_v54  ;;  %v1371_v48 = vadd.f32 -0.4999988, %v1370_v39 }
 0x1e3   : > { %v1378_v15 = vadd.f32 -0.16666654, %v1377_v4  ;;  %vm1389_vm12 = vcmp.eq.s32.totalorder %v5810_v13, 2  ;;  %vm1497_vm0 = vcmp.lt.s32.totalorder %v5831_v21, 0  ;;  %v1498_v25 = vsub.s32 0, %v5831_v21 }
 0x1e4   : > { %vm1386_vm15 = vcmp.eq.s32.totalorder %v5810_v13, 0  ;;  %v1585_v5 = vsel %vm1581_vm4, %v1565_v34, %v5757_v50  ;;  %v1587_v47 = vsel %vm1583_vm14, %v5763_v3, %v1586_v61  ;;  %v1611_v41 = vsel %vm1610_vm3, 1, %v7283_v40 }
 0x1e5   : > { %vm1614_vm2 = vc.u32 %v1612_v16, %v1608_v28  ;;  %v1372_v43 = vmul.f32 %v1371_v48, %v1367_v55  ;;  %v1379_v57 = vmul.f32 %v1378_v15, %v1367_v55  ;;  %vm1385_vm9 = vcmp.lt.s32.totalorder %v5810_v13, 2  ;;  %v7331_v16 = vld [vmem:[#allocation2_spill] sm:$0xff] }
 0x1e6   : > { %v1499_v44 = vsel %vm1497_vm0, %v1498_v25, %v5831_v21  ;;  %v1613_v7 = vadd.s32 %v1611_v41, %v1605_v49  ;;  %vm1382_vm10 = vweird.f32 %v7317_v32  ;;  %v5852_v50 = vsel %vm1396_vm6, %v1518_v11, %v1494_v62 }
 0x1e7   : > { %v1500_v51 = vclz %v1499_v44  ;;  %v1615_v22 = vsel %vm1614_vm2, 1, %v7283_v40  ;;  %v1626_v3 = vmul.u32 %v1622_v14, %v1599_v36  ;;  %v1373_v53 = vadd.f32 1.0, %v1372_v43 }
 0x1e8   : > { %v1380_v38 = vadd.f32 1.0, %v1379_v57  ;;  %v1617_v31 = vadd.s32 %v1615_v22, %v1613_v7  ;;  %v1628_v55 = vshll.u32 %v5834_v20, 16  ;;  %v5858_v27 = vsel %vm1582_vm5, %v1585_v5, %v1587_v47  ;;  %v7332_v57 = vld [vmem:[#allocation5_spill] sm:$0xff] }
 0x1e9   : > { %v3991_v46 = vadd.s32 4294967294, %v1500_v51  ;;  %v1607_v61 = vshrl.u32 %v1603_v17, 16  ;;  %v1624_v6 = vmul.u32 %v1622_v14, %v1598_v54  ;;  %v1390_v26 = vxor.u32 2147483648, %v1373_v53 }
 0x1ea   : > { %v1381_v63 = vmul.f32 %v1380_v38, %v5800_v56  ;;  %v1521_v62 = vsel %vm5826_vm7, 0, %v5852_v50  ;;  %v1609_v34 = vshrl.u32 %v5819_v12, 16  ;;  %v1627_v49 = vmul.u32 %v1623_v24, %v1599_v36 }
 0x1eb   : > { %vm3992_vm4 = vcmp.lt.s32.totalorder %v3991_v46, 0  ;;  %v1618_v33 = vadd.s32 %v1617_v31, %v1607_v61  ;;  %vm1632_vm14 = vc.u32 %v1624_v6, %v1628_v55  ;;  %v1629_v1 = vshrl.u32 %v5834_v20, 16 }
 0x1ec   : > { %v1387_v35 = vxor.u32 2147483648, %v1381_v63  ;;  %v1503_v39 = vsel %vm3992_vm4, 0, %v3991_v46  ;;  %v1630_v4 = vshll.u32 %v1626_v3, 16  ;;  %v1391_v54 = vsel %vm1389_vm12, %v1390_v26, %v1381_v63  ;;  %v7334_v26 = vld [vmem:[#allocation6_spill] sm:$0xff] }
 0x1ed   : > { %v1504_v56 = vsub.s32 32, %v1503_v39  ;;  %v1508_v17 = vsub.s32 4294967266, %v1503_v39  ;;  %v1633_v14 = vsel %vm1632_vm14, 1, %v7283_v40  ;;  %v1634_v12 = vadd.s32 %v1628_v55, %v1624_v6 }
 0x1ee   : > { %v1388_v11 = vsel %vm1386_vm15, %v1373_v53, %v1387_v35  ;;  %v1635_v28 = vadd.s32 %v1633_v14, %v1627_v49  ;;  %v1704_v36 = vand.u32 2147483647, %v7331_v16  ;;  %v1505_v20 = vshll.u32 %v5831_v21, %v1503_v39  ;;  %v7335_v39 = vld [vmem:[#allocation19_spill] sm:$0xff] }
 0x1ef   : > { %v1392_v24 = vsel %vm1385_vm9, %v1388_v11, %v1391_v54  ;;  %v1506_v48 = vshrl.u32 %v5815_v37, %v1504_v56  ;;  %v1509_v15 = vadd.s32 127, %v1508_v17  ;;  %v1631_v5 = vshrl.u32 %v1626_v3, 16  ;;  %v7333_v3 = vld [vmem:[#allocation8_spill] sm:$0xff]  ;;  %v7337_v56 = vld [vmem:[#allocation46_spill] sm:$0xff] }
 0x1f0   : > { %v1393_v25 = vsel %vm1382_vm10, nan, %v1392_v24  ;;  %vm1636_vm5 = vc.u32 %v1634_v12, %v1630_v4  ;;  %v1711_v47 = vand.u32 8388607, %v1704_v36  ;;  %v1721_v21 = vshll.u32 %v7284_v19, %v7332_v57 }
 0x1f1   : > { %4023 = vmatmul.msk.f32.gmra.mxu1 %vm2799_vm11, %v1393_v25  ;;  %v1507_v41 = vor.u32 %v1506_v48, %v1505_v20  ;;  %v1510_v43 = vshll.u32 %v1509_v15, 23  ;;  %v1637_v13 = vsel %vm1636_vm5, 1, %v7283_v40  ;;  %v1619_v44 = vadd.s32 %v1618_v33, %v1609_v34 }
 0x1f2   : > { %v1638_v37 = vadd.s32 %v1634_v12, %v1630_v4  ;;  %v1639_v7 = vadd.s32 %v1637_v13, %v1635_v28  ;;  %v1712_v51 = vor.u32 8388608, %v1711_v47  ;;  %v1722_v53 = vshrl.u32 %v7285_v8, %v7333_v3  ;;  %v7338_v12 = vld [vmem:[#allocation13_spill] sm:$0xff]  ;;  %v7339_v13 = vld [vmem:[#allocation48_spill] sm:$0xff] }
 0x1f3   : > { %v1511_v32 = vor.u32 4788187, %v1510_v43  ;;  %v1514_v22 = vcvt.s32.f32 %v1507_v41  ;;  %v1724_v38 = vshll.u32 %v7285_v8, %v7332_v57  ;;  %v1725_v55 = vshrl.u32 %v7286_v2, %v7333_v3 }
 0x1f4   : > { %v1640_v31 = vadd.s32 %v1639_v7, %v1629_v1  ;;  %v1727_v46 = vshll.u32 %v7286_v2, %v7332_v57  ;;  %v1728_v61 = vshrl.u32 %v7250_v0, %v7333_v3  ;;  %v1723_v63 = vor.u32 %v1722_v53, %v1721_v21  ;;  %v7336_v1 = vld [vmem:[#allocation10_spill] sm:$0xff] }
 0x1f5   : > { %v1512_v6 = vand.u32 2147483647, %v1511_v32  ;;  %vm1736_vm3 = vcmp.lt.s32.totalorder %v7334_v26, 1  ;;  %vm1737_vm12 = vcmp.lt.s32.totalorder %v7334_v26, 2  ;;  %v5896_v33 = vor.u32 %v1725_v55, %v1724_v38 }
 0x1f6   : > { %v1641_v34 = vadd.s32 %v1640_v31, %v1631_v5  ;;  %v1729_v49 = vor.u32 %v1728_v61, %v1727_v46  ;;  %vm1738_vm0 = vcmp.lt.s32.totalorder %v7334_v26, 3  ;;  %vm1644_vm15 = vc.u32 %v1619_v44, %v1638_v37  ;;  %v7340_v26 = vld [vmem:[#allocation40_spill] sm:$0xff] }
 0x1f7   : > { %v1515_v35 = vmul.f32 %v1514_v22, %v1512_v6  ;;  %v1750_v4 = vsel %vm1738_vm0, %v7336_v1, %v7335_v39  ;;  %v5903_v54 = vshll.u32 %v1712_v51, 8  ;;  %v5907_v17 = vor.u32 %v5678_v58, %v7337_v56 }
 0x1f8   : > { %v1645_v14 = vadd.s32 1, %v1641_v34  ;;  %v1744_v11 = vsel %vm1736_vm3, %v1723_v63, %v5896_v33  ;;  %v1746_v28 = vsel %vm1738_vm0, %v1729_v49, %v7338_v12  ;;  %v1642_v20 = vmul.u32 %v5782_v45, %v5858_v27 }
 0x1f9   : > { %v1516_v24 = vxor.u32 2147483648, %v1515_v35  ;;  %v5919_v48 = vsel %vm1737_vm12, %v1744_v11, %v1746_v28  ;;  %v1748_v58 = vsel %vm1736_vm3, %v5896_v33, %v1729_v49  ;;  %v1538_v15 = vadd.s32 3, %v1521_v62 }
 0x1fa   : > { %v1646_v25 = vsel %vm1644_vm15, %v1645_v14, %v1641_v34  ;;  %v1751_v5 = vsel %vm1737_vm12, %v1748_v58, %v1750_v4  ;;  %v1753_v47 = vand.u32 65535, %v5903_v54  ;;  %v1754_v41 = vshrl.u32 %v5903_v54, 16 }
 0x1fb   : > { %v1517_v45 = vsel %vm1396_vm6, %v1516_v24, %v1515_v35  ;;  %v1647_v27 = vadd.s32 %v1646_v25, %v1642_v20  ;;  %v1755_v43 = vand.u32 65535, %v1751_v5  ;;  %v2355_v57 = vor.u32 %v5786_v52, %v7339_v13 }
 0x1fc   : > { %v5939_v50 = vsel %vm5826_vm7, %v7321_v42, %v1517_v45  ;;  %v1756_v62 = vshrl.u32 %v1751_v5, 16  ;;  %v1778_v21 = vshrl.u32 %v5919_v48, 16  ;;  %v5943_v7 = vsub.s32 32, %v5795_v59 }
 0x1fd   : > { %v1522_v51 = vmul.f32 %v5939_v50, %v5939_v50  ;;  %v1648_v32 = vadd.s32 536870912, %v1647_v27  ;;  %v5947_v22 = vmul.u32 %v1755_v43, %v1754_v41  ;;  %v5951_v53 = vshll.u32 %v7250_v0, %v5795_v59 }
 0x1fe   : > { %v1720_v60 = vshrl.u32 %v7284_v19, %v7333_v3  ;;  %v1757_v38 = vmul.u32 %v1755_v43, %v1753_v47  ;;  %v1758_v31 = vmul.u32 %v1756_v62, %v1753_v47  ;;  %v5955_v61 = vand.u32 3, %v1538_v15 }
 0x1ff   : > { %v1523_v55 = vmul.f32 -0.001358992, %v1522_v51  ;;  %v1530_v46 = vmul.f32 -0.00019511016, %v1522_v51  ;;  %v5957_v6 = vshrl.u32 %v1648_v32, 30  ;;  %v1763_v35 = vshll.u32 %v5947_v22, 16 }
 0x200   : > { %v1761_v34 = vshll.u32 %v1758_v31, 16  ;;  %v1777_v39 = vand.u32 65535, %v5919_v48  ;;  %v5961_v1 = vmul.u32 %v1778_v21, %v1753_v47  ;;  %v5963_v14 = vadd.s32 %v1638_v37, %v1619_v44 }
 0x201   : > { %v1524_v4 = vadd.f32 0.041655596, %v1523_v55  ;;  %v1531_v56 = vadd.f32 0.008332121, %v1530_v46  ;;  %v1650_v3 = vshll.u32 %v5957_v6, 30  ;;  %v1740_v11 = vsel %vm1736_vm3, %v1720_v60, %v1723_v63 }
 0x202   : > { %v1760_v12 = vmul.u32 %v1756_v62, %v1754_v41  ;;  %vm1765_vm6 = vc.u32 %v1757_v38, %v1761_v34  ;;  %v1767_v28 = vadd.s32 %v1761_v34, %v1757_v38  ;;  %v1741_v48 = vsel %vm1739_vm8, %v1729_v49, 2102212464 }
 0x203   : > { %v1525_v24 = vmul.f32 %v1524_v4, %v1522_v51  ;;  %v1532_v20 = vmul.f32 %v1531_v56, %v1522_v51  ;;  %v5968_v58 = vsub.s32 %v1647_v27, %v1650_v3  ;;  %vm1544_vm7 = vcmp.eq.s32.totalorder %v5955_v61, 2 }
 0x204   : > { %v1766_v44 = vsel %vm1765_vm6, 1, %v7283_v40  ;;  %vm1769_vm2 = vc.u32 %v1767_v28, %v1763_v35  ;;  %v1779_v37 = vmul.u32 %v1777_v39, %v1753_v47  ;;  %v1783_v15 = vshll.u32 %v5961_v1, 16 }
 0x205   : > { %v1526_v25 = vadd.f32 -0.4999988, %v1525_v24  ;;  %v1533_v63 = vadd.f32 -0.16666654, %v1532_v20  ;;  %vm1652_vm9 = vcmp.lt.s32.totalorder %v5968_v58, 0  ;;  %v1653_v5 = vsub.s32 0, %v5968_v58 }
 0x206   : > { %vm1541_vm10 = vcmp.eq.s32.totalorder %v5955_v61, 0  ;;  %v1742_v49 = vsel %vm1738_vm0, %v5896_v33, %v1741_v48  ;;  %v1768_v45 = vadd.s32 %v1766_v44, %v1760_v12  ;;  %v1770_v27 = vsel %vm1769_vm2, 1, %v7283_v40 }
 0x207   : > { %v1781_v43 = vmul.u32 %v1777_v39, %v1754_v41  ;;  %v1527_v62 = vmul.f32 %v1526_v25, %v1522_v51  ;;  %v1534_v47 = vmul.f32 %v1533_v63, %v1522_v51  ;;  %vm1540_vm8 = vcmp.lt.s32.totalorder %v5955_v61, 2 }
 0x208   : > { %v1654_v32 = vsel %vm1652_vm9, %v1653_v5, %v5968_v58  ;;  %v1762_v60 = vshrl.u32 %v1758_v31, 16  ;;  %vm1537_vm4 = vweird.f32 %v7321_v42  ;;  %vm1551_vm14 = vcmp.lt.s32.totalorder %v7327_v18, 0  ;;  %v7341_v5 = vld [vmem:[#allocation3_spill] sm:$0xff] }
 0x209   : > { %v1655_v38 = vclz %v1654_v32  ;;  %v1772_v55 = vadd.s32 %v1770_v27, %v1768_v45  ;;  %v1782_v46 = vmul.u32 %v1778_v21, %v1754_v41  ;;  %vm1787_vm5 = vc.u32 %v1779_v37, %v1783_v15 }
 0x20a   : > { %v1528_v33 = vadd.f32 1.0, %v1527_v62  ;;  %v1535_v34 = vadd.f32 1.0, %v1534_v47  ;;  %v1764_v35 = vshrl.u32 %v5947_v22, 16  ;;  %v1788_v39 = vsel %vm1787_vm5, 1, %v7283_v40 }
 0x20b   : > { %v3994_v51 = vadd.s32 4294967294, %v1655_v38  ;;  %v1673_v4 = vsub.s32 4, %v5957_v6  ;;  %v5991_v31 = vsel %vm1737_vm12, %v1740_v11, %v1742_v49  ;;  %v1785_v56 = vshll.u32 %v1781_v43, 16 }
 0x20c   : > { %v1536_v3 = vmul.f32 %v1535_v34, %v5939_v50  ;;  %v1545_v12 = vxor.u32 2147483648, %v1528_v33  ;;  %v1773_v28 = vadd.s32 %v1772_v55, %v1762_v60  ;;  %v1784_v41 = vshrl.u32 %v5961_v1, 16 }
 0x20d   : > { %vm3995_vm3 = vcmp.lt.s32.totalorder %v3994_v51, 0  ;;  %v1786_v21 = vshrl.u32 %v1781_v43, 16  ;;  %v1789_v24 = vadd.s32 %v1783_v15, %v1779_v37  ;;  %v1790_v22 = vadd.s32 %v1788_v39, %v1782_v46 }
 0x20e   : > { %v1542_v20 = vxor.u32 2147483648, %v1536_v3  ;;  %v1546_v48 = vsel %vm1544_vm7, %v1545_v12, %v1536_v3  ;;  %v1658_v44 = vsel %vm3995_vm3, 0, %v3994_v51  ;;  %v5997_v25 = vadd.s32 %v1773_v28, %v1764_v35 }
 0x20f   : > { %vm2359_vm12 = vcmp.lt.s32.totalorder %v7340_v26, 4  ;;  %v1659_v11 = vsub.s32 32, %v1658_v44  ;;  %v1660_v50 = vshll.u32 %v5968_v58, %v1658_v44  ;;  %v1663_v63 = vsub.s32 4294967266, %v1658_v44  ;;  %v7347_v44 = vld [vmem:[#allocation23_spill] sm:$0xff] }
 0x210   : > { %vm1791_vm0 = vc.u32 %v1789_v24, %v1785_v56  ;;  %v1543_v1 = vsel %vm1541_vm10, %v1528_v33, %v1542_v20  ;;  %v6004_v15 = vadd.s32 %v1789_v24, %v1785_v56  ;;  %v1859_v49 = vand.u32 2147483647, %v7341_v5  ;;  %v7345_v33 = vld [vmem:[#allocation12_spill] sm:$0xff] }
 0x211   : > { %v1792_v37 = vsel %vm1791_vm0, 1, %v7283_v40  ;;  %v1547_v45 = vsel %vm1540_vm8, %v1543_v1, %v1546_v48  ;;  %v1661_v27 = vshrl.u32 %v5963_v14, %v1659_v11  ;;  %v1664_v43 = vadd.s32 127, %v1663_v63  ;;  %v7348_v11 = vld [vmem:[#allocation17_spill] sm:$0xff] }
 0x212   : > { %v1794_v62 = vadd.s32 %v1792_v37, %v1790_v22  ;;  %v1548_v58 = vsel %vm1537_vm4, nan, %v1547_v45  ;;  %vm6014_vm15 = vcmp.le.f32.partialorder %v1549_v10, 0.7853982  ;;  %v1674_v32 = vsel %vm1551_vm14, %v1673_v4, %v5957_v6  ;;  %v7344_v10 = vld [vmem:[#allocation9_spill] sm:$0xff] }
 0x213   : > { %v1866_v61 = vand.u32 8388607, %v1859_v49  ;;  %4024 = vmatmul.msk.f32.gmra.mxu1 %vm2799_vm11, %v1548_v58  ;;  %v1662_v14 = vor.u32 %v1661_v27, %v1660_v50  ;;  %v1665_v60 = vshll.u32 %v1664_v43, 23  ;;  %v1797_v42 = vmul.u32 %v5903_v54, %v5991_v31  ;;  %v7349_v58 = vld [vmem:[#allocation21_spill] sm:$0xff] }
 0x214   : > { %v1795_v38 = vadd.s32 %v1794_v62, %v1784_v41  ;;  %v1876_v46 = vshll.u32 %v7284_v19, %v7344_v10  ;;  %v1877_v34 = vshrl.u32 %v7285_v8, %v7345_v33  ;;  %v1879_v6 = vshll.u32 %v7285_v8, %v7344_v10  ;;  %v7346_v41 = vld [vmem:[#allocation14_spill] sm:$0xff] }
 0x215   : > { %v1867_v55 = vor.u32 8388608, %v1866_v61  ;;  %v1666_v35 = vor.u32 4788187, %v1665_v60  ;;  %vm1799_vm6 = vc.u32 %v5997_v25, %v6004_v15  ;;  %v1880_v51 = vshrl.u32 %v7286_v2, %v7345_v33 }
 0x216   : > { %v1796_v39 = vadd.s32 %v1795_v38, %v1786_v21  ;;  %v1669_v4 = vcvt.s32.f32 %v1662_v14  ;;  %v1878_v54 = vor.u32 %v1877_v34, %v1876_v46  ;;  %v1882_v31 = vshll.u32 %v7286_v2, %v7344_v10 }
 0x217   : > { %v1883_v56 = vshrl.u32 %v7250_v0, %v7345_v33  ;;  %v1667_v3 = vand.u32 2147483647, %v1666_v35  ;;  %v1881_v28 = vor.u32 %v1880_v51, %v1879_v6  ;;  %vm1891_vm7 = vcmp.lt.s32.totalorder %v7346_v41, 1 }
 0x218   : > { %v1800_v12 = vadd.s32 1, %v1796_v39  ;;  %v1676_v21 = vsel %vm6014_vm15, 0, %v1674_v32  ;;  %vm1893_vm2 = vcmp.lt.s32.totalorder %v7346_v41, 3  ;;  %v6044_v22 = vshll.u32 %v1867_v55, 8 }
 0x219   : > { %v1884_v24 = vor.u32 %v1883_v56, %v1882_v31  ;;  %v1670_v20 = vmul.f32 %v1669_v4, %v1667_v3  ;;  %vm1892_vm9 = vcmp.lt.s32.totalorder %v7346_v41, 2  ;;  %v1905_v50 = vsel %vm1893_vm2, %v7348_v11, %v7347_v44 }
 0x21a   : > { %v1801_v48 = vsel %vm1799_vm6, %v1800_v12, %v1796_v39  ;;  %v6054_v63 = vsel %vm2359_vm12, %v5907_v17, 920167782  ;;  %v6061_v1 = vsel %vm2359_vm12, %v2355_v57, 1326507024  ;;  %v1693_v43 = vadd.s32 3, %v1676_v21 }
 0x21b   : > { %v1802_v37 = vadd.s32 %v1801_v48, %v1797_v42  ;;  %v1903_v45 = vsel %vm1891_vm7, %v1881_v28, %v1884_v24  ;;  %v1671_v27 = vxor.u32 2147483648, %v1670_v20  ;;  %v1899_v62 = vsel %vm1891_vm7, %v1878_v54, %v1881_v28 }
 0x21c   : > { %v1901_v32 = vsel %vm1893_vm2, %v1884_v24, %v7349_v58  ;;  %v1875_v52 = vshrl.u32 %v7284_v19, %v7345_v33  ;;  %v1906_v13 = vsel %vm1892_vm9, %v1903_v45, %v1905_v50  ;;  %v1908_v57 = vand.u32 65535, %v6044_v22 }
 0x21d   : > { %v1803_v61 = vadd.s32 536870912, %v1802_v37  ;;  %v1672_v14 = vsel %vm1551_vm14, %v1671_v27, %v1670_v20  ;;  %v6078_v60 = vshrl.u32 %v6044_v22, 16  ;;  %v1910_v38 = vand.u32 65535, %v1906_v13 }
 0x21e   : > { %v1911_v42 = vshrl.u32 %v1906_v13, 16  ;;  %v6083_v55 = vsel %vm6014_vm15, %v7327_v18, %v1672_v14  ;;  %v1896_v46 = vsel %vm1894_vm13, %v1884_v24, 2102212464  ;;  %v1902_v33 = vsel %vm1892_vm9, %v1899_v62, %v1901_v32 }
 0x21f   : > { %v1804_v10 = vshrl.u32 %v1803_v61, 30  ;;  %v1677_v34 = vmul.f32 %v6083_v55, %v6083_v55  ;;  %v1912_v6 = vmul.u32 %v1910_v38, %v1908_v57  ;;  %v6094_v39 = vmul.u32 %v1910_v38, %v6078_v60 }
 0x220   : > { %v6091_v35 = vmul.u32 %v1911_v42, %v1908_v57  ;;  %v6098_v47 = vshrl.u32 %v7303_v29, %v5943_v7  ;;  %v6100_v51 = vand.u32 3, %v1693_v43  ;;  %vm1706_vm13 = vcmp.lt.s32.totalorder %v7331_v16, 0 }
 0x221   : > { %v1805_v4 = vshll.u32 %v1804_v10, 30  ;;  %v1678_v31 = vmul.f32 -0.001358992, %v1677_v34  ;;  %v1685_v56 = vmul.f32 -0.00019511016, %v1677_v34  ;;  %v1895_v3 = vsel %vm1891_vm7, %v1875_v52, %v1878_v54 }
 0x222   : > { %v1916_v12 = vshll.u32 %v6091_v35, 16  ;;  %v1897_v24 = vsel %vm1893_vm2, %v1881_v28, %v1896_v46  ;;  %v1915_v20 = vmul.u32 %v1911_v42, %v6078_v60  ;;  %v1933_v48 = vshrl.u32 %v1902_v33, 16 }
 0x223   : > { %v6106_v21 = vsub.s32 %v1802_v37, %v1805_v4  ;;  %v1679_v44 = vadd.f32 0.041655596, %v1678_v31  ;;  %v1686_v11 = vadd.f32 0.008332121, %v1685_v56  ;;  %v1918_v50 = vshll.u32 %v6094_v39, 16 }
 0x224   : > { %vm1920_vm10 = vc.u32 %v1912_v6, %v1916_v12  ;;  %v1932_v27 = vand.u32 65535, %v1902_v33  ;;  %v1828_v62 = vsub.s32 4, %v1804_v10  ;;  %v1922_v58 = vadd.s32 %v1916_v12, %v1912_v6 }
 0x225   : > { %vm1807_vm8 = vcmp.lt.s32.totalorder %v6106_v21, 0  ;;  %v1808_v45 = vsub.s32 0, %v6106_v21  ;;  %v1921_v54 = vsel %vm1920_vm10, 1, %v7283_v40  ;;  %v1680_v37 = vmul.f32 %v1679_v44, %v1677_v34 }
 0x226   : > { %v1687_v43 = vmul.f32 %v1686_v11, %v1677_v34  ;;  %vm6117_vm4 = vcmp.le.f32.partialorder %v1704_v36, 0.7853982  ;;  %v1923_v61 = vadd.s32 %v1921_v54, %v1915_v20  ;;  %v1935_v52 = vmul.u32 %v1933_v48, %v1908_v57 }
 0x227   : > { %v1809_v32 = vsel %vm1807_vm8, %v1808_v45, %v6106_v21  ;;  %v1681_v13 = vadd.f32 -0.4999988, %v1680_v37  ;;  %vm1924_vm14 = vc.u32 %v1922_v58, %v1918_v50  ;;  %vm1696_vm5 = vcmp.eq.s32.totalorder %v6100_v51, 0 }
 0x228   : > { %v1688_v14 = vadd.f32 -0.16666654, %v1687_v43  ;;  %v1810_v38 = vclz %v1809_v32  ;;  %vm1699_vm3 = vcmp.eq.s32.totalorder %v6100_v51, 2  ;;  %v1798_v42 = vadd.s32 %v6004_v15, %v5997_v25 }
 0x229   : > { %v6128_v36 = vsel %vm1892_vm9, %v1895_v3, %v1897_v24  ;;  %v1925_v46 = vsel %vm1924_vm14, 1, %v7283_v40  ;;  %v1936_v33 = vmul.u32 %v1932_v27, %v6078_v60  ;;  %v1682_v6 = vmul.f32 %v1681_v13, %v1677_v34 }
 0x22a   : > { %v1689_v4 = vmul.f32 %v1688_v14, %v1677_v34  ;;  %vm1695_vm0 = vcmp.lt.s32.totalorder %v6100_v51, 2  ;;  %v3997_v31 = vadd.s32 4294967294, %v1810_v38  ;;  %v6135_v56 = vsel %vm1706_vm13, %v1828_v62, %v1804_v10 }
 0x22b   : > { %vm1692_vm15 = vweird.f32 %v7327_v18  ;;  %v1917_v25 = vshrl.u32 %v6091_v35, 16  ;;  %v1927_v15 = vadd.s32 %v1925_v46, %v1923_v61  ;;  %v1934_v41 = vmul.u32 %v1932_v27, %v1908_v57  ;;  %v7354_v18 = vld [vmem:[#allocation22_spill] sm:$0xff] }
 0x22c   : > { %v1938_v3 = vshll.u32 %v1935_v52, 16  ;;  %v1683_v12 = vadd.f32 1.0, %v1682_v6  ;;  %v1690_v24 = vadd.f32 1.0, %v1689_v4  ;;  %vm3998_vm6 = vcmp.lt.s32.totalorder %v3997_v31, 0  ;;  %v7352_v4 = vld [vmem:[#allocation4_spill] sm:$0xff] }
 0x22d   : > { %v1919_v20 = vshrl.u32 %v6094_v39, 16  ;;  %v1813_v34 = vsel %vm3998_vm6, 0, %v3997_v31  ;;  %v1831_v44 = vsel %vm6117_vm4, 0, %v6135_v56  ;;  %v1937_v10 = vmul.u32 %v1933_v48, %v6078_v60 }
 0x22e   : > { %v1940_v11 = vshll.u32 %v1936_v33, 16  ;;  %v1691_v50 = vmul.f32 %v1690_v24, %v6083_v55  ;;  %v1700_v45 = vxor.u32 2147483648, %v1683_v12  ;;  %v1814_v35 = vsub.s32 32, %v1813_v34 }
 0x22f   : > { %v1815_v57 = vshll.u32 %v6106_v21, %v1813_v34  ;;  %v1818_v54 = vsub.s32 4294967266, %v1813_v34  ;;  %v1928_v27 = vadd.s32 %v1927_v15, %v1917_v25  ;;  %vm1942_vm7 = vc.u32 %v1934_v41, %v1938_v3  ;;  %v7353_v15 = vld [vmem:[#allocation18_spill] sm:$0xff] }
 0x230   : > { %v1944_v37 = vadd.s32 %v1938_v3, %v1934_v41  ;;  %v1697_v43 = vxor.u32 2147483648, %v1691_v50  ;;  %v1816_v39 = vshrl.u32 %v1798_v42, %v1814_v35  ;;  %v1939_v62 = vshrl.u32 %v1935_v52, 16 }
 0x231   : > { %v1943_v58 = vsel %vm1942_vm7, 1, %v7283_v40  ;;  %v1819_v32 = vadd.s32 127, %v1818_v54  ;;  %v1941_v61 = vshrl.u32 %v1936_v33, 16  ;;  %v1701_v55 = vsel %vm1699_vm3, %v1700_v45, %v1691_v50 }
 0x232   : > { %v1945_v13 = vadd.s32 %v1943_v58, %v1937_v10  ;;  %vm1946_vm2 = vc.u32 %v1944_v37, %v1940_v11  ;;  %v1698_v60 = vsel %vm1696_vm5, %v1683_v12, %v1697_v43  ;;  %v1817_v21 = vor.u32 %v1816_v39, %v1815_v57 }
 0x233   : > { %v1947_v48 = vsel %vm1946_vm2, 1, %v7283_v40  ;;  %v1702_v14 = vsel %vm1695_vm0, %v1698_v60, %v1701_v55  ;;  %v1820_v38 = vshll.u32 %v1819_v32, 23  ;;  %v6154_v52 = vadd.s32 %v1928_v27, %v1919_v20  ;;  %v7355_v27 = vld [vmem:[#allocation24_spill] sm:$0xff] }
 0x234   : > { %v1949_v42 = vadd.s32 %v1947_v48, %v1945_v13  ;;  %v1703_v46 = vsel %vm1692_vm15, nan, %v1702_v14  ;;  %v6158_v33 = vadd.s32 %v1944_v37, %v1940_v11  ;;  %v1952_v6 = vmul.u32 %v6044_v22, %v6128_v36 }
 0x235   : > { %v2014_v31 = vand.u32 2147483647, %v7352_v4  ;;  %4025 = vmatmul.msk.f32.gmra.mxu1 %vm2799_vm11, %v1703_v46  ;;  %v1821_v56 = vor.u32 4788187, %v1820_v38  ;;  %v1824_v25 = vcvt.s32.f32 %v1817_v21  ;;  %v2031_v41 = vshll.u32 %v7284_v19, %v7353_v15  ;;  %v7357_v38 = vld [vmem:[#allocation33_spill] sm:$0xff]  ;;  %v7358_v46 = vld [vmem:[#allocation35_spill] sm:$0xff] }
 0x236   : > { %v1950_v51 = vadd.s32 %v1949_v42, %v1939_v62  ;;  %v2032_v12 = vshrl.u32 %v7285_v8, %v7354_v18  ;;  %v2034_v24 = vshll.u32 %v7285_v8, %v7353_v15  ;;  %v2035_v22 = vshrl.u32 %v7286_v2, %v7354_v18  ;;  %v7356_v62 = vld [vmem:[#allocation42_spill] sm:$0xff] }
 0x237   : > { %v2021_v3 = vand.u32 8388607, %v2014_v31  ;;  %v1822_v36 = vand.u32 2147483647, %v1821_v56  ;;  %v2037_v34 = vshll.u32 %v7286_v2, %v7353_v15  ;;  %v2038_v10 = vshrl.u32 %v7250_v0, %v7354_v18  ;;  %v7359_v56 = vld [vmem:[#allocation27_spill] sm:$0xff] }
 0x238   : > { %v1951_v20 = vadd.s32 %v1950_v51, %v1941_v61  ;;  %vm1954_vm9 = vc.u32 %v6154_v52, %v6158_v33  ;;  %v2033_v50 = vor.u32 %v2032_v12, %v2031_v41  ;;  %v2036_v45 = vor.u32 %v2035_v22, %v2034_v24 }
 0x239   : > { %v2022_v11 = vor.u32 8388608, %v2021_v3  ;;  %v1825_v35 = vmul.f32 %v1824_v25, %v1822_v36  ;;  %v2039_v54 = vor.u32 %v2038_v10, %v2037_v34  ;;  %vm2046_vm10 = vcmp.lt.s32.totalorder %v7355_v27, 1 }
 0x23a   : > { %v1955_v57 = vadd.s32 1, %v1951_v20  ;;  %v6183_v37 = vshll.u32 %v7303_v29, %v5795_v59  ;;  %v6187_v43 = vshrl.u32 %v7305_v30, %v5943_v7  ;;  %vm2048_vm8 = vcmp.lt.s32.totalorder %v7355_v27, 3 }
 0x23b   : > { %v6190_v39 = vshll.u32 %v2022_v11, 8  ;;  %v4014_v58 = vadd.s32 4294967169, %v7356_v62  ;;  %v1826_v32 = vxor.u32 2147483648, %v1825_v35  ;;  %vm2047_vm14 = vcmp.lt.s32.totalorder %v7355_v27, 2 }
 0x23c   : > { %v1956_v61 = vsel %vm1954_vm9, %v1955_v57, %v1951_v20  ;;  %v6196_v13 = vor.u32 %v6098_v47, %v5951_v53  ;;  %v1848_v60 = vadd.s32 3, %v1831_v44  ;;  %v2058_v21 = vsel %vm2046_vm10, %v2036_v45, %v2039_v54 }
 0x23d   : > { %v1957_v55 = vadd.s32 %v1956_v61, %v1952_v6  ;;  %v1827_v48 = vsel %vm1706_vm13, %v1826_v32, %v1825_v35  ;;  %v2054_v14 = vsel %vm2046_vm10, %v2033_v50, %v2036_v45  ;;  %v2056_v42 = vsel %vm2048_vm8, %v2039_v54, %v7357_v38 }
 0x23e   : > { %v2060_v53 = vsel %vm2048_vm8, %v7359_v56, %v7358_v46  ;;  %v6214_v47 = vsel %vm6117_vm4, %v7331_v16, %v1827_v48  ;;  %v2063_v25 = vand.u32 65535, %v6190_v39  ;;  %v6222_v15 = vshrl.u32 %v6190_v39, 16 }
 0x23f   : > { %v1958_v44 = vadd.s32 536870912, %v1957_v55  ;;  %v2061_v6 = vsel %vm2047_vm14, %v2058_v21, %v2060_v53  ;;  %v1832_v51 = vmul.f32 %v6214_v47, %v6214_v47  ;;  %v2030_v28 = vshrl.u32 %v7284_v19, %v7354_v18 }
 0x240   : > { %v2065_v41 = vand.u32 65535, %v2061_v6  ;;  %v2066_v3 = vshrl.u32 %v2061_v6, 16  ;;  %v2051_v24 = vsel %vm2049_vm1, %v2039_v54, 2102212464  ;;  %v2057_v22 = vsel %vm2047_vm14, %v2054_v14, %v2056_v42 }
 0x241   : > { %v6224_v12 = vshrl.u32 %v1958_v44, 30  ;;  %v1833_v36 = vmul.f32 -0.001358992, %v1832_v51  ;;  %v1840_v20 = vmul.f32 -0.00019511016, %v1832_v51  ;;  %v6232_v11 = vadd.s32 1, %v4014_v58 }
 0x242   : > { %v2067_v34 = vmul.u32 %v2065_v41, %v2063_v25  ;;  %v2068_v10 = vmul.u32 %v2066_v3, %v2063_v25  ;;  %v6234_v35 = vand.u32 3, %v1848_v60  ;;  %v6238_v62 = vmul.u32 %v2065_v41, %v6222_v15 }
 0x243   : > { %v1960_v57 = vshll.u32 %v6224_v12, 30  ;;  %v1834_v18 = vadd.f32 0.041655596, %v1833_v36  ;;  %v1841_v32 = vadd.f32 0.008332121, %v1840_v20  ;;  %v2070_v54 = vmul.u32 %v2066_v3, %v6222_v15 }
 0x244   : > { %v2071_v61 = vshll.u32 %v2068_v10, 16  ;;  %v2050_v48 = vsel %vm2046_vm10, %v2030_v28, %v2033_v50  ;;  %v2052_v58 = vsel %vm2048_vm8, %v2036_v45, %v2051_v24  ;;  %v2088_v60 = vshrl.u32 %v2057_v22, 16 }
 0x245   : > { %v6241_v21 = vsub.s32 %v1957_v55, %v1960_v57  ;;  %v1835_v14 = vmul.f32 %v1834_v18, %v1832_v51  ;;  %v1842_v38 = vmul.f32 %v1841_v32, %v1832_v51  ;;  %v2073_v42 = vshll.u32 %v6238_v62, 16 }
 0x246   : > { %vm2075_vm1 = vc.u32 %v2067_v34, %v2071_v61  ;;  %v2087_v55 = vand.u32 65535, %v2057_v22  ;;  %v2077_v6 = vadd.s32 %v2071_v61, %v2067_v34  ;;  %vm1851_vm4 = vcmp.eq.s32.totalorder %v6234_v35, 0 }
 0x247   : > { %vm1962_vm13 = vcmp.lt.s32.totalorder %v6241_v21, 0  ;;  %v1963_v46 = vsub.s32 0, %v6241_v21  ;;  %v2076_v56 = vsel %vm2075_vm1, 1, %v7283_v40  ;;  %v1836_v53 = vadd.f32 -0.4999988, %v1835_v14 }
 0x248   : > { %v1843_v44 = vadd.f32 -0.16666654, %v1842_v38  ;;  %v2078_v50 = vadd.s32 %v2076_v56, %v2070_v54  ;;  %vm1854_vm5 = vcmp.eq.s32.totalorder %v6234_v35, 2  ;;  %v6256_v41 = vsel %vm2047_vm14, %v2050_v48, %v2052_v58 }
 0x249   : > { %v1964_v45 = vsel %vm1962_vm13, %v1963_v46, %v6241_v21  ;;  %v6258_v3 = vmul.u32 %v2088_v60, %v2063_v25  ;;  %v1837_v28 = vmul.f32 %v1836_v53, %v1832_v51  ;;  %vm1850_vm3 = vcmp.lt.s32.totalorder %v6234_v35, 2 }
 0x24a   : > { %v1844_v24 = vmul.f32 %v1843_v44, %v1832_v51  ;;  %v1965_v22 = vclz %v1964_v45  ;;  %vm2079_vm0 = vc.u32 %v2077_v6, %v2073_v42  ;;  %vm1847_vm15 = vweird.f32 %v7331_v16 }
 0x24b   : > { %vm1861_vm6 = vcmp.lt.s32.totalorder %v7341_v5, 0  ;;  %v2072_v36 = vshrl.u32 %v2068_v10, 16  ;;  %v2080_v20 = vsel %vm2079_vm0, 1, %v7283_v40  ;;  %v2089_v34 = vmul.u32 %v2087_v55, %v2063_v25 }
 0x24c   : > { %v1838_v57 = vadd.f32 1.0, %v1837_v28  ;;  %v1845_v27 = vadd.f32 1.0, %v1844_v24  ;;  %v4000_v18 = vadd.s32 4294967294, %v1965_v22  ;;  %v2082_v32 = vadd.s32 %v2080_v20, %v2078_v50  ;;  %v7362_v28 = vld [vmem:[#allocation7_spill] sm:$0xff] }
 0x24d   : > { %v1953_v54 = vadd.s32 %v6158_v33, %v6154_v52  ;;  %v2091_v51 = vmul.u32 %v2087_v55, %v6222_v15  ;;  %v2093_v61 = vshll.u32 %v6258_v3, 16  ;;  %v2107_v48 = vmul.u32 %v6190_v39, %v6256_v41 }
 0x24e   : > { %v1846_v58 = vmul.f32 %v1845_v27, %v6214_v47  ;;  %v1855_v10 = vxor.u32 2147483648, %v1838_v57  ;;  %vm4001_vm7 = vcmp.lt.s32.totalorder %v4000_v18, 0  ;;  %v2074_v25 = vshrl.u32 %v6238_v62, 16 }
 0x24f   : > { %v1968_v14 = vsel %vm4001_vm7, 0, %v4000_v18  ;;  %v2083_v38 = vadd.s32 %v2082_v32, %v2072_v36  ;;  %v2092_v42 = vmul.u32 %v2088_v60, %v6222_v15  ;;  %vm2097_vm2 = vc.u32 %v2089_v34, %v2093_v61 }
 0x250   : > { %v1852_v46 = vxor.u32 2147483648, %v1846_v58  ;;  %v1969_v52 = vsub.s32 32, %v1968_v14  ;;  %v1970_v33 = vshll.u32 %v6241_v21, %v1968_v14  ;;  %v2095_v56 = vshll.u32 %v2091_v51, 16 }
 0x251   : > { %v1856_v55 = vsel %vm1854_vm5, %v1855_v10, %v1846_v58  ;;  %vm6278_vm9 = vcmp.le.f32.partialorder %v1859_v49, 0.7853982  ;;  %v1973_v62 = vsub.s32 4294967266, %v1968_v14  ;;  %v1983_v53 = vsub.s32 4, %v6224_v12  ;;  %v7363_v58 = vld [vmem:[#allocation25_spill] sm:$0xff] }
 0x252   : > { %v2094_v15 = vshrl.u32 %v6258_v3, 16  ;;  %v1853_v60 = vsel %vm1851_vm4, %v1838_v57, %v1852_v46  ;;  %v1971_v44 = vshrl.u32 %v1953_v54, %v1969_v52  ;;  %v2098_v21 = vsel %vm2097_vm2, 1, %v7283_v40 }
 0x253   : > { %v2099_v6 = vadd.s32 %v2093_v61, %v2089_v34  ;;  %v1857_v50 = vsel %vm1850_vm3, %v1853_v60, %v1856_v55  ;;  %v1974_v45 = vadd.s32 127, %v1973_v62  ;;  %v2100_v49 = vadd.s32 %v2098_v21, %v2092_v42  ;;  %v7365_v62 = vld [vmem:[#allocation29_spill] sm:$0xff] }
 0x254   : > { %v2169_v24 = vand.u32 2147483647, %v7362_v28  ;;  %v1858_v22 = vsel %vm1847_vm15, nan, %v1857_v50  ;;  %v1972_v36 = vor.u32 %v1971_v44, %v1970_v33  ;;  %v6292_v20 = vadd.s32 %v2083_v38, %v2074_v25  ;;  %v7364_v25 = vld [vmem:[#allocation26_spill] sm:$0xff]  ;;  %v7366_v60 = vld [vmem:[#allocation37_spill] sm:$0xff]  ;;  %v7367_v44 = vld [vmem:[#allocation31_spill] sm:$0xff] }
 0x255   : > { %vm2101_vm10 = vc.u32 %v2099_v6, %v2095_v56  ;;  %4026 = vmatmul.msk.f32.gmra.mxu1 %vm2799_vm11, %v1858_v22  ;;  %v1975_v3 = vshll.u32 %v1974_v45, 23  ;;  %v6296_v34 = vadd.s32 %v2099_v6, %v2095_v56  ;;  %v1984_v16 = vsel %vm1861_vm6, %v1983_v53, %v6224_v12 }
 0x256   : > { %v2102_v57 = vsel %vm2101_vm10, 1, %v7283_v40  ;;  %v2176_v35 = vand.u32 8388607, %v2169_v24  ;;  %v1979_v27 = vcvt.s32.f32 %v1972_v36  ;;  %v2096_v18 = vshrl.u32 %v2091_v51, 16 }
 0x257   : > { %v2104_v32 = vadd.s32 %v2102_v57, %v2100_v49  ;;  %vm2514_vm8 = vcmp.lt.s32.totalorder %v5792_v9, 4  ;;  %v1976_v54 = vor.u32 4788187, %v1975_v3  ;;  %v2186_v10 = vshll.u32 %v7284_v19, %v7363_v58 }
 0x258   : > { %v2177_v61 = vor.u32 8388608, %v2176_v35  ;;  %v2187_v14 = vshrl.u32 %v7285_v8, %v7364_v25  ;;  %v2189_v42 = vshll.u32 %v7285_v8, %v7363_v58  ;;  %v2190_v46 = vshrl.u32 %v7286_v2, %v7364_v25 }
 0x259   : > { %v2105_v38 = vadd.s32 %v2104_v32, %v2094_v15  ;;  %v2192_v12 = vshll.u32 %v7286_v2, %v7363_v58  ;;  %v1977_v51 = vand.u32 2147483647, %v1976_v54  ;;  %vm2109_vm14 = vc.u32 %v6292_v20, %v6296_v34 }
 0x25a   : > { %v2188_v52 = vor.u32 %v2187_v14, %v2186_v10  ;;  %v2193_v33 = vshrl.u32 %v7250_v0, %v7364_v25  ;;  %v2191_v55 = vor.u32 %v2190_v46, %v2189_v42  ;;  %vm2201_vm1 = vcmp.lt.s32.totalorder %v7365_v62, 1 }
 0x25b   : > { %v2106_v56 = vadd.s32 %v2105_v38, %v2096_v18  ;;  %vm2203_vm13 = vcmp.lt.s32.totalorder %v7365_v62, 3  ;;  %v1980_v53 = vmul.f32 %v1979_v27, %v1977_v51  ;;  %vm2202_vm4 = vcmp.lt.s32.totalorder %v7365_v62, 2  ;;  %v7368_v27 = vld [vmem:[#allocation36_spill] sm:$0xff] }
 0x25c   : > { %v2194_v15 = vor.u32 %v2193_v33, %v2192_v12  ;;  %v2215_v21 = vsel %vm2203_vm13, %v7367_v44, %v7366_v60  ;;  %v2510_v6 = vor.u32 %v6187_v43, %v6183_v37  ;;  %v1986_v50 = vsel %vm6278_vm9, 0, %v1984_v16 }
 0x25d   : > { %v2110_v45 = vadd.s32 1, %v2106_v56  ;;  %v6329_v49 = vshll.u32 %v2177_v61, 8  ;;  %vm2645_vm5 = vcmp.gt.s32.totalorder %v6232_v11, 0  ;;  %v1981_v22 = vxor.u32 2147483648, %v1980_v53 }
 0x25e   : > { %v2185_v36 = vshrl.u32 %v7284_v19, %v7364_v25  ;;  %v2213_v3 = vsel %vm2201_vm1, %v2191_v55, %v2194_v15  ;;  %v2209_v35 = vsel %vm2201_vm1, %v2188_v52, %v2191_v55  ;;  %v2211_v16 = vsel %vm2203_vm13, %v2194_v15, %v7368_v27 }
 0x25f   : > { %v2111_v57 = vsel %vm2109_vm14, %v2110_v45, %v2106_v56  ;;  %v2216_v18 = vsel %vm2202_vm4, %v2213_v3, %v2215_v21  ;;  %v1982_v32 = vsel %vm1861_vm6, %v1981_v22, %v1980_v53  ;;  %v2003_v54 = vadd.s32 3, %v1986_v50 }
 0x260   : > { %v2112_v61 = vadd.s32 %v2111_v57, %v2107_v48  ;;  %vm7369_vm3 = vcmp.lt.s32.totalorder %v7365_v62, 4  ;;  %v6356_v10 = vsel %vm6278_vm9, %v7341_v5, %v1982_v32  ;;  %v2218_v25 = vand.u32 65535, %v6329_v49 }
 0x261   : > { %v2206_v58 = vsel %vm7369_vm3, %v2194_v15, 2102212464  ;;  %v6360_v14 = vshrl.u32 %v6329_v49, 16  ;;  %v2220_v38 = vand.u32 65535, %v2216_v18  ;;  %v1987_v42 = vmul.f32 %v6356_v10, %v6356_v10 }
 0x262   : > { %v2113_v46 = vadd.s32 536870912, %v2112_v61  ;;  %v6366_v39 = vsel %vm2202_vm4, %v2209_v35, %v2211_v16  ;;  %v2221_v41 = vshrl.u32 %v2216_v18, 16  ;;  %v6371_v48 = vsel %vm2514_vm8, %v6196_v13, 920167782 }
 0x263   : > { %v2205_v47 = vsel %vm2201_vm1, %v2185_v36, %v2188_v52  ;;  %v2207_v12 = vsel %vm2203_vm13, %v2191_v55, %v2206_v58  ;;  %v6378_v51 = vmul.u32 %v2220_v38, %v6360_v14  ;;  %v1988_v33 = vmul.f32 -0.001358992, %v1987_v42 }
 0x264   : > { %v1995_v56 = vmul.f32 -0.00019511016, %v1987_v42  ;;  %v2114_v53 = vshrl.u32 %v2113_v46, 30  ;;  %v2223_v15 = vmul.u32 %v2221_v41, %v2218_v25  ;;  %v6383_v60 = vsel %vm2645_vm5, %v6232_v11, 0 }
 0x265   : > { %v6385_v44 = vand.u32 3, %v2003_v54  ;;  %v2222_v21 = vmul.u32 %v2220_v38, %v2218_v25  ;;  %v2243_v52 = vshrl.u32 %v6366_v39, 16  ;;  %v1989_v50 = vadd.f32 0.041655596, %v1988_v33 }
 0x266   : > { %v1996_v45 = vadd.f32 0.008332121, %v1995_v56  ;;  %vm6390_vm0 = vcmp.le.f32.partialorder %v2014_v31, 0.7853982  ;;  %vm2016_vm15 = vcmp.lt.s32.totalorder %v7352_v4, 0  ;;  %v2115_v22 = vshll.u32 %v2114_v53, 30 }
 0x267   : > { %v6397_v11 = vsel %vm2202_vm4, %v2205_v47, %v2207_v12  ;;  %v2226_v36 = vshll.u32 %v2223_v15, 16  ;;  %v2228_v3 = vshll.u32 %v6378_v51, 16  ;;  %v2242_v57 = vand.u32 65535, %v6366_v39 }
 0x268   : > { %v1990_v35 = vmul.f32 %v1989_v50, %v1987_v42  ;;  %v1997_v27 = vmul.f32 %v1996_v45, %v1987_v42  ;;  %v6401_v16 = vsub.s32 %v2112_v61, %v2115_v22  ;;  %v2225_v31 = vmul.u32 %v2221_v41, %v6360_v14 }
 0x269   : > { %v2138_v18 = vsub.s32 4, %v2114_v53  ;;  %vm2230_vm6 = vc.u32 %v2222_v21, %v2226_v36  ;;  %v2232_v32 = vadd.s32 %v2226_v36, %v2222_v21  ;;  %v6404_v54 = vmul.u32 %v2243_v52, %v2218_v25 }
 0x26a   : > { %v1991_v58 = vadd.f32 -0.4999988, %v1990_v35  ;;  %v1998_v62 = vadd.f32 -0.16666654, %v1997_v27  ;;  %vm2009_vm7 = vcmp.eq.s32.totalorder %v6385_v44, 2  ;;  %vm2117_vm2 = vcmp.lt.s32.totalorder %v6401_v16, 0 }
 0x26b   : > { %v2118_v38 = vsub.s32 0, %v6401_v16  ;;  %vm2006_vm9 = vcmp.eq.s32.totalorder %v6385_v44, 0  ;;  %v2227_v46 = vshrl.u32 %v2223_v15, 16  ;;  %v2231_v61 = vsel %vm2230_vm6, 1, %v7283_v40  ;;  %v7372_v27 = vld [vmem:[#allocation16_spill] sm:$0xff] }
 0x26c   : > { %vm2234_vm10 = vc.u32 %v2232_v32, %v2228_v3  ;;  %v2244_v39 = vmul.u32 %v2242_v57, %v2218_v25  ;;  %v1992_v41 = vmul.f32 %v1991_v58, %v1987_v42  ;;  %v1999_v47 = vmul.f32 %v1998_v62, %v1987_v42 }
 0x26d   : > { %vm2005_vm14 = vcmp.lt.s32.totalorder %v6385_v44, 2  ;;  %v2119_v12 = vsel %vm2117_vm2, %v2118_v38, %v6401_v16  ;;  %v2233_v33 = vadd.s32 %v2231_v61, %v2225_v31  ;;  %vm2002_vm1 = vweird.f32 %v7341_v5  ;;  %v7373_v44 = vld [vmem:[#allocation38_spill] sm:$0xff] }
 0x26e   : > { %v2120_v56 = vclz %v2119_v12  ;;  %v2235_v21 = vsel %vm2234_vm10, 1, %v7283_v40  ;;  %v2246_v50 = vmul.u32 %v2242_v57, %v6360_v14  ;;  %v2248_v15 = vshll.u32 %v6404_v54, 16 }
 0x26f   : > { %v1993_v45 = vadd.f32 1.0, %v1992_v41  ;;  %v2000_v22 = vadd.f32 1.0, %v1999_v47  ;;  %v6419_v25 = vsel %vm2016_vm15, %v2138_v18, %v2114_v53  ;;  %v2237_v42 = vadd.s32 %v2235_v21, %v2233_v33 }
 0x270   : > { %v2108_v36 = vadd.s32 %v6296_v34, %v6292_v20  ;;  %v4003_v3 = vadd.s32 4294967294, %v2120_v56  ;;  %v2262_v35 = vmul.u32 %v6329_v49, %v6397_v11  ;;  %v2324_v31 = vand.u32 2147483647, %v7372_v27 }
 0x271   : > { %v2001_v57 = vmul.f32 %v2000_v22, %v6356_v10  ;;  %v2010_v32 = vxor.u32 2147483648, %v1993_v45  ;;  %v2229_v58 = vshrl.u32 %v6378_v51, 16  ;;  %v2247_v62 = vmul.u32 %v2243_v52, %v6360_v14 }
 0x272   : > { %vm4004_vm13 = vcmp.lt.s32.totalorder %v4003_v3, 0  ;;  %v2141_v53 = vsel %vm6390_vm0, 0, %v6419_v25  ;;  %v2250_v18 = vshll.u32 %v2246_v50, 16  ;;  %vm2252_vm4 = vc.u32 %v2244_v39, %v2248_v15 }
 0x273   : > { %v2007_v20 = vxor.u32 2147483648, %v2001_v57  ;;  %v2123_v34 = vsel %vm4004_vm13, 0, %v4003_v3  ;;  %v2238_v38 = vadd.s32 %v2237_v42, %v2227_v46  ;;  %v2253_v61 = vsel %vm2252_vm4, 1, %v7283_v40 }
 0x274   : > { %v2011_v10 = vsel %vm2009_vm7, %v2010_v32, %v2001_v57  ;;  %v2124_v41 = vsub.s32 32, %v2123_v34  ;;  %v2125_v51 = vshll.u32 %v6401_v16, %v2123_v34  ;;  %v2128_v47 = vsub.s32 4294967266, %v2123_v34 }
 0x275   : > { %v2008_v14 = vsel %vm2006_vm9, %v1993_v45, %v2007_v20  ;;  %v2254_v52 = vadd.s32 %v2248_v15, %v2244_v39  ;;  %v2255_v12 = vadd.s32 %v2253_v61, %v2247_v62  ;;  %v2331_v33 = vand.u32 8388607, %v2324_v31 }
 0x276   : > { %v2012_v46 = vsel %vm2005_vm14, %v2008_v14, %v2011_v10  ;;  %v2126_v56 = vshrl.u32 %v2108_v36, %v2124_v41  ;;  %v2129_v21 = vadd.s32 127, %v2128_v47  ;;  %v2249_v22 = vshrl.u32 %v6404_v54, 16 }
 0x277   : > { %v2013_v25 = vsel %vm2002_vm1, nan, %v2012_v46  ;;  %v6445_v16 = vadd.s32 %v2238_v38, %v2229_v58  ;;  %vm2256_vm5 = vc.u32 %v2254_v52, %v2250_v18  ;;  %v6447_v42 = vadd.s32 %v2254_v52, %v2250_v18 }
 0x278   : > { %4027 = vmatmul.msk.f32.gmra.mxu1 %vm2799_vm11, %v2013_v25  ;;  %v2127_v39 = vor.u32 %v2126_v56, %v2125_v51  ;;  %v2130_v15 = vshll.u32 %v2129_v21, 23  ;;  %v2257_v45 = vsel %vm2256_vm5, 1, %v7283_v40  ;;  %v2341_v36 = vshll.u32 %v7284_v19, %v7373_v44 }
 0x279   : > { %v2251_v3 = vshrl.u32 %v2246_v50, 16  ;;  %v2259_v57 = vadd.s32 %v2257_v45, %v2255_v12  ;;  %v2332_v54 = vor.u32 8388608, %v2331_v33  ;;  %v2342_v5 = vshrl.u32 %v7285_v8, %v7324_v23 }
 0x27a   : > { %v2131_v32 = vor.u32 4788187, %v2130_v15  ;;  %v2134_v58 = vcvt.s32.f32 %v2127_v39  ;;  %v2344_v62 = vshll.u32 %v7285_v8, %v7373_v44  ;;  %v2345_v18 = vshrl.u32 %v7286_v2, %v7324_v23 }
 0x27b   : > { %v2260_v20 = vadd.s32 %v2259_v57, %v2249_v22  ;;  %v6459_v34 = vor.u32 %v2342_v5, %v2341_v36  ;;  %v2347_v38 = vshll.u32 %v7286_v2, %v7373_v44  ;;  %v2348_v50 = vshrl.u32 %v7250_v0, %v7324_v23 }
 0x27c   : > { %v2132_v61 = vand.u32 2147483647, %v2131_v32  ;;  %vm2264_vm3 = vc.u32 %v6445_v16, %v6447_v42  ;;  %v2346_v10 = vor.u32 %v2345_v18, %v2344_v62  ;;  %vm2356_vm6 = vcmp.lt.s32.totalorder %v7340_v26, 1 }
 0x27d   : > { %v2261_v41 = vadd.s32 %v2260_v20, %v2251_v3  ;;  %v2349_v51 = vor.u32 %v2348_v50, %v2347_v38  ;;  %vm2357_vm7 = vcmp.lt.s32.totalorder %v7340_v26, 2  ;;  %vm2358_vm2 = vcmp.lt.s32.totalorder %v7340_v26, 3 }
 0x27e   : > { %v2135_v47 = vmul.f32 %v2134_v58, %v2132_v61  ;;  %v2364_v14 = vsel %vm2356_vm6, %v6459_v34, %v2346_v10  ;;  %v2370_v52 = vsel %vm2358_vm2, %v5907_v17, %v6061_v1  ;;  %v6477_v12 = vshll.u32 %v2332_v54, 8 }
 0x27f   : > { %v6480_v33 = vand.u32 31, %v6383_v60  ;;  %v2265_v46 = vadd.s32 1, %v2261_v41  ;;  %v2366_v56 = vsel %vm2358_vm2, %v2349_v51, %v6054_v63  ;;  %v2368_v21 = vsel %vm2356_vm6, %v2346_v10, %v2349_v51 }
 0x280   : > { %v6492_v22 = vsel %vm2514_vm8, %v2510_v6, 1326507024  ;;  %v2136_v17 = vxor.u32 2147483648, %v2135_v47  ;;  %v6496_v1 = vsel %vm2357_vm7, %v2364_v14, %v2366_v56  ;;  %v2371_v25 = vsel %vm2357_vm7, %v2368_v21, %v2370_v52 }
 0x281   : > { %v2158_v39 = vadd.s32 3, %v2141_v53  ;;  %v2266_v63 = vsel %vm2264_vm3, %v2265_v46, %v2261_v41  ;;  %v2373_v15 = vand.u32 65535, %v6477_v12  ;;  %v2374_v37 = vshrl.u32 %v6477_v12, 16 }
 0x282   : > { %v6506_v43 = vshrl.u32 %v6383_v60, 5  ;;  %v2137_v6 = vsel %vm2016_vm15, %v2136_v17, %v2135_v47  ;;  %v2267_v45 = vadd.s32 %v2266_v63, %v2262_v35  ;;  %v2375_v44 = vand.u32 65535, %v2371_v25 }
 0x283   : > { %v6514_v53 = vsub.s32 32, %v6480_v33  ;;  %v6519_v36 = vsel %vm6390_vm0, %v7352_v4, %v2137_v6  ;;  %v2376_v3 = vshrl.u32 %v2371_v25, 16  ;;  %v2398_v60 = vshrl.u32 %v6496_v1, 16 }
 0x284   : > { %v6524_v57 = vshll.u32 %v7250_v0, %v6480_v33  ;;  %v6528_v49 = vshll.u32 %v7303_v29, %v6480_v33  ;;  %v2142_v11 = vmul.f32 %v6519_v36, %v6519_v36  ;;  %v2268_v35 = vadd.s32 536870912, %v2267_v45 }
 0x285   : > { %v6532_v54 = vand.u32 3, %v2158_v39  ;;  %v2377_v55 = vmul.u32 %v2375_v44, %v2373_v15  ;;  %v6534_v5 = vmul.u32 %v2376_v3, %v2373_v15  ;;  %v6536_v32 = vmul.u32 %v2375_v44, %v2374_v37 }
 0x286   : > { %v2143_v58 = vmul.f32 -0.001358992, %v2142_v11  ;;  %v2150_v62 = vmul.f32 -0.00019511016, %v2142_v11  ;;  %v2269_v18 = vshrl.u32 %v2268_v35, 30  ;;  %v2340_v20 = vshrl.u32 %v7284_v19, %v7324_v23 }
 0x287   : > { %v2361_v38 = vsel %vm2359_vm12, %v2349_v51, 2102212464  ;;  %v2381_v50 = vshll.u32 %v6534_v5, 16  ;;  %v2397_v61 = vand.u32 65535, %v6496_v1  ;;  %v6544_v41 = vmul.u32 %v2398_v60, %v2373_v15 }
 0x288   : > { %v2144_v47 = vadd.f32 0.041655596, %v2143_v58  ;;  %v2151_v14 = vadd.f32 0.008332121, %v2150_v62  ;;  %vm2171_vm0 = vcmp.lt.s32.totalorder %v7362_v28, 0  ;;  %v2270_v52 = vshll.u32 %v2269_v18, 30 }
 0x289   : > { %v2380_v46 = vmul.u32 %v2376_v3, %v2374_v37  ;;  %v2383_v56 = vshll.u32 %v6536_v32, 16  ;;  %vm2385_vm15 = vc.u32 %v2377_v55, %v2381_v50  ;;  %v2387_v21 = vadd.s32 %v2381_v50, %v2377_v55 }
 0x28a   : > { %v2145_v23 = vmul.f32 %v2144_v47, %v2142_v11  ;;  %v2152_v17 = vmul.f32 %v2151_v14, %v2142_v11  ;;  %v6548_v25 = vsub.s32 %v2267_v45, %v2270_v52  ;;  %v2360_v51 = vsel %vm2356_vm6, %v2340_v20, %v6459_v34 }
 0x28b   : > { %v2362_v1 = vsel %vm2358_vm2, %v2346_v10, %v2361_v38  ;;  %v2386_v39 = vsel %vm2385_vm15, 1, %v7283_v40  ;;  %v2399_v63 = vmul.u32 %v2397_v61, %v2373_v15  ;;  %v2403_v6 = vshll.u32 %v6544_v41, 16 }
 0x28c   : > { %v2146_v44 = vadd.f32 -0.4999988, %v2145_v23  ;;  %v2153_v3 = vadd.f32 -0.16666654, %v2152_v17  ;;  %vm2272_vm12 = vcmp.lt.s32.totalorder %v6548_v25, 0  ;;  %v2273_v35 = vsub.s32 0, %v6548_v25 }
 0x28d   : > { %vm2161_vm9 = vcmp.eq.s32.totalorder %v6532_v54, 0  ;;  %vm2164_vm10 = vcmp.eq.s32.totalorder %v6532_v54, 2  ;;  %v2293_v45 = vsub.s32 4, %v2269_v18  ;;  %v2388_v34 = vadd.s32 %v2386_v39, %v2380_v46 }
 0x28e   : > { %vm2389_vm14 = vc.u32 %v2387_v21, %v2383_v56  ;;  %v2401_v55 = vmul.u32 %v2397_v61, %v2374_v37  ;;  %v2147_v10 = vmul.f32 %v2146_v44, %v2142_v11  ;;  %v2154_v58 = vmul.f32 %v2153_v3, %v2142_v11 }
 0x28f   : > { %vm2160_vm1 = vcmp.lt.s32.totalorder %v6532_v54, 2  ;;  %v2274_v15 = vsel %vm2272_vm12, %v2273_v35, %v6548_v25  ;;  %v2390_v62 = vsel %vm2389_vm14, 1, %v7283_v40  ;;  %vm2157_vm13 = vweird.f32 %v7352_v4 }
 0x290   : > { %v2263_v20 = vadd.s32 %v6447_v42, %v6445_v16  ;;  %v2275_v38 = vclz %v2274_v15  ;;  %v2382_v50 = vshrl.u32 %v6534_v5, 16  ;;  %v2402_v47 = vmul.u32 %v2398_v60, %v2374_v37 }
 0x291   : > { %v2148_v14 = vadd.f32 1.0, %v2147_v10  ;;  %v2155_v52 = vadd.f32 1.0, %v2154_v58  ;;  %v2392_v61 = vadd.s32 %v2390_v62, %v2388_v34  ;;  %vm2407_vm4 = vc.u32 %v2399_v63, %v2403_v6 }
 0x292   : > { %v4006_v11 = vadd.s32 4294967294, %v2275_v38  ;;  %v6570_v46 = vsel %vm2357_vm7, %v2360_v51, %v2362_v1  ;;  %v2384_v56 = vshrl.u32 %v6536_v32, 16  ;;  %v2405_v21 = vshll.u32 %v2401_v55, 16 }
 0x293   : > { %v2156_v23 = vmul.f32 %v2155_v52, %v6519_v36  ;;  %v2165_v17 = vxor.u32 2147483648, %v2148_v14  ;;  %v2294_v16 = vsel %vm2171_vm0, %v2293_v45, %v2269_v18  ;;  %v2408_v42 = vsel %vm2407_vm4, 1, %v7283_v40 }
 0x294   : > { %vm6579_vm5 = vcmp.le.f32.partialorder %v2169_v24, 0.7853982  ;;  %vm4007_vm3 = vcmp.lt.s32.totalorder %v4006_v11, 0  ;;  %v2404_v26 = vshrl.u32 %v6544_v41, 16  ;;  %v2409_v60 = vadd.s32 %v2403_v6, %v2399_v63  ;;  %v7376_v41 = vld [vmem:[#allocation20_spill] sm:$0xff] }
 0x295   : > { %v2410_v5 = vadd.s32 %v2408_v42, %v2402_v47  ;;  %v2162_v32 = vxor.u32 2147483648, %v2156_v23  ;;  %v2278_v51 = vsel %vm4007_vm3, 0, %v4006_v11  ;;  %v2393_v36 = vadd.s32 %v2392_v61, %v2382_v50 }
 0x296   : > { %v2406_v1 = vshrl.u32 %v2401_v55, 16  ;;  %v2279_v39 = vsub.s32 32, %v2278_v51  ;;  %v2280_v18 = vshll.u32 %v6548_v25, %v2278_v51  ;;  %v2283_v44 = vsub.s32 4294967266, %v2278_v51 }
 0x297   : > { %vm2411_vm6 = vc.u32 %v2409_v60, %v2405_v21  ;;  %v2163_v24 = vsel %vm2161_vm9, %v2148_v14, %v2162_v32  ;;  %v2166_v3 = vsel %vm2164_vm10, %v2165_v17, %v2156_v23  ;;  %v2479_v63 = vand.u32 2147483647, %v7376_v41 }
 0x298   : > { %v2412_v35 = vsel %vm2411_vm6, 1, %v7283_v40  ;;  %v2167_v6 = vsel %vm2160_vm1, %v2163_v24, %v2166_v3  ;;  %v2281_v45 = vshrl.u32 %v2263_v20, %v2279_v39  ;;  %v2284_v34 = vadd.s32 127, %v2283_v44 }
 0x299   : > { %v2414_v55 = vadd.s32 %v2412_v35, %v2410_v5  ;;  %v2168_v25 = vsel %vm2157_vm13, nan, %v2167_v6  ;;  %v6595_v10 = vadd.s32 %v2393_v36, %v2384_v56  ;;  %v6597_v58 = vadd.s32 %v2409_v60, %v2405_v21 }
 0x29a   : > { %v2486_v15 = vand.u32 8388607, %v2479_v63  ;;  %4028 = vmatmul.msk.f32.gmra.mxu1 %vm2799_vm11, %v2168_v25  ;;  %v2282_v62 = vor.u32 %v2281_v45, %v2280_v18  ;;  %v2285_v38 = vshll.u32 %v2284_v34, 23  ;;  %v2417_v54 = vmul.u32 %v6477_v12, %v6570_v46 }
 0x29b   : > { %v2415_v50 = vadd.s32 %v2414_v55, %v2404_v26  ;;  %v2496_v4 = vshll.u32 %v7284_v19, %v5795_v59  ;;  %v2497_v47 = vshrl.u32 %v7285_v8, %v5943_v7  ;;  %v2499_v14 = vshll.u32 %v7285_v8, %v5795_v59 }
 0x29c   : > { %v2487_v20 = vor.u32 8388608, %v2486_v15  ;;  %v2286_v52 = vor.u32 4788187, %v2285_v38  ;;  %v2289_v61 = vcvt.s32.f32 %v2282_v62  ;;  %v2500_v56 = vshrl.u32 %v7286_v2, %v5943_v7 }
 0x29d   : > { %v2416_v11 = vadd.s32 %v2415_v50, %v2406_v1  ;;  %vm2419_vm7 = vc.u32 %v6595_v10, %v6597_v58  ;;  %v2498_v12 = vor.u32 %v2497_v47, %v2496_v4  ;;  %v2502_v46 = vshll.u32 %v7286_v2, %v5795_v59 }
 0x29e   : > { %v2503_v21 = vshrl.u32 %v7250_v0, %v5943_v7  ;;  %v2287_v23 = vand.u32 2147483647, %v2286_v52  ;;  %v2501_v42 = vor.u32 %v2500_v56, %v2499_v14  ;;  %vm2511_vm2 = vcmp.lt.s32.totalorder %v5792_v9, 1 }
 0x29f   : > { %v2420_v17 = vadd.s32 1, %v2416_v11  ;;  %v2296_v26 = vsel %vm6579_vm5, 0, %v2294_v16  ;;  %vm2513_vm15 = vcmp.lt.s32.totalorder %v5792_v9, 3  ;;  %v6622_v5 = vshll.u32 %v2487_v20, 8 }
 0x2a0   : > { %v2504_v60 = vor.u32 %v2503_v21, %v2502_v46  ;;  %v2290_v32 = vmul.f32 %v2289_v61, %v2287_v23  ;;  %vm2512_vm12 = vcmp.lt.s32.totalorder %v5792_v9, 2  ;;  %v2525_v59 = vsel %vm2513_vm15, %v6196_v13, %v6492_v22 }
 0x2a1   : > { %v2421_v51 = vsel %vm2419_vm7, %v2420_v17, %v2416_v11  ;;  %v2661_v36 = vshrl.u32 %v7303_v29, %v6514_v53  ;;  %v6633_v16 = vshrl.u32 %v7305_v30, %v6514_v53  ;;  %v2313_v44 = vadd.s32 3, %v2296_v26 }
 0x2a2   : > { %v2422_v1 = vadd.s32 %v2421_v51, %v2417_v54  ;;  %v2523_v39 = vsel %vm2511_vm2, %v2501_v42, %v2504_v60  ;;  %v2291_v18 = vxor.u32 2147483648, %v2290_v32  ;;  %v2519_v24 = vsel %vm2511_vm2, %v2498_v12, %v2501_v42 }
 0x2a3   : > { %v2521_v13 = vsel %vm2513_vm15, %v2504_v60, %v6371_v48  ;;  %v2495_v29 = vshrl.u32 %v7284_v19, %v5943_v7  ;;  %v2526_v30 = vsel %vm2512_vm12, %v2523_v39, %v2525_v59  ;;  %v2528_v3 = vand.u32 65535, %v6622_v5 }
 0x2a4   : > { %v2423_v22 = vadd.s32 536870912, %v2422_v1  ;;  %v2292_v35 = vsel %vm2171_vm0, %v2291_v18, %v2290_v32  ;;  %v6650_v6 = vshrl.u32 %v6622_v5, 16  ;;  %v2530_v45 = vand.u32 65535, %v2526_v30 }
 0x2a5   : > { %v2531_v34 = vshrl.u32 %v2526_v30, 16  ;;  %v6653_v55 = vor.u32 %v2661_v36, %v6524_v57  ;;  %v2295_v7 = vsel %vm6579_vm5, %v7362_v28, %v2292_v35  ;;  %v2522_v25 = vsel %vm2512_vm12, %v2519_v24, %v2521_v13 }
 0x2a6   : > { %v2424_v48 = vshrl.u32 %v2423_v22, 30  ;;  %v2297_v15 = vmul.f32 %v2295_v7, %v2295_v7  ;;  %v2532_v62 = vmul.u32 %v2530_v45, %v2528_v3  ;;  %v6663_v50 = vmul.u32 %v2530_v45, %v6650_v6 }
 0x2a7   : > { %v6660_v38 = vmul.u32 %v2531_v34, %v2528_v3  ;;  %v2665_v54 = vor.u32 %v6633_v16, %v6528_v49  ;;  %v6667_v57 = vand.u32 3, %v2313_v44  ;;  %vm2326_vm0 = vcmp.lt.s32.totalorder %v7372_v27, 0 }
 0x2a8   : > { %v2425_v37 = vshll.u32 %v2424_v48, 30  ;;  %v2298_v20 = vmul.f32 -0.001358992, %v2297_v15  ;;  %v2305_v4 = vmul.f32 -0.00019511016, %v2297_v15  ;;  %v2515_v47 = vsel %vm2511_vm2, %v2495_v29, %v2498_v12 }
 0x2a9   : > { %v2536_v14 = vshll.u32 %v6660_v38, 16  ;;  %v2516_v61 = vsel %vm2514_vm8, %v2504_v60, 2102212464  ;;  %v2535_v11 = vmul.u32 %v2531_v34, %v6650_v6  ;;  %v2553_v56 = vshrl.u32 %v2522_v25, 16 }
 0x2aa   : > { %v6673_v52 = vsub.s32 %v2422_v1, %v2425_v37  ;;  %v2299_v46 = vadd.f32 0.041655596, %v2298_v20  ;;  %v2306_v21 = vadd.f32 0.008332121, %v2305_v4  ;;  %v2538_v23 = vshll.u32 %v6663_v50, 16 }
 0x2ab   : > { %vm2540_vm9 = vc.u32 %v2532_v62, %v2536_v14  ;;  %v2552_v26 = vand.u32 65535, %v2522_v25  ;;  %v2517_v60 = vsel %vm2513_vm15, %v2501_v42, %v2516_v61  ;;  %v2542_v59 = vadd.s32 %v2536_v14, %v2532_v62 }
 0x2ac   : > { %vm2427_vm10 = vcmp.lt.s32.totalorder %v6673_v52, 0  ;;  %v2428_v17 = vsub.s32 0, %v6673_v52  ;;  %v2541_v12 = vsel %vm2540_vm9, 1, %v7283_v40  ;;  %v2300_v32 = vmul.f32 %v2299_v46, %v2297_v15 }
 0x2ad   : > { %v2307_v51 = vmul.f32 %v2306_v21, %v2297_v15  ;;  %v2448_v1 = vsub.s32 4, %v2424_v48  ;;  %v2543_v39 = vadd.s32 %v2541_v12, %v2535_v11  ;;  %v2555_v18 = vmul.u32 %v2553_v56, %v2528_v3 }
 0x2ae   : > { %v2429_v36 = vsel %vm2427_vm10, %v2428_v17, %v6673_v52  ;;  %v2301_v44 = vadd.f32 -0.4999988, %v2300_v32  ;;  %vm2544_vm8 = vc.u32 %v2542_v59, %v2538_v23  ;;  %vm2316_vm14 = vcmp.eq.s32.totalorder %v6667_v57, 0 }
 0x2af   : > { %v2308_v24 = vadd.f32 -0.16666654, %v2307_v51  ;;  %v2430_v13 = vclz %v2429_v36  ;;  %vm2319_vm1 = vcmp.eq.s32.totalorder %v6667_v57, 2  ;;  %v2418_v22 = vadd.s32 %v6597_v58, %v6595_v10 }
 0x2b0   : > { %v2545_v29 = vsel %vm2544_vm8, 1, %v7283_v40  ;;  %v2556_v42 = vmul.u32 %v2552_v26, %v6650_v6  ;;  %v2302_v30 = vmul.f32 %v2301_v44, %v2297_v15  ;;  %vm2315_vm13 = vcmp.lt.s32.totalorder %v6667_v57, 2 }
 0x2b1   : > { %v2309_v35 = vmul.f32 %v2308_v24, %v2297_v15  ;;  %v4009_v45 = vadd.s32 4294967294, %v2430_v13  ;;  %v6694_v34 = vsel %vm2512_vm12, %v2515_v47, %v2517_v60  ;;  %vm2312_vm4 = vweird.f32 %v7362_v28  ;;  %v7379_v24 = vld [vmem:[#allocation32_spill] sm:$0xff] }
 0x2b2   : > { %v2537_v25 = vshrl.u32 %v6660_v38, 16  ;;  %v2547_v62 = vadd.s32 %v2545_v29, %v2543_v39  ;;  %v2554_v37 = vmul.u32 %v2552_v26, %v2528_v3  ;;  %v2558_v10 = vshll.u32 %v2555_v18, 16 }
 0x2b3   : > { %v2303_v58 = vadd.f32 1.0, %v2302_v30  ;;  %v2310_v20 = vadd.f32 1.0, %v2309_v35  ;;  %vm4010_vm5 = vcmp.lt.s32.totalorder %v4009_v45, 0  ;;  %v6700_v15 = vsel %vm2326_vm0, %v2448_v1, %v2424_v48 }
 0x2b4   : > { %v2433_v4 = vsel %vm4010_vm5, 0, %v4009_v45  ;;  %v2539_v14 = vshrl.u32 %v6663_v50, 16  ;;  %v2557_v9 = vmul.u32 %v2553_v56, %v6650_v6  ;;  %v2560_v47 = vshll.u32 %v2556_v42, 16 }
 0x2b5   : > { %v2311_v61 = vmul.f32 %v2310_v20, %v2295_v7  ;;  %v2320_v11 = vxor.u32 2147483648, %v2303_v58  ;;  %v2434_v46 = vsub.s32 32, %v2433_v4  ;;  %v2435_v38 = vshll.u32 %v6673_v52, %v2433_v4 }
 0x2b6   : > { %vm2669_vm3 = vcmp.lt.s32.totalorder %v6506_v43, 4  ;;  %v2438_v3 = vsub.s32 4294967266, %v2433_v4  ;;  %v2548_v21 = vadd.s32 %v2547_v62, %v2537_v25  ;;  %vm2562_vm6 = vc.u32 %v2554_v37, %v2558_v10 }
 0x2b7   : > { %v2564_v23 = vadd.s32 %v2558_v10, %v2554_v37  ;;  %v2317_v17 = vxor.u32 2147483648, %v2311_v61  ;;  %v2436_v48 = vshrl.u32 %v2418_v22, %v2434_v46  ;;  %v2559_v12 = vshrl.u32 %v2555_v18, 16 }
 0x2b8   : > { %v2563_v26 = vsel %vm2562_vm6, 1, %v7283_v40  ;;  %vm6709_vm7 = vcmp.le.f32.partialorder %v2324_v31, 0.7853982  ;;  %v2439_v7 = vadd.s32 127, %v2438_v3  ;;  %v2561_v50 = vshrl.u32 %v2556_v42, 16 }
 0x2b9   : > { %v2565_v52 = vadd.s32 %v2563_v26, %v2557_v9  ;;  %vm2566_vm2 = vc.u32 %v2564_v23, %v2560_v47  ;;  %v2318_v56 = vsel %vm2316_vm14, %v2303_v58, %v2317_v17  ;;  %v2321_v32 = vsel %vm2319_vm1, %v2320_v11, %v2311_v61 }
 0x2ba   : > { %v2437_v51 = vor.u32 %v2436_v48, %v2435_v38  ;;  %v2567_v60 = vsel %vm2566_vm2, 1, %v7283_v40  ;;  %v2322_v59 = vsel %vm2315_vm13, %v2318_v56, %v2321_v32  ;;  %v2440_v31 = vshll.u32 %v2439_v7, 23 }
 0x2bb   : > { %v6720_v36 = vadd.s32 %v2548_v21, %v2539_v14  ;;  %v2569_v1 = vadd.s32 %v2567_v60, %v2565_v52  ;;  %v2323_v39 = vsel %vm2312_vm4, nan, %v2322_v59  ;;  %v6724_v18 = vadd.s32 %v2564_v23, %v2560_v47 }
 0x2bc   : > { %v2572_v44 = vmul.u32 %v6622_v5, %v6694_v34  ;;  %v2634_v13 = vand.u32 2147483647, %v7379_v24  ;;  %4029 = vmatmul.msk.f32.gmra.mxu1 %vm2799_vm11, %v2323_v39  ;;  %v2441_v22 = vor.u32 4788187, %v2440_v31  ;;  %v2444_v29 = vcvt.s32.f32 %v2437_v51 }
 0x2bd   : > { %v2570_v57 = vadd.s32 %v2569_v1, %v2559_v12  ;;  %v2651_v42 = vshll.u32 %v7284_v19, %v6480_v33  ;;  %v2652_v28 = vshrl.u32 %v7285_v8, %v6514_v53  ;;  %v2654_v35 = vshll.u32 %v7285_v8, %v6480_v33 }
 0x2be   : > { %v2641_v30 = vand.u32 8388607, %v2634_v13  ;;  %v2655_v5 = vshrl.u32 %v7286_v2, %v6514_v53  ;;  %v2442_v45 = vand.u32 2147483647, %v2441_v22  ;;  %v2657_v25 = vshll.u32 %v7286_v2, %v6480_v33 }
 0x2bf   : > { %v2571_v34 = vadd.s32 %v2570_v57, %v2561_v50  ;;  %v2658_v62 = vshrl.u32 %v7250_v0, %v6514_v53  ;;  %vm2574_vm15 = vc.u32 %v6720_v36, %v6724_v18  ;;  %v6746_v10 = vor.u32 %v2652_v28, %v2651_v42 }
 0x2c0   : > { %v2642_v37 = vor.u32 8388608, %v2641_v30  ;;  %v6748_v58 = vor.u32 %v2655_v5, %v2654_v35  ;;  %v2445_v8 = vmul.f32 %v2444_v29, %v2442_v45  ;;  %vm2666_vm12 = vcmp.lt.s32.totalorder %v6506_v43, 1 }
 0x2c1   : > { %v2575_v20 = vadd.s32 1, %v2571_v34  ;;  %v6750_v4 = vor.u32 %v2658_v62, %v2657_v25  ;;  %v2675_v2 = vsel %vm2669_vm3, %v6653_v55, 920167782  ;;  %v2679_v0 = vsel %vm2669_vm3, %v2665_v54, 1326507024 }
 0x2c2   : > { %vm2668_vm9 = vcmp.lt.s32.totalorder %v6506_v43, 3  ;;  %v6762_v33 = vshll.u32 %v2642_v37, 8  ;;  %v2446_v14 = vxor.u32 2147483648, %v2445_v8  ;;  %vm2667_vm10 = vcmp.lt.s32.totalorder %v6506_v43, 2 }
 0x2c3   : > { %v2576_v9 = vsel %vm2574_vm15, %v2575_v20, %v2571_v34  ;;  %v2451_v47 = vsel %vm6709_vm7, 0, %v6700_v15  ;;  %v2678_v49 = vsel %vm2666_vm12, %v6748_v58, %v6750_v4  ;;  %v2674_v54 = vsel %vm2666_vm12, %v6746_v10, %v6748_v58 }
 0x2c4   : > { %v2577_v61 = vadd.s32 %v2576_v9, %v2572_v44  ;;  %v2447_v16 = vsel %vm2326_vm0, %v2446_v14, %v2445_v8  ;;  %v2676_v11 = vsel %vm2668_vm9, %v6750_v4, %v2675_v2  ;;  %v2680_v15 = vsel %vm2668_vm9, %v6653_v55, %v2679_v0 }
 0x2c5   : > { %v2450_v46 = vsel %vm6709_vm7, %v7372_v27, %v2447_v16  ;;  %v2681_v3 = vsel %vm2667_vm10, %v2678_v49, %v2680_v15  ;;  %v2683_v21 = vand.u32 65535, %v6762_v33  ;;  %v2684_v17 = vshrl.u32 %v6762_v33, 16 }
 0x2c6   : > { %v2578_v38 = vadd.s32 536870912, %v2577_v61  ;;  %v2452_v23 = vmul.f32 %v2450_v46, %v2450_v46  ;;  %v2685_v48 = vand.u32 65535, %v2681_v3  ;;  %v2686_v12 = vshrl.u32 %v2681_v3, 16 }
 0x2c7   : > { %v2468_v26 = vadd.s32 3, %v2451_v47  ;;  %v2677_v55 = vsel %vm2667_vm10, %v2674_v54, %v2676_v11  ;;  %vm2467_vm13 = vweird.f32 %v7372_v27  ;;  %v2573_v49 = vadd.s32 %v6724_v18, %v6720_v36 }
 0x2c8   : > { %v6791_v7 = vshrl.u32 %v2578_v38, 30  ;;  %v2453_v50 = vmul.f32 -0.001358992, %v2452_v23  ;;  %v2460_v6 = vmul.f32 -0.00019511016, %v2452_v23  ;;  %v2687_v52 = vmul.u32 %v2685_v48, %v2683_v21 }
 0x2c9   : > { %v6795_v56 = vmul.u32 %v2686_v12, %v2683_v21  ;;  %v6798_v51 = vmul.u32 %v2685_v48, %v2684_v17  ;;  %v2469_v1 = vand.u32 3, %v2468_v26  ;;  %v2708_v44 = vshrl.u32 %v2677_v55, 16 }
 0x2ca   : > { %v2580_v32 = vshll.u32 %v6791_v7, 30  ;;  %v2454_v60 = vadd.f32 0.041655596, %v2453_v50  ;;  %v2461_v59 = vadd.f32 0.008332121, %v2460_v6  ;;  %v2690_v30 = vmul.u32 %v2686_v12, %v2684_v17 }
 0x2cb   : > { %v2691_v31 = vshll.u32 %v6795_v56, 16  ;;  %v2693_v57 = vshll.u32 %v6798_v51, 16  ;;  %v2707_v28 = vand.u32 65535, %v2677_v55  ;;  %v2710_v62 = vmul.u32 %v2708_v44, %v2683_v21 }
 0x2cc   : > { %v2581_v39 = vsub.s32 %v2577_v61, %v2580_v32  ;;  %v2455_v22 = vmul.f32 %v2454_v60, %v2452_v23  ;;  %v2462_v29 = vmul.f32 %v2461_v59, %v2452_v23  ;;  %vm2470_vm14 = vcmp.lt.s32.totalorder %v2469_v1, 2 }
 0x2cd   : > { %vm2695_vm0 = vc.u32 %v2687_v52, %v2691_v31  ;;  %v2697_v34 = vadd.s32 %v2691_v31, %v2687_v52  ;;  %vm2471_vm4 = vcmp.eq.s32.totalorder %v2469_v1, 0  ;;  %vm2474_vm5 = vcmp.eq.s32.totalorder %v2469_v1, 2 }
 0x2ce   : > { %vm2582_vm8 = vcmp.lt.s32.totalorder %v2581_v39, 0  ;;  %v2583_v42 = vsub.s32 0, %v2581_v39  ;;  %v2456_v35 = vadd.f32 -0.4999988, %v2455_v22  ;;  %v2463_v5 = vadd.f32 -0.16666654, %v2462_v29 }
 0x2cf   : > { %v2696_v45 = vsel %vm2695_vm0, 1, %v7283_v40  ;;  %vm2699_vm1 = vc.u32 %v2697_v34, %v2693_v57  ;;  %v2709_v0 = vmul.u32 %v2707_v28, %v2683_v21  ;;  %v2650_v16 = vshrl.u32 %v7284_v19, %v6514_v53 }
 0x2d0   : > { %v2584_v25 = vsel %vm2582_vm8, %v2583_v42, %v2581_v39  ;;  %v2457_v37 = vmul.f32 %v2456_v35, %v2452_v23  ;;  %v2464_v8 = vmul.f32 %v2463_v5, %v2452_v23  ;;  %v2698_v2 = vadd.s32 %v2696_v45, %v2690_v30 }
 0x2d1   : > { %v2585_v20 = vclz %v2584_v25  ;;  %v2700_v61 = vsel %vm2699_vm1, 1, %v7283_v40  ;;  %v2711_v54 = vmul.u32 %v2707_v28, %v2684_v17  ;;  %v2713_v11 = vshll.u32 %v2710_v62, 16 }
 0x2d2   : > { %v2458_v14 = vadd.f32 1.0, %v2457_v37  ;;  %v2465_v9 = vadd.f32 1.0, %v2464_v8  ;;  %v2692_v3 = vshrl.u32 %v6795_v56, 16  ;;  %v2702_v21 = vadd.s32 %v2700_v61, %v2698_v2 }
 0x2d3   : > { %v4012_v47 = vadd.s32 4294967294, %v2585_v20  ;;  %v2712_v48 = vmul.u32 %v2708_v44, %v2684_v17  ;;  %vm2717_vm7 = vc.u32 %v2709_v0, %v2713_v11  ;;  %v2715_v50 = vshll.u32 %v2711_v54, 16 }
 0x2d4   : > { %v2466_v15 = vmul.f32 %v2465_v9, %v2450_v46  ;;  %v2475_v38 = vxor.u32 2147483648, %v2458_v14  ;;  %v2671_v19 = vsel %vm2669_vm3, %v6750_v4, 2102212464  ;;  %v2694_v53 = vshrl.u32 %v6798_v51, 16 }
 0x2d5   : > { %vm4013_vm6 = vcmp.lt.s32.totalorder %v4012_v47, 0  ;;  %v2718_v52 = vsel %vm2717_vm7, 1, %v7283_v40  ;;  %v2719_v17 = vadd.s32 %v2713_v11, %v2709_v0  ;;  %v2703_v60 = vadd.s32 %v2702_v21, %v2692_v3 }
 0x2d6   : > { %v2588_v23 = vsel %vm4013_vm6, 0, %v4012_v47  ;;  %v2472_v12 = vxor.u32 2147483648, %v2466_v15  ;;  %v2476_v36 = vsel %vm2474_vm5, %v2475_v38, %v2466_v15  ;;  %v2720_v59 = vadd.s32 %v2718_v52, %v2712_v48 }
 0x2d7   : > { %v2589_v26 = vsub.s32 32, %v2588_v23  ;;  %v2590_v55 = vshll.u32 %v2581_v39, %v2588_v23  ;;  %v2593_v18 = vsub.s32 4294967266, %v2588_v23  ;;  %v2714_v44 = vshrl.u32 %v2710_v62, 16 }
 0x2d8   : > { %v2473_v46 = vsel %vm2471_vm4, %v2458_v14, %v2472_v12  ;;  %vm2721_vm2 = vc.u32 %v2719_v17, %v2715_v50  ;;  %v2670_v51 = vsel %vm2666_vm12, %v2650_v16, %v6746_v10  ;;  %v2672_v1 = vsel %vm2668_vm9, %v6748_v58, %v2671_v19 }
 0x2d9   : > { %v2591_v6 = vshrl.u32 %v2573_v49, %v2589_v26  ;;  %v2477_v56 = vsel %vm2470_vm14, %v2473_v46, %v2476_v36  ;;  %v2594_v32 = vadd.s32 127, %v2593_v18  ;;  %v2722_v22 = vsel %vm2721_vm2, 1, %v7283_v40 }
 0x2da   : > { %v2478_v31 = vsel %vm2467_vm13, nan, %v2477_v56  ;;  %v2716_v29 = vshrl.u32 %v2711_v54, 16  ;;  %v2724_v57 = vadd.s32 %v2722_v22, %v2720_v59  ;;  %v2704_v30 = vadd.s32 %v2703_v60, %v2694_v53 }
 0x2db   : > { %v2592_v39 = vor.u32 %v2591_v6, %v2590_v55  ;;  %4030 = vmatmul.msk.f32.gmra.mxu1 %vm2799_vm11, %v2478_v31  ;;  %v2595_v4 = vshll.u32 %v2594_v32, 23  ;;  %v2723_v28 = vadd.s32 %v2719_v17, %v2715_v50  ;;  %v2673_v35 = vsel %vm2667_vm10, %v2670_v51, %v2672_v1 }
 0x2dc   : > { %v2725_v5 = vadd.s32 %v2724_v57, %v2714_v44  ;;  %v2727_v10 = vmul.u32 %v6762_v33, %v2673_v35  ;;  %vm2481_vm15 = vcmp.lt.s32.totalorder %v7376_v41, 0  ;;  %vm6834_vm12 = vcmp.le.f32.partialorder %v2479_v63, 0.7853982  ;;  %v2915_v57 = vld [vmem:[%s7132_s1 + $0x68] sm:$0xff] }
 0x2dd   : > { %v2596_v27 = vor.u32 4788187, %v2595_v4  ;;  %v2599_v42 = vcvt.s32.f32 %v2592_v39  ;;  %vm2729_vm3 = vc.u32 %v2704_v30, %v2723_v28  ;;  %v2603_v43 = vsub.s32 4, %v6791_v7 }
 0x2de   : > { %v2726_v34 = vadd.s32 %v2725_v5, %v2716_v29  ;;  %v2728_v6 = vadd.s32 %v2723_v28, %v2704_v30  ;;  %vm2622_vm1 = vweird.f32 %v7376_v41  ;;  %v2916_v29 = vld [vmem:[%s7132_s1 + $0x70] sm:$0xff]  ;;  %v2914_v28 = vld [vmem:[%s7132_s1 + $0x60] sm:$0xff]  ;;  %vm2919_vm13 = vcmask 261120  }
 0x2df   : > { %v2597_v45 = vand.u32 2147483647, %v2596_v27  ;;  %v2604_v14 = vsel %vm2481_vm15, %v2603_v43, %v6791_v7  ;;  %v2865_v27 = vpop.f32.mrf.mxu1  ;;  %2980 = vmatpush.msra.mxu2 %v2916_v29  ;;  %4100 = vmatpush.msra.mxu3 %v2916_v29  ;;  %vm2636_vm4 = vcmp.lt.s32.totalorder %v7379_v24, 0  ;;  %vm6871_vm5 = vcmp.le.f32.partialorder %v2634_v13, 0.7853982 }
 0x2e0   : > { %v2730_v58 = vadd.s32 1, %v2726_v34  ;;  %v2606_v61 = vsel %vm6834_vm12, 0, %v2604_v14 }
 0x2e1   : > { %v2600_v25 = vmul.f32 %v2599_v42, %v2597_v45  ;;  %v2623_v3 = vadd.s32 3, %v2606_v61  ;;  %2981 = vmatpush.msra.mxu2 %v2915_v57  ;;  %4101 = vmatpush.msra.mxu3 %v2915_v57  ;;  %v2913_v45 = vld [vmem:[%s7132_s1 + $0x58] sm:$0xff] }
 0x2e2   : > { %v2731_v37 = vsel %vm2729_vm3, %v2730_v58, %v2726_v34  ;;  %vm2777_vm3 = vweird.f32 %v7379_v24 }
 0x2e3   : > { %v2601_v62 = vxor.u32 2147483648, %v2600_v25  ;;  %v2732_v20 = vadd.s32 %v2731_v37, %v2727_v10  ;;  %v2624_v18 = vand.u32 3, %v2623_v3  ;;  %2982 = vmatpush.msra.mxu2 %v2914_v28  ;;  %4102 = vmatpush.msra.mxu3 %v2914_v28 }
 0x2e5   : > { %v2602_v8 = vsel %vm2481_vm15, %v2601_v62, %v2600_v25  ;;  %v2733_v0 = vadd.s32 536870912, %v2732_v20  ;;  %vm2626_vm0 = vcmp.eq.s32.totalorder %v2624_v18, 0  ;;  %vm2629_vm8 = vcmp.eq.s32.totalorder %v2624_v18, 2  ;;  %2983 = vmatpush.msra.mxu2 %v2913_v45  ;;  %4103 = vmatpush.msra.mxu3 %v2913_v45 }
 0x2e6   : > { %v2605_v33 = vsel %vm6834_vm12, %v7376_v41, %v2602_v8  ;;  %vm2625_vm14 = vcmp.lt.s32.totalorder %v2624_v18, 2  ;;  %v6859_v41 = vld [vmem:[%s7132_s1 + $0x50] ss:$0 sm:$0xff] }
 0x2e7   : > { %v2607_v2 = vmul.f32 %v2605_v33, %v2605_v33  ;;  %v6843_v63 = vshrl.u32 %v2733_v0, 30  ;;  %v2866_v5 = vadd.f32 %v6859_v41, %v2865_v27  ;;  %v2868_v58 = vpop.f32.mrf.mxu1 }
 0x2e8   : > { %v2869_v8 = vadd.f32 %v6859_v41, %v2868_v58  ;;  %v4121_v58 = vld [vmem:[%s7132_s1 + $0x78] ss:$0 sm:$0xff] }
 0x2e9   : > { %v2608_v9 = vmul.f32 -0.001358992, %v2607_v2  ;;  %v2615_v47 = vmul.f32 -0.00019511016, %v2607_v2  ;;  %v2735_v54 = vshll.u32 %v6843_v63, 30  ;;  %4033 = vmatmul.msk.f32.vlgmr.msra.gmra.mxu2 %vm2919_vm13, %v2866_v5  ;;  %v2758_v62 = vsub.s32 4, %v6843_v63 }
 0x2ea   : > { %v3033_v5 = vld [vmem:[%s7132_s1 + $0x80] sm:$0xff] }
 0x2eb   : > { %v2609_v49 = vadd.f32 0.041655596, %v2608_v9  ;;  %v2616_v16 = vadd.f32 0.008332121, %v2615_v47  ;;  %v2736_v38 = vsub.s32 %v2732_v20, %v2735_v54 }
 0x2ed   : > { %v2610_v11 = vmul.f32 %v2609_v49, %v2607_v2  ;;  %v2617_v15 = vmul.f32 %v2616_v16, %v2607_v2  ;;  %vm2737_vm9 = vcmp.lt.s32.totalorder %v2736_v38, 0  ;;  %v2738_v48 = vsub.s32 0, %v2736_v38 }
 0x2ef   : > { %v2611_v23 = vadd.f32 -0.4999988, %v2610_v11  ;;  %v2618_v21 = vadd.f32 -0.16666654, %v2617_v15  ;;  %v2739_v26 = vsel %vm2737_vm9, %v2738_v48, %v2736_v38  ;;  %v2871_v14 = vpop.f32.mrf.mxu1 }
 0x2f0   : > { %v2740_v55 = vclz %v2739_v26  ;;  %v2872_v11 = vadd.f32 %v6859_v41, %v2871_v14 }
 0x2f1   : > { %v2612_v7 = vmul.f32 %v2611_v23, %v2607_v2  ;;  %v2619_v12 = vmul.f32 %v2618_v21, %v2607_v2  ;;  %4034 = vmatmul.msk.f32.gmra.mxu2 %vm2919_vm13, %v2869_v8 }
 0x2f2   : > { %v4015_v19 = vadd.s32 4294967294, %v2740_v55 }
 0x2f3   : > { %v2613_v50 = vadd.f32 1.0, %v2612_v7  ;;  %v2620_v36 = vadd.f32 1.0, %v2619_v12 }
 0x2f4   : > { %vm4016_vm10 = vcmp.lt.s32.totalorder %v4015_v19, 0 }
 0x2f5   : > { %v2621_v53 = vmul.f32 %v2620_v36, %v2605_v33  ;;  %v2630_v46 = vxor.u32 2147483648, %v2613_v50  ;;  %v2743_v17 = vsel %vm4016_vm10, 0, %v4015_v19  ;;  %v2759_v33 = vsel %vm2636_vm4, %v2758_v62, %v6843_v63 }
 0x2f6   : > { %v2744_v56 = vsub.s32 32, %v2743_v17  ;;  %v2745_v32 = vshll.u32 %v2736_v38, %v2743_v17  ;;  %v2748_v60 = vsub.s32 4294967266, %v2743_v17  ;;  %v2761_v9 = vsel %vm6871_vm5, 0, %v2759_v33 }
 0x2f7   : > { %v2627_v52 = vxor.u32 2147483648, %v2621_v53  ;;  %v2631_v31 = vsel %vm2629_vm8, %v2630_v46, %v2621_v53  ;;  %v2778_v54 = vadd.s32 3, %v2761_v9  ;;  %v2874_v21 = vpop.f32.mrf.mxu1 }
 0x2f8   : > { %v2746_v44 = vshrl.u32 %v2728_v6, %v2744_v56  ;;  %v2749_v4 = vadd.s32 127, %v2748_v60  ;;  %v2875_v26 = vadd.f32 %v6859_v41, %v2874_v21  ;;  %v3036_v6 = vld [vmem:[%s7132_s1 + $0x98] sm:$0xff] }
 0x2f9   : > { %v2628_v59 = vsel %vm2626_vm0, %v2613_v50, %v2627_v52  ;;  %v2779_v63 = vand.u32 3, %v2778_v54  ;;  %4035 = vmatmul.msk.f32.gmra.mxu2 %vm2919_vm13, %v2872_v11  ;;  %3099 = vmatpush.msrb.mxu3 %v3036_v6 }
 0x2fa   : > { %v2632_v39 = vsel %vm2625_vm14, %v2628_v59, %v2631_v31  ;;  %v2747_v1 = vor.u32 %v2746_v44, %v2745_v32  ;;  %v2750_v22 = vshll.u32 %v2749_v4, 23  ;;  %v3035_v32 = vld [vmem:[%s7132_s1 + $0x90] sm:$0xff]  ;;  %v3034_v4 = vld [vmem:[%s7132_s1 + $0x88] sm:$0xff] }
 0x2fb   : > { %v2633_v51 = vsel %vm2622_vm1, nan, %v2632_v39  ;;  %vm2781_vm6 = vcmp.eq.s32.totalorder %v2779_v63, 0  ;;  %vm2784_vm7 = vcmp.eq.s32.totalorder %v2779_v63, 2  ;;  %vm2780_vm2 = vcmp.lt.s32.totalorder %v2779_v63, 2  ;;  %3100 = vmatpush.msrb.mxu3 %v3035_v32 }
 0x2fc   : > { %4031 = vmatmul.msk.f32.gmra.mxu1 %vm2799_vm11, %v2633_v51  ;;  %v2751_v42 = vor.u32 4788187, %v2750_v22  ;;  %v2754_v30 = vcvt.s32.f32 %v2747_v1 }
 0x2fd   : > { %3101 = vmatpush.msrb.mxu3 %v3034_v4 }
 0x2fe   : > { %v2752_v35 = vand.u32 2147483647, %v2751_v42 }
 0x2ff   : > { %v2877_v19 = vpop.f32.mrf.mxu1  ;;  %3102 = vmatpush.msrb.mxu3 %v3033_v5 }
 0x300   : > { %v2755_v34 = vmul.f32 %v2754_v30, %v2752_v35  ;;  %v2878_v53 = vadd.f32 %v6859_v41, %v2877_v19  ;;  %v3392_v19 = vld [vmem:[%s7132_s1 + $0xa8] sm:$0xff] }
 0x301   : > { %4036 = vmatmul.msk.f32.gmra.mxu2 %vm2919_vm13, %v2875_v26 }
 0x302   : > { %v2756_v10 = vxor.u32 2147483648, %v2755_v34 }
 0x304   : > { %v2757_v40 = vsel %vm2636_vm4, %v2756_v10, %v2755_v34 }
 0x305   : > { %v2760_v43 = vsel %vm6871_vm5, %v7379_v24, %v2757_v40 }
 0x306   : > { %v2762_v37 = vmul.f32 %v2760_v43, %v2760_v43 }
 0x307   : > { %v2880_v46 = vpop.f32.mrf.mxu1 }
 0x308   : > { %v2763_v13 = vmul.f32 -0.001358992, %v2762_v37  ;;  %v2770_v20 = vmul.f32 -0.00019511016, %v2762_v37  ;;  %v2881_v52 = vadd.f32 %v6859_v41, %v2880_v46 }
 0x309   : > { %4037 = vmatmul.msk.f32.gmra.mxu2 %vm2919_vm13, %v2878_v53  ;;  %v6961_v53 = vld [vmem:[%s7132_s1 + $0xa0] ss:$0 sm:$0xff] }
 0x30a   : > { %v2764_v2 = vadd.f32 0.041655596, %v2763_v13  ;;  %v2771_v0 = vadd.f32 0.008332121, %v2770_v20 }
 0x30c   : > { %v2765_v47 = vmul.f32 %v2764_v2, %v2762_v37  ;;  %v2772_v61 = vmul.f32 %v2771_v0, %v2762_v37 }
 0x30e   : > { %v2766_v49 = vadd.f32 -0.4999988, %v2765_v47  ;;  %v2773_v16 = vadd.f32 -0.16666654, %v2772_v61 }
 0x30f   : > { %v2883_v24 = vpop.f32.mrf.mxu1 }
 0x310   : > { %v2767_v15 = vmul.f32 %v2766_v49, %v2762_v37  ;;  %v2774_v38 = vmul.f32 %v2773_v16, %v2762_v37  ;;  %v2884_v17 = vadd.f32 %v6859_v41, %v2883_v24  ;;  %v3395_v16 = vld [vmem:[%s7132_s1 + $0xc0] sm:$0xff] }
 0x311   : > { %4038 = vmatmul.msk.f32.gmra.mxu2 %vm2919_vm13, %v2881_v52  ;;  %3458 = vmatpush.msrb.mxu0 %v3395_v16 }
 0x312   : > { %v2768_v3 = vadd.f32 1.0, %v2767_v15  ;;  %v2775_v23 = vadd.f32 1.0, %v2774_v38  ;;  %v3394_v38 = vld [vmem:[%s7132_s1 + $0xb8] sm:$0xff] }
 0x313   : > { %3459 = vmatpush.msrb.mxu0 %v3394_v38 }
 0x314   : > { %v2776_v48 = vmul.f32 %v2775_v23, %v2760_v43  ;;  %v2785_v7 = vxor.u32 2147483648, %v2768_v3 }
 0x316   : > { %v2782_v12 = vxor.u32 2147483648, %v2776_v48  ;;  %v2786_v50 = vsel %vm2784_vm7, %v2785_v7, %v2776_v48  ;;  %v3393_v7 = vld [vmem:[%s7132_s1 + $0xb0] sm:$0xff] }
 0x317   : > { %v2886_v56 = vpop.f32.mrf.mxu1  ;;  %3460 = vmatpush.msrb.mxu0 %v3393_v7 }
 0x318   : > { %v2783_v55 = vsel %vm2781_vm6, %v2768_v3, %v2782_v12  ;;  %v2887_v60 = vadd.f32 %v6859_v41, %v2886_v56 }
 0x319   : > { %v2787_v36 = vsel %vm2780_vm2, %v2783_v55, %v2786_v50  ;;  %4039 = vmatmul.msk.f32.gmra.mxu2 %vm2919_vm13, %v2884_v17  ;;  %3461 = vmatpush.msrb.mxu0 %v3392_v19 }
 0x31a   : > { %v2788_v18 = vsel %vm2777_vm3, nan, %v2787_v36 }
 0x31b   : > { %4032 = vmatmul.msk.f32.gmra.mxu1 %vm2799_vm11, %v2788_v18 }
 0x31f   : > { %v2889_v59 = vpop.f32.mrf.mxu1 }
 0x320   : > { %v2890_v31 = vadd.f32 %v6859_v41, %v2889_v59 }
 0x321   : > { %4040 = vmatmul.msk.f32.gmra.mxu2 %vm2919_vm13, %v2887_v60 }
 0x322   : > { %4041 = vmatmul.msk.f32.vlgmr.msra.gmra.mxu3 %vm2919_vm13, %v2890_v31 }
 0x327   : > { %v2892_v39 = vpop.f32.mrf.mxu1 }
 0x328   : > { %v2893_v44 = vadd.f32 %v6859_v41, %v2892_v39 }
 0x32a   : > { %4042 = vmatmul.msk.f32.gmra.mxu3 %vm2919_vm13, %v2893_v44 }
 0x32f   : > { %v2895_v51 = vpop.f32.mrf.mxu1 }
 0x330   : > { %v2896_v1 = vadd.f32 %v6859_v41, %v2895_v51 }
 0x332   : > { %4043 = vmatmul.msk.f32.gmra.mxu3 %vm2919_vm13, %v2896_v1 }
 0x337   : > { %v2898_v22 = vpop.f32.mrf.mxu1 }
 0x338   : > { %v2899_v29 = vadd.f32 %v6859_v41, %v2898_v22 }
 0x33a   : > { %4044 = vmatmul.msk.f32.gmra.mxu3 %vm2919_vm13, %v2899_v29 }
 0x33f   : > { %v2901_v57 = vpop.f32.mrf.mxu1 }
 0x340   : > { %v2902_v27 = vadd.f32 %v6859_v41, %v2901_v57 }
 0x342   : > { %4045 = vmatmul.msk.f32.gmra.mxu3 %vm2919_vm13, %v2902_v27 }
 0x358   : > { %v2904_v42 = vpop.f32.mrf.mxu1 }
 0x359   : > { %v2905_v30 = vadd.f32 %v6859_v41, %v2904_v42 }
 0x35b   : > { %4046 = vmatmul.msk.f32.gmra.mxu3 %vm2919_vm13, %v2905_v30 }
 0x36c   : > { %v2985_v45 = vpop.f32.mrf.mxu2 }
 0x36d   : > { %v2986_v40 = vadd.f32 %v4121_v58, %v2985_v45 }
 0x374   : > { %v2988_v25 = vpop.f32.mrf.mxu2 }
 0x375   : > { %v2989_v43 = vadd.f32 %v4121_v58, %v2988_v25 }
 0x379   : > { %v2907_v28 = vpop.f32.mrf.mxu1 }
 0x37a   : > { %v2908_v35 = vadd.f32 %v6859_v41, %v2907_v28 }
 0x37c   : > { %4047 = vmatmul.msk.f32.gmra.mxu3 %vm2919_vm13, %v2908_v35  ;;  %v2991_v62 = vpop.f32.mrf.mxu2 }
 0x37d   : > { %v2992_v8 = vadd.f32 %v4121_v58, %v2991_v62 }
 0x384   : > { %v2994_v37 = vpop.f32.mrf.mxu2 }
 0x385   : > { %v2995_v20 = vadd.f32 %v4121_v58, %v2994_v37 }
 0x38c   : > { %v2997_v13 = vpop.f32.mrf.mxu2 }
 0x394   : > { %v3000_v33 = vpop.f32.mrf.mxu2 }
 0x395   : > { %v3001_v2 = vadd.f32 %v4121_v58, %v3000_v33 }
 0x398   : > { %v2910_v34 = vpop.f32.mrf.mxu1 }
 0x399   : > { %v2911_v10 = vadd.f32 %v6859_v41, %v2910_v34  ;;  %v2998_v41 = vadd.f32 %v4121_v58, %v2997_v13 }
 0x39b   : > { %4048 = vmatmul.msk.f32.gmra.mxu3 %vm2919_vm13, %v2911_v10 }
 0x39c   : > { %v3003_v0 = vpop.f32.mrf.mxu2 }
 0x39d   : > { %v3004_v14 = vadd.f32 %v4121_v58, %v3003_v0 }
 0x3a3   : > { %4049 = vmatmul.msk.f32.vlgmr.msrb.gmra.mxu3 %vm2919_vm13, %v2986_v40 }
 0x3a4   : > { %v3006_v47 = vpop.f32.mrf.mxu2 }
 0x3a5   : > { %v3009_v9 = vpop.f32.mrf.mxu3  ;;  %v3007_v61 = vadd.f32 %v4121_v58, %v3006_v47 }
 0x3a6   : > { %v3010_v54 = vadd.f32 %v4121_v58, %v3009_v9 }
 0x3ab   : > { %4050 = vmatmul.msk.f32.gmra.mxu3 %vm2919_vm13, %v2989_v43 }
 0x3ad   : > { %v3012_v49 = vpop.f32.mrf.mxu3 }
 0x3ae   : > { %v3013_v15 = vadd.f32 %v4121_v58, %v3012_v49 }
 0x3b3   : > { %4051 = vmatmul.msk.f32.gmra.mxu3 %vm2919_vm13, %v2992_v8 }
 0x3b5   : > { %v3015_v11 = vpop.f32.mrf.mxu3 }
 0x3b6   : > { %v3016_v23 = vadd.f32 %v4121_v58, %v3015_v11 }
 0x3bb   : > { %4052 = vmatmul.msk.f32.gmra.mxu3 %vm2919_vm13, %v2995_v20 }
 0x3bd   : > { %v3018_v3 = vpop.f32.mrf.mxu3 }
 0x3be   : > { %v3019_v63 = vadd.f32 %v4121_v58, %v3018_v3 }
 0x3c3   : > { %4053 = vmatmul.msk.f32.gmra.mxu3 %vm2919_vm13, %v2998_v41 }
 0x3c5   : > { %v3021_v21 = vpop.f32.mrf.mxu3 }
 0x3c6   : > { %v3022_v48 = vadd.f32 %v4121_v58, %v3021_v21 }
 0x3cb   : > { %4054 = vmatmul.msk.f32.gmra.mxu3 %vm2919_vm13, %v3001_v2 }
 0x3d3   : > { %4055 = vmatmul.msk.f32.gmra.mxu3 %vm2919_vm13, %v3004_v14 }
 0x3db   : > { %4056 = vmatmul.msk.f32.gmra.mxu3 %vm2919_vm13, %v3007_v61 }
 0x3de   : > { %v3024_v12 = vpop.f32.mrf.mxu3 }
 0x3df   : > { %v3025_v26 = vadd.f32 %v4121_v58, %v3024_v12 }
 0x3e3   : > { %4057 = vmatmul.msk.f32.gmra.mxu3 %vm2919_vm13, %v3010_v54 }
 0x3eb   : > { %4058 = vmatmul.msk.f32.gmra.mxu3 %vm2919_vm13, %v3013_v15 }
 0x3f3   : > { %4059 = vmatmul.msk.f32.gmra.mxu3 %vm2919_vm13, %v3016_v23 }
 0x3fb   : > { %4060 = vmatmul.msk.f32.gmra.mxu3 %vm2919_vm13, %v3019_v63 }
 0x3ff   : > { %v3027_v55 = vpop.f32.mrf.mxu3 }
 0x400   : > { %v3028_v50 = vadd.f32 %v4121_v58, %v3027_v55 }
 0x403   : > { %4061 = vmatmul.msk.f32.gmra.mxu3 %vm2919_vm13, %v3022_v48 }
 0x40b   : > { %4062 = vmatmul.msk.f32.gmra.mxu3 %vm2919_vm13, %v3025_v26 }
 0x413   : > { %4063 = vmatmul.msk.f32.gmra.mxu3 %vm2919_vm13, %v3028_v50 }
 0x41e   : > { %v3030_v36 = vpop.f32.mrf.mxu3 }
 0x41f   : > { %v3031_v18 = vadd.f32 %v4121_v58, %v3030_v36 }
 0x421   : > { %4064 = vmatmul.msk.f32.gmra.mxu3 %vm2919_vm13, %v3031_v18 }
 0x426   : > { %v3104_v46 = vpop.f32.mrf.mxu3 }
 0x427   : > { %v3105_v6 = vadd.f32 %v6961_v53, %v3104_v46 }
 0x429   : > { %v3168_v52 = vand.u32 2147483647, %v3105_v6  ;;  %v3152_v58 = vmax.f32 %v3105_v6, 0.0 }
 0x42b   : > { %v3184_v24 = vsub.f32 0.0, %v3168_v52 }
 0x42d   : > { %v3200_v17 = vmul.f32 1.442695, %v3184_v24 }
 0x42e   : > { %v3107_v56 = vpop.f32.mrf.mxu3 }
 0x42f   : > { %4125 = vpow2.f32 %v3200_v17  ;;  %v3108_v32 = vadd.f32 %v6961_v53, %v3107_v56 }
 0x431   : > { %v3169_v60 = vand.u32 2147483647, %v3108_v32  ;;  %v3153_v49 = vmax.f32 %v3108_v32, 0.0 }
 0x433   : > { %v3185_v59 = vsub.f32 0.0, %v3169_v60 }
 0x435   : > { %v4126_v31 = vpop.eup %4125  ;;  %v3202_v39 = vmul.f32 1.442695, %v3185_v59 }
 0x436   : > { %v3232_v44 = vadd.f32 1.0, %v4126_v31  ;;  %v3110_v4 = vpop.f32.mrf.mxu3  ;;  %v3235_v51 = vmul.f32 -0.5, %v4126_v31  ;;  %v3238_v27 = vand.u32 2147483647, %v4126_v31 }
 0x437   : > { %4127 = vpow2.f32 %v3202_v39  ;;  %v3111_v1 = vadd.f32 %v6961_v53, %v3110_v4 }
 0x438   : > { %4129 = vlog2.f32 %v3232_v44  ;;  %v3236_v29 = vadd.f32 1.0, %v3235_v51  ;;  %vm3239_vm11 = vcmp.lt.f32.partialorder %v3238_v27, 0.0004427343 }
 0x439   : > { %v3170_v22 = vand.u32 2147483647, %v3111_v1  ;;  %v3154_v36 = vmax.f32 %v3111_v1, 0.0 }
 0x43a   : > { %v3237_v25 = vmul.f32 %v4126_v31, %v3236_v29 }
 0x43b   : > { %v3186_v57 = vsub.f32 0.0, %v3170_v22 }
 0x43d   : > { %v4128_v42 = vpop.eup %4127  ;;  %v3204_v30 = vmul.f32 1.442695, %v3186_v57 }
 0x43e   : > { %v4130_v28 = vpop.eup %4129  ;;  %v3113_v35 = vpop.f32.mrf.mxu3  ;;  %v3241_v5 = vadd.f32 1.0, %v4128_v42  ;;  %v3244_v45 = vmul.f32 -0.5, %v4128_v42  ;;  %v3247_v13 = vand.u32 2147483647, %v4128_v42 }
 0x43f   : > { %v3234_v34 = vmul.f32 0.6931472, %v4130_v28  ;;  %4131 = vpow2.f32 %v3204_v30  ;;  %v6967_v10 = vadd.f32 %v6961_v53, %v3113_v35 }
 0x440   : > { %4133 = vlog2.f32 %v3241_v5  ;;  %v3245_v37 = vadd.f32 1.0, %v3244_v45  ;;  %vm3248_vm15 = vcmp.lt.f32.partialorder %v3247_v13, 0.0004427343 }
 0x441   : > { %v3240_v40 = vsel %vm3239_vm11, %v3237_v25, %v3234_v34  ;;  %v3171_v62 = vand.u32 2147483647, %v6967_v10  ;;  %v3155_v51 = vmax.f32 %v6967_v10, 0.0 }
 0x442   : > { %v3376_v43 = vadd.f32 %v3240_v40, %v3152_v58  ;;  %v3246_v0 = vmul.f32 %v4128_v42, %v3245_v37 }
 0x443   : > { %v3187_v8 = vsub.f32 0.0, %v3171_v62 }
 0x444   : > { %4065 = vmatmul.msk.f32.vlgmr.msrb.gmra.mxu0 %vm2919_vm13, %v3376_v43 }
 0x445   : > { %v4132_v20 = vpop.eup %4131  ;;  %v3206_v41 = vmul.f32 1.442695, %v3187_v8 }
 0x446   : > { %v4134_v33 = vpop.eup %4133  ;;  %v3116_v2 = vpop.f32.mrf.mxu3  ;;  %v3250_v14 = vadd.f32 1.0, %v4132_v20  ;;  %v3253_v61 = vmul.f32 -0.5, %v4132_v20  ;;  %v3256_v3 = vand.u32 2147483647, %v4132_v20 }
 0x447   : > { %4135 = vpow2.f32 %v3206_v41  ;;  %v6972_v9 = vadd.f32 %v6961_v53, %v3116_v2  ;;  %v3243_v47 = vmul.f32 0.6931472, %v4134_v33 }
 0x448   : > { %4137 = vlog2.f32 %v3250_v14  ;;  %v3254_v38 = vadd.f32 1.0, %v3253_v61  ;;  %vm3257_vm12 = vcmp.lt.f32.partialorder %v3256_v3, 0.0004427343 }
 0x449   : > { %v3172_v16 = vand.u32 2147483647, %v6972_v9  ;;  %v3249_v54 = vsel %vm3248_vm15, %v3246_v0, %v3243_v47  ;;  %v3156_v40 = vmax.f32 %v6972_v9, 0.0 }
 0x44a   : > { %v3377_v11 = vadd.f32 %v3249_v54, %v3153_v49  ;;  %v3255_v50 = vmul.f32 %v4132_v20, %v3254_v38 }
 0x44b   : > { %v3188_v15 = vsub.f32 0.0, %v3172_v16 }
 0x44c   : > { %4066 = vmatmul.msk.f32.gmra.mxu0 %vm2919_vm13, %v3377_v11 }
 0x44d   : > { %v4136_v23 = vpop.eup %4135  ;;  %v3208_v63 = vmul.f32 1.442695, %v3188_v15 }
 0x44e   : > { %v4138_v21 = vpop.eup %4137  ;;  %v3119_v48 = vpop.f32.mrf.mxu3  ;;  %v3259_v7 = vadd.f32 1.0, %v4136_v23  ;;  %v3262_v12 = vmul.f32 -0.5, %v4136_v23  ;;  %v3265_v24 = vand.u32 2147483647, %v4136_v23 }
 0x44f   : > { %4139 = vpow2.f32 %v3208_v63  ;;  %v6977_v26 = vadd.f32 %v6961_v53, %v3119_v48  ;;  %v3252_v55 = vmul.f32 0.6931472, %v4138_v21 }
 0x450   : > { %4141 = vlog2.f32 %v3259_v7  ;;  %v3263_v6 = vadd.f32 1.0, %v3262_v12  ;;  %vm3266_vm9 = vcmp.lt.f32.partialorder %v3265_v24, 0.0004427343 }
 0x451   : > { %v3173_v18 = vand.u32 2147483647, %v6977_v26  ;;  %v3258_v19 = vsel %vm3257_vm12, %v3255_v50, %v3252_v55  ;;  %v3157_v16 = vmax.f32 %v6977_v26, 0.0 }
 0x452   : > { %v3378_v46 = vadd.f32 %v3258_v19, %v3154_v36  ;;  %v3264_v59 = vmul.f32 %v4136_v23, %v3263_v6 }
 0x453   : > { %v3189_v52 = vsub.f32 0.0, %v3173_v18 }
 0x454   : > { %4067 = vmatmul.msk.f32.gmra.mxu0 %vm2919_vm13, %v3378_v46 }
 0x455   : > { %v4140_v17 = vpop.eup %4139  ;;  %v3210_v56 = vmul.f32 1.442695, %v3189_v52 }
 0x456   : > { %v4142_v32 = vpop.eup %4141  ;;  %v3122_v60 = vpop.f32.mrf.mxu3  ;;  %v3268_v31 = vadd.f32 1.0, %v4140_v17  ;;  %v3271_v4 = vmul.f32 -0.5, %v4140_v17  ;;  %v3274_v42 = vand.u32 2147483647, %v4140_v17 }
 0x457   : > { %4143 = vpow2.f32 %v3210_v56  ;;  %v6982_v39 = vadd.f32 %v6961_v53, %v3122_v60  ;;  %v3261_v44 = vmul.f32 0.6931472, %v4142_v32 }
 0x458   : > { %4145 = vlog2.f32 %v3268_v31  ;;  %v3272_v27 = vadd.f32 1.0, %v3271_v4  ;;  %vm3275_vm10 = vcmp.lt.f32.partialorder %v3274_v42, 0.0004427343 }
 0x459   : > { %v3174_v1 = vand.u32 2147483647, %v6982_v39  ;;  %v3267_v22 = vsel %vm3266_vm9, %v3264_v59, %v3261_v44  ;;  %v3158_v18 = vmax.f32 %v6982_v39, 0.0 }
 0x45a   : > { %v3379_v29 = vadd.f32 %v3267_v22, %v3155_v51  ;;  %v3273_v58 = vmul.f32 %v4140_v17, %v3272_v27 }
 0x45b   : > { %v3190_v57 = vsub.f32 0.0, %v3174_v1 }
 0x45c   : > { %4068 = vmatmul.msk.f32.gmra.mxu0 %vm2919_vm13, %v3379_v29 }
 0x45d   : > { %v4144_v30 = vpop.eup %4143  ;;  %v3212_v28 = vmul.f32 1.442695, %v3190_v57 }
 0x45e   : > { %v4146_v35 = vpop.eup %4145  ;;  %v3125_v5 = vpop.f32.mrf.mxu3  ;;  %v3277_v45 = vadd.f32 1.0, %v4144_v30  ;;  %v3280_v34 = vmul.f32 -0.5, %v4144_v30  ;;  %v3283_v20 = vand.u32 2147483647, %v4144_v30 }
 0x45f   : > { %4147 = vpow2.f32 %v3212_v28  ;;  %v6988_v25 = vadd.f32 %v6961_v53, %v3125_v5  ;;  %v3270_v10 = vmul.f32 0.6931472, %v4146_v35 }
 0x460   : > { %4149 = vlog2.f32 %v3277_v45  ;;  %v3281_v8 = vadd.f32 1.0, %v3280_v34  ;;  %vm3284_vm0 = vcmp.lt.f32.partialorder %v3283_v20, 0.0004427343 }
 0x461   : > { %v3175_v62 = vand.u32 2147483647, %v6988_v25  ;;  %v3276_v43 = vsel %vm3275_vm10, %v3273_v58, %v3270_v10  ;;  %v3159_v1 = vmax.f32 %v6988_v25, 0.0 }
 0x462   : > { %v3380_v37 = vadd.f32 %v3276_v43, %v3156_v40  ;;  %v3282_v14 = vmul.f32 %v4144_v30, %v3281_v8 }
 0x463   : > { %v3191_v13 = vsub.f32 0.0, %v3175_v62 }
 0x464   : > { %4069 = vmatmul.msk.f32.gmra.mxu0 %vm2919_vm13, %v3380_v37 }
 0x465   : > { %v4148_v41 = vpop.eup %4147  ;;  %v3214_v33 = vmul.f32 1.442695, %v3191_v13 }
 0x466   : > { %v4150_v2 = vpop.eup %4149  ;;  %v3128_v0 = vpop.f32.mrf.mxu3  ;;  %v3286_v47 = vadd.f32 1.0, %v4148_v41  ;;  %v3289_v49 = vmul.f32 -0.5, %v4148_v41  ;;  %v3292_v23 = vand.u32 2147483647, %v4148_v41 }
 0x467   : > { %4151 = vpow2.f32 %v3214_v33  ;;  %v6994_v9 = vadd.f32 %v6961_v53, %v3128_v0  ;;  %v3279_v61 = vmul.f32 0.6931472, %v4150_v2 }
 0x468   : > { %4153 = vlog2.f32 %v3286_v47  ;;  %v3290_v3 = vadd.f32 1.0, %v3289_v49  ;;  %vm3293_vm8 = vcmp.lt.f32.partialorder %v3292_v23, 0.0004427343 }
 0x469   : > { %v3176_v54 = vand.u32 2147483647, %v6994_v9  ;;  %v3285_v11 = vsel %vm3284_vm0, %v3282_v14, %v3279_v61  ;;  %v3160_v62 = vmax.f32 %v6994_v9, 0.0 }
 0x46a   : > { %v3381_v15 = vadd.f32 %v3285_v11, %v3157_v16  ;;  %v3291_v36 = vmul.f32 %v4148_v41, %v3290_v3 }
 0x46b   : > { %v3192_v38 = vsub.f32 0.0, %v3176_v54 }
 0x46c   : > { %4070 = vmatmul.msk.f32.gmra.mxu0 %vm2919_vm13, %v3381_v15 }
 0x46d   : > { %v4152_v63 = vpop.eup %4151  ;;  %v3216_v21 = vmul.f32 1.442695, %v3192_v38 }
 0x46e   : > { %v4154_v48 = vpop.eup %4153  ;;  %v3131_v7 = vpop.f32.mrf.mxu3  ;;  %v3295_v12 = vadd.f32 1.0, %v4152_v63  ;;  %v3298_v55 = vmul.f32 -0.5, %v4152_v63  ;;  %v3301_v17 = vand.u32 2147483647, %v4152_v63 }
 0x46f   : > { %4155 = vpow2.f32 %v3216_v21  ;;  %v7000_v26 = vadd.f32 %v6961_v53, %v3131_v7  ;;  %v3288_v50 = vmul.f32 0.6931472, %v4154_v48 }
 0x470   : > { %4157 = vlog2.f32 %v3295_v12  ;;  %v3299_v52 = vadd.f32 1.0, %v3298_v55  ;;  %vm3302_vm14 = vcmp.lt.f32.partialorder %v3301_v17, 0.0004427343 }
 0x471   : > { %v3177_v19 = vand.u32 2147483647, %v7000_v26  ;;  %v3294_v46 = vsel %vm3293_vm8, %v3291_v36, %v3288_v50  ;;  %v3161_v54 = vmax.f32 %v7000_v26, 0.0 }
 0x472   : > { %v3382_v6 = vadd.f32 %v3294_v46, %v3158_v18  ;;  %v3300_v31 = vmul.f32 %v4152_v63, %v3299_v52 }
 0x473   : > { %v3193_v24 = vsub.f32 0.0, %v3177_v19 }
 0x474   : > { %4071 = vmatmul.msk.f32.gmra.mxu0 %vm2919_vm13, %v3382_v6 }
 0x475   : > { %v4156_v56 = vpop.eup %4155  ;;  %v3218_v32 = vmul.f32 1.442695, %v3193_v24 }
 0x476   : > { %v4158_v60 = vpop.eup %4157  ;;  %v3134_v59 = vpop.f32.mrf.mxu3  ;;  %v3304_v44 = vadd.f32 1.0, %v4156_v56  ;;  %v3307_v51 = vmul.f32 -0.5, %v4156_v56  ;;  %v3310_v30 = vand.u32 2147483647, %v4156_v56 }
 0x477   : > { %4159 = vpow2.f32 %v3218_v32  ;;  %v7006_v39 = vadd.f32 %v6961_v53, %v3134_v59  ;;  %v3297_v4 = vmul.f32 0.6931472, %v4158_v60 }
 0x478   : > { %4161 = vlog2.f32 %v3304_v44  ;;  %v3308_v42 = vadd.f32 1.0, %v3307_v51  ;;  %vm3311_vm1 = vcmp.lt.f32.partialorder %v3310_v30, 0.0004427343  ;;  %v3754_v30 = vld [vmem:[%s7132_s1 + $0xe8] sm:$0xff] }
 0x479   : > { %v3178_v22 = vand.u32 2147483647, %v7006_v39  ;;  %v3303_v29 = vsel %vm3302_vm14, %v3300_v31, %v3297_v4  ;;  %v3162_v18 = vmax.f32 %v7006_v39, 0.0  ;;  %3817 = vmatpush.msrb.mxu2 %v3754_v30 }
 0x47a   : > { %v3383_v57 = vadd.f32 %v3303_v29, %v3159_v1  ;;  %v3309_v40 = vmul.f32 %v4156_v56, %v3308_v42 }
 0x47b   : > { %v3194_v27 = vsub.f32 0.0, %v3178_v22 }
 0x47c   : > { %4072 = vmatmul.msk.f32.gmra.mxu0 %vm2919_vm13, %v3383_v57 }
 0x47d   : > { %v4160_v28 = vpop.eup %4159  ;;  %v3220_v35 = vmul.f32 1.442695, %v3194_v27 }
 0x47e   : > { %v4162_v5 = vpop.eup %4161  ;;  %v3137_v45 = vpop.f32.mrf.mxu3  ;;  %v3313_v34 = vadd.f32 1.0, %v4160_v28  ;;  %v3316_v10 = vmul.f32 -0.5, %v4160_v28  ;;  %v3319_v41 = vand.u32 2147483647, %v4160_v28 }
 0x47f   : > { %4163 = vpow2.f32 %v3220_v35  ;;  %v7012_v25 = vadd.f32 %v6961_v53, %v3137_v45  ;;  %v3306_v58 = vmul.f32 0.6931472, %v4162_v5  ;;  %v3753_v45 = vld [vmem:[%s7132_s1 + $0xe0] sm:$0xff] }
 0x480   : > { %4165 = vlog2.f32 %v3313_v34  ;;  %v3317_v13 = vadd.f32 1.0, %v3316_v10  ;;  %vm3320_vm4 = vcmp.lt.f32.partialorder %v3319_v41, 0.0004427343  ;;  %3818 = vmatpush.msrb.mxu2 %v3753_v45 }
 0x481   : > { %v3179_v43 = vand.u32 2147483647, %v7012_v25  ;;  %v3312_v37 = vsel %vm3311_vm1, %v3309_v40, %v3306_v58  ;;  %v3163_v4 = vmax.f32 %v7012_v25, 0.0 }
 0x482   : > { %v3384_v8 = vadd.f32 %v3312_v37, %v3160_v62  ;;  %v3318_v47 = vmul.f32 %v4160_v28, %v3317_v13  ;;  %v3752_v37 = vld [vmem:[%s7132_s1 + $0xd8] sm:$0xff] }
 0x483   : > { %v3195_v20 = vsub.f32 0.0, %v3179_v43  ;;  %3819 = vmatpush.msrb.mxu2 %v3752_v37 }
 0x484   : > { %4073 = vmatmul.msk.f32.gmra.mxu0 %vm2919_vm13, %v3384_v8 }
 0x485   : > { %v4164_v33 = vpop.eup %4163  ;;  %v3222_v2 = vmul.f32 1.442695, %v3195_v20 }
 0x486   : > { %v4166_v0 = vpop.eup %4165  ;;  %v3140_v14 = vpop.f32.mrf.mxu3  ;;  %v3322_v61 = vadd.f32 1.0, %v4164_v33  ;;  %v3325_v16 = vmul.f32 -0.5, %v4164_v33  ;;  %v3328_v23 = vand.u32 2147483647, %v4164_v33 }
 0x487   : > { %4167 = vpow2.f32 %v3222_v2  ;;  %v7018_v9 = vadd.f32 %v6961_v53, %v3140_v14  ;;  %v3315_v49 = vmul.f32 0.6931472, %v4166_v0 }
 0x488   : > { %4169 = vlog2.f32 %v3322_v61  ;;  %v3326_v3 = vadd.f32 1.0, %v3325_v16  ;;  %vm3329_vm5 = vcmp.lt.f32.partialorder %v3328_v23, 0.0004427343 }
 0x489   : > { %v3321_v11 = vsel %vm3320_vm4, %v3318_v47, %v3315_v49  ;;  %v3180_v15 = vand.u32 2147483647, %v7018_v9  ;;  %v3164_v14 = vmax.f32 %v7018_v9, 0.0 }
 0x48a   : > { %v3385_v38 = vadd.f32 %v3321_v11, %v3161_v54  ;;  %v3327_v26 = vmul.f32 %v4164_v33, %v3326_v3 }
 0x48b   : > { %v3196_v48 = vsub.f32 0.0, %v3180_v15 }
 0x48c   : > { %4074 = vmatmul.msk.f32.gmra.mxu0 %vm2919_vm13, %v3385_v38 }
 0x48d   : > { %v4168_v63 = vpop.eup %4167  ;;  %v3224_v6 = vmul.f32 1.442695, %v3196_v48 }
 0x48e   : > { %v4170_v21 = vpop.eup %4169  ;;  %v3143_v7 = vpop.f32.mrf.mxu3  ;;  %v3331_v12 = vadd.f32 1.0, %v4168_v63  ;;  %v3334_v36 = vmul.f32 -0.5, %v4168_v63  ;;  %v3337_v56 = vand.u32 2147483647, %v4168_v63 }
 0x48f   : > { %v7024_v55 = vadd.f32 %v6961_v53, %v3143_v7  ;;  %v3324_v50 = vmul.f32 0.6931472, %v4170_v21 }
 0x490   : > { %4171 = vlog2.f32 %v3331_v12  ;;  %v3335_v17 = vadd.f32 1.0, %v3334_v36  ;;  %vm3338_vm6 = vcmp.lt.f32.partialorder %v3337_v56, 0.0004427343 }
 0x491   : > { %v3181_v19 = vand.u32 2147483647, %v7024_v55  ;;  %v3330_v46 = vsel %vm3329_vm5, %v3327_v26, %v3324_v50  ;;  %4173 = vpow2.f32 %v3224_v6  ;;  %v3165_v3 = vmax.f32 %v7024_v55, 0.0 }
 0x492   : > { %v3386_v52 = vadd.f32 %v3330_v46, %v3162_v18  ;;  %v3336_v39 = vmul.f32 %v4168_v63, %v3335_v17  ;;  %v7057_v17 = vld [vmem:[%s7132_s1 + $0xc8] ss:$0 sm:$0xff] }
 0x493   : > { %v3197_v24 = vsub.f32 0.0, %v3181_v19 }
 0x494   : > { %4075 = vmatmul.msk.f32.gmra.mxu0 %vm2919_vm13, %v3386_v52 }
 0x495   : > { %v3226_v32 = vmul.f32 1.442695, %v3197_v24  ;;  %v3751_v24 = vld [vmem:[%s7132_s1 + $0xd0] sm:$0xff] }
 0x496   : > { %v4172_v60 = vpop.eup %4171  ;;  %v3146_v59 = vpop.f32.mrf.mxu3  ;;  %3820 = vmatpush.msrb.mxu2 %v3751_v24 }
 0x497   : > { %4175 = vpow2.f32 %v3226_v32  ;;  %v7030_v31 = vadd.f32 %v6961_v53, %v3146_v59  ;;  %v3333_v44 = vmul.f32 0.6931472, %v4172_v60  ;;  %v4174_v57 = vpop.eup %4173 }
 0x498   : > { %v3340_v28 = vadd.f32 1.0, %v4174_v57  ;;  %v3343_v5 = vmul.f32 -0.5, %v4174_v57  ;;  %v3346_v62 = vand.u32 2147483647, %v4174_v57 }
 0x499   : > { %v3182_v51 = vand.u32 2147483647, %v7030_v31  ;;  %v3339_v1 = vsel %vm3338_vm6, %v3336_v39, %v3333_v44  ;;  %v3166_v36 = vmax.f32 %v7030_v31, 0.0 }
 0x49a   : > { %v3387_v22 = vadd.f32 %v3339_v1, %v3163_v4  ;;  %v3344_v58 = vadd.f32 1.0, %v3343_v5  ;;  %vm3347_vm7 = vcmp.lt.f32.partialorder %v3346_v62, 0.0004427343 }
 0x49b   : > { %v3198_v29 = vsub.f32 0.0, %v3182_v51 }
 0x49c   : > { %4076 = vmatmul.msk.f32.gmra.mxu0 %vm2919_vm13, %v3387_v22  ;;  %v3345_v2 = vmul.f32 %v4174_v57, %v3344_v58 }
 0x49d   : > { %v4176_v27 = vpop.eup %4175  ;;  %v3228_v42 = vmul.f32 1.442695, %v3198_v29 }
 0x49e   : > { %v3349_v35 = vadd.f32 1.0, %v4176_v27  ;;  %v3352_v40 = vmul.f32 -0.5, %v4176_v27 }
 0x49f   : > { %4177 = vpow2.f32 %v3228_v42 }
 0x4a0   : > { %4179 = vlog2.f32 %v3340_v28  ;;  %v3353_v0 = vadd.f32 1.0, %v3352_v40 }
 0x4a1   : > { %4181 = vlog2.f32 %v3349_v35 }
 0x4a2   : > { %v3354_v54 = vmul.f32 %v4176_v27, %v3353_v0 }
 0x4a4   : > { %v3149_v34 = vpop.f32.mrf.mxu3 }
 0x4a5   : > { %v4178_v10 = vpop.eup %4177  ;;  %v3150_v25 = vadd.f32 %v6961_v53, %v3149_v34  ;;  %v3355_v53 = vand.u32 2147483647, %v4176_v27 }
 0x4a6   : > { %v3358_v43 = vadd.f32 1.0, %v4178_v10  ;;  %v4180_v13 = vpop.eup %4179  ;;  %v3361_v11 = vmul.f32 -0.5, %v4178_v10  ;;  %v3364_v9 = vand.u32 2147483647, %v4178_v10 }
 0x4a7   : > { %v3183_v8 = vand.u32 2147483647, %v3150_v25  ;;  %v4182_v20 = vpop.eup %4181  ;;  %v3342_v33 = vmul.f32 0.6931472, %v4180_v13  ;;  %vm3356_vm2 = vcmp.lt.f32.partialorder %v3355_v53, 0.0004427343 }
 0x4a8   : > { %4183 = vlog2.f32 %v3358_v43  ;;  %v3351_v49 = vmul.f32 0.6931472, %v4182_v20  ;;  %v3362_v23 = vadd.f32 1.0, %v3361_v11  ;;  %vm3365_vm3 = vcmp.lt.f32.partialorder %v3364_v9, 0.0004427343 }
 0x4a9   : > { %v3199_v41 = vsub.f32 0.0, %v3183_v8  ;;  %v3348_v61 = vsel %vm3347_vm7, %v3345_v2, %v3342_v33  ;;  %v3167_v32 = vmax.f32 %v3150_v25, 0.0 }
 0x4aa   : > { %v3388_v16 = vadd.f32 %v3348_v61, %v3164_v14  ;;  %v3357_v15 = vsel %vm3356_vm2, %v3354_v54, %v3351_v49  ;;  %v3363_v50 = vmul.f32 %v4178_v10, %v3362_v23 }
 0x4ab   : > { %v3230_v47 = vmul.f32 1.442695, %v3199_v41  ;;  %v3389_v63 = vadd.f32 %v3357_v15, %v3165_v3 }
 0x4ac   : > { %4077 = vmatmul.msk.f32.gmra.mxu0 %vm2919_vm13, %v3388_v16 }
 0x4ad   : > { %4185 = vpow2.f32 %v3230_v47 }
 0x4ae   : > { %v4184_v38 = vpop.eup %4183 }
 0x4af   : > { %v3360_v48 = vmul.f32 0.6931472, %v4184_v38 }
 0x4b1   : > { %v3366_v26 = vsel %vm3365_vm3, %v3363_v50, %v3360_v48 }
 0x4b2   : > { %v3390_v46 = vadd.f32 %v3366_v26, %v3166_v36 }
 0x4b3   : > { %v4186_v21 = vpop.eup %4185 }
 0x4b4   : > { %v3367_v7 = vadd.f32 1.0, %v4186_v21  ;;  %v3370_v12 = vmul.f32 -0.5, %v4186_v21  ;;  %4078 = vmatmul.msk.f32.gmra.mxu0 %vm2919_vm13, %v3389_v63  ;;  %v3373_v19 = vand.u32 2147483647, %v4186_v21 }
 0x4b6   : > { %4187 = vlog2.f32 %v3367_v7  ;;  %v3371_v18 = vadd.f32 1.0, %v3370_v12  ;;  %vm3374_vm11 = vcmp.lt.f32.partialorder %v3373_v19, 0.0004427343 }
 0x4b8   : > { %v3372_v52 = vmul.f32 %v4186_v21, %v3371_v18 }
 0x4bc   : > { %v4188_v6 = vpop.eup %4187  ;;  %4079 = vmatmul.msk.f32.gmra.mxu0 %vm2919_vm13, %v3390_v46 }
 0x4bd   : > { %v3369_v55 = vmul.f32 0.6931472, %v4188_v6 }
 0x4bf   : > { %v3375_v56 = vsel %vm3374_vm11, %v3372_v52, %v3369_v55 }
 0x4c0   : > { %v3391_v59 = vadd.f32 %v3375_v56, %v3167_v32 }
 0x4c1   : > { %v3463_v60 = vpop.f32.mrf.mxu0 }
 0x4c2   : > { %v3464_v31 = vadd.f32 %v7057_v17, %v3463_v60 }
 0x4c4   : > { %v3527_v44 = vand.u32 2147483647, %v3464_v31  ;;  %4080 = vmatmul.msk.f32.gmra.mxu0 %vm2919_vm13, %v3391_v59  ;;  %v3511_v41 = vmax.f32 %v3464_v31, 0.0 }
 0x4c6   : > { %v3543_v39 = vsub.f32 0.0, %v3527_v44 }
 0x4c8   : > { %v3559_v4 = vmul.f32 1.442695, %v3543_v39 }
 0x4c9   : > { %v3466_v51 = vpop.f32.mrf.mxu0 }
 0x4ca   : > { %4189 = vpow2.f32 %v3559_v4  ;;  %v3467_v1 = vadd.f32 %v7057_v17, %v3466_v51 }
 0x4cc   : > { %v3528_v22 = vand.u32 2147483647, %v3467_v1  ;;  %v3512_v63 = vmax.f32 %v3467_v1, 0.0 }
 0x4ce   : > { %v3544_v29 = vsub.f32 0.0, %v3528_v22 }
 0x4d0   : > { %v4190_v57 = vpop.eup %4189  ;;  %v3561_v27 = vmul.f32 1.442695, %v3544_v29 }
 0x4d1   : > { %v3591_v42 = vadd.f32 1.0, %v4190_v57  ;;  %v3594_v30 = vmul.f32 -0.5, %v4190_v57  ;;  %v3469_v28 = vpop.f32.mrf.mxu0  ;;  %v3597_v10 = vand.u32 2147483647, %v4190_v57 }
 0x4d2   : > { %4191 = vpow2.f32 %v3561_v27  ;;  %v3470_v35 = vadd.f32 %v7057_v17, %v3469_v28 }
 0x4d3   : > { %4193 = vlog2.f32 %v3591_v42  ;;  %v3595_v45 = vadd.f32 1.0, %v3594_v30  ;;  %vm3598_vm15 = vcmp.lt.f32.partialorder %v3597_v10, 0.0004427343 }
 0x4d4   : > { %v3529_v5 = vand.u32 2147483647, %v3470_v35  ;;  %v3513_v56 = vmax.f32 %v3470_v35, 0.0 }
 0x4d5   : > { %v3596_v62 = vmul.f32 %v4190_v57, %v3595_v45 }
 0x4d6   : > { %v3545_v34 = vsub.f32 0.0, %v3529_v5 }
 0x4d8   : > { %v4192_v25 = vpop.eup %4191  ;;  %v3563_v58 = vmul.f32 1.442695, %v3545_v34 }
 0x4d9   : > { %v4194_v40 = vpop.eup %4193  ;;  %v3472_v43 = vpop.f32.mrf.mxu0  ;;  %v3600_v37 = vadd.f32 1.0, %v4192_v25  ;;  %v3603_v20 = vmul.f32 -0.5, %v4192_v25  ;;  %v3606_v47 = vand.u32 2147483647, %v4192_v25 }
 0x4da   : > { %v3593_v8 = vmul.f32 0.6931472, %v4194_v40  ;;  %4195 = vpow2.f32 %v3563_v58  ;;  %v7064_v13 = vadd.f32 %v7057_v17, %v3472_v43 }
 0x4db   : > { %4197 = vlog2.f32 %v3600_v37  ;;  %v3604_v53 = vadd.f32 1.0, %v3603_v20  ;;  %vm3607_vm12 = vcmp.lt.f32.partialorder %v3606_v47, 0.0004427343 }
 0x4dc   : > { %v3599_v33 = vsel %vm3598_vm15, %v3596_v62, %v3593_v8  ;;  %v3530_v2 = vand.u32 2147483647, %v7064_v13  ;;  %v3514_v28 = vmax.f32 %v7064_v13, 0.0 }
 0x4dd   : > { %v3735_v0 = vadd.f32 %v3599_v33, %v3511_v41  ;;  %v3605_v23 = vmul.f32 %v4192_v25, %v3604_v53 }
 0x4de   : > { %v3546_v14 = vsub.f32 0.0, %v3530_v2 }
 0x4df   : > { %4081 = vmatmul.msk.f32.vlgmr.msrb.gmra.mxu2 %vm2919_vm13, %v3735_v0 }
 0x4e0   : > { %v4196_v61 = vpop.eup %4195  ;;  %v3565_v49 = vmul.f32 1.442695, %v3546_v14 }
 0x4e1   : > { %v4198_v16 = vpop.eup %4197  ;;  %v3475_v54 = vpop.f32.mrf.mxu0  ;;  %v3609_v11 = vadd.f32 1.0, %v4196_v61  ;;  %v3612_v15 = vmul.f32 -0.5, %v4196_v61  ;;  %v3615_v50 = vand.u32 2147483647, %v4196_v61 }
 0x4e2   : > { %4199 = vpow2.f32 %v3565_v49  ;;  %v7069_v38 = vadd.f32 %v7057_v17, %v3475_v54  ;;  %v3602_v3 = vmul.f32 0.6931472, %v4198_v16 }
 0x4e3   : > { %4201 = vlog2.f32 %v3609_v11  ;;  %v3613_v7 = vadd.f32 1.0, %v3612_v15  ;;  %vm3616_vm9 = vcmp.lt.f32.partialorder %v3615_v50, 0.0004427343 }
 0x4e4   : > { %v3531_v9 = vand.u32 2147483647, %v7069_v38  ;;  %v3608_v21 = vsel %vm3607_vm12, %v3605_v23, %v3602_v3  ;;  %v3515_v33 = vmax.f32 %v7069_v38, 0.0 }
 0x4e5   : > { %v3736_v48 = vadd.f32 %v3608_v21, %v3512_v63  ;;  %v3614_v46 = vmul.f32 %v4196_v61, %v3613_v7 }
 0x4e6   : > { %v3547_v12 = vsub.f32 0.0, %v3531_v9 }
 0x4e7   : > { %4082 = vmatmul.msk.f32.gmra.mxu2 %vm2919_vm13, %v3736_v48 }
 0x4e8   : > { %v4200_v26 = vpop.eup %4199  ;;  %v3567_v36 = vmul.f32 1.442695, %v3547_v12 }
 0x4e9   : > { %v4202_v18 = vpop.eup %4201  ;;  %v3478_v19 = vpop.f32.mrf.mxu0  ;;  %v3618_v6 = vadd.f32 1.0, %v4200_v26  ;;  %v3621_v24 = vmul.f32 -0.5, %v4200_v26  ;;  %v3624_v39 = vand.u32 2147483647, %v4200_v26 }
 0x4ea   : > { %4203 = vpow2.f32 %v3567_v36  ;;  %v7074_v55 = vadd.f32 %v7057_v17, %v3478_v19  ;;  %v3611_v52 = vmul.f32 0.6931472, %v4202_v18 }
 0x4eb   : > { %4205 = vlog2.f32 %v3618_v6  ;;  %v3622_v44 = vadd.f32 1.0, %v3621_v24  ;;  %vm3625_vm10 = vcmp.lt.f32.partialorder %v3624_v39, 0.0004427343 }
 0x4ec   : > { %v3532_v32 = vand.u32 2147483647, %v7074_v55  ;;  %v3617_v60 = vsel %vm3616_vm9, %v3614_v46, %v3611_v52  ;;  %v3516_v9 = vmax.f32 %v7074_v55, 0.0 }
 0x4ed   : > { %v3737_v59 = vadd.f32 %v3617_v60, %v3513_v56  ;;  %v3623_v30 = vmul.f32 %v4200_v26, %v3622_v44 }
 0x4ee   : > { %v3548_v31 = vsub.f32 0.0, %v3532_v32 }
 0x4ef   : > { %4083 = vmatmul.msk.f32.gmra.mxu2 %vm2919_vm13, %v3737_v59 }
 0x4f0   : > { %v4204_v4 = vpop.eup %4203  ;;  %v3569_v51 = vmul.f32 1.442695, %v3548_v31 }
 0x4f1   : > { %v4206_v1 = vpop.eup %4205  ;;  %v3481_v22 = vpop.f32.mrf.mxu0  ;;  %v3627_v29 = vadd.f32 1.0, %v4204_v4  ;;  %v3630_v57 = vmul.f32 -0.5, %v4204_v4  ;;  %v3633_v25 = vand.u32 2147483647, %v4204_v4 }
 0x4f2   : > { %4207 = vpow2.f32 %v3569_v51  ;;  %v7079_v27 = vadd.f32 %v7057_v17, %v3481_v22  ;;  %v3620_v42 = vmul.f32 0.6931472, %v4206_v1 }
 0x4f3   : > { %4209 = vlog2.f32 %v3627_v29  ;;  %v3631_v34 = vadd.f32 1.0, %v3630_v57  ;;  %vm3634_vm0 = vcmp.lt.f32.partialorder %v3633_v25, 0.0004427343 }
 0x4f4   : > { %v3533_v35 = vand.u32 2147483647, %v7079_v27  ;;  %v3626_v5 = vsel %vm3625_vm10, %v3623_v30, %v3620_v42  ;;  %v3517_v32 = vmax.f32 %v7079_v27, 0.0 }
 0x4f5   : > { %v3738_v45 = vadd.f32 %v3626_v5, %v3514_v28  ;;  %v3632_v37 = vmul.f32 %v4204_v4, %v3631_v34 }
 0x4f6   : > { %v3549_v10 = vsub.f32 0.0, %v3533_v35 }
 0x4f7   : > { %4084 = vmatmul.msk.f32.gmra.mxu2 %vm2919_vm13, %v3738_v45 }
 0x4f8   : > { %v4208_v58 = vpop.eup %4207  ;;  %v3571_v40 = vmul.f32 1.442695, %v3549_v10 }
 0x4f9   : > { %v4210_v62 = vpop.eup %4209  ;;  %v3484_v43 = vpop.f32.mrf.mxu0  ;;  %v3636_v8 = vadd.f32 1.0, %v4208_v58  ;;  %v3639_v41 = vmul.f32 -0.5, %v4208_v58  ;;  %v3642_v61 = vand.u32 2147483647, %v4208_v58 }
 0x4fa   : > { %4211 = vpow2.f32 %v3571_v40  ;;  %v7085_v13 = vadd.f32 %v7057_v17, %v3484_v43  ;;  %v3629_v20 = vmul.f32 0.6931472, %v4210_v62 }
 0x4fb   : > { %4213 = vlog2.f32 %v3636_v8  ;;  %v3640_v47 = vadd.f32 1.0, %v3639_v41  ;;  %vm3643_vm8 = vcmp.lt.f32.partialorder %v3642_v61, 0.0004427343 }
 0x4fc   : > { %v3534_v2 = vand.u32 2147483647, %v7085_v13  ;;  %v3635_v0 = vsel %vm3634_vm0, %v3632_v37, %v3629_v20  ;;  %v3518_v35 = vmax.f32 %v7085_v13, 0.0 }
 0x4fd   : > { %v3739_v14 = vadd.f32 %v3635_v0, %v3515_v33  ;;  %v3641_v63 = vmul.f32 %v4208_v58, %v3640_v47 }
 0x4fe   : > { %v3550_v53 = vsub.f32 0.0, %v3534_v2 }
 0x4ff   : > { %4085 = vmatmul.msk.f32.gmra.mxu2 %vm2919_vm13, %v3739_v14 }
 0x500   : > { %v4212_v49 = vpop.eup %4211  ;;  %v3573_v16 = vmul.f32 1.442695, %v3550_v53 }
 0x501   : > { %v4214_v54 = vpop.eup %4213  ;;  %v3487_v11 = vpop.f32.mrf.mxu0  ;;  %v3645_v15 = vadd.f32 1.0, %v4212_v49  ;;  %v3648_v3 = vmul.f32 -0.5, %v4212_v49  ;;  %v3651_v26 = vand.u32 2147483647, %v4212_v49 }
 0x502   : > { %4215 = vpow2.f32 %v3573_v16  ;;  %v7091_v38 = vadd.f32 %v7057_v17, %v3487_v11  ;;  %v3638_v23 = vmul.f32 0.6931472, %v4214_v54 }
 0x503   : > { %4217 = vlog2.f32 %v3645_v15  ;;  %v3649_v12 = vadd.f32 1.0, %v3648_v3  ;;  %vm3652_vm14 = vcmp.lt.f32.partialorder %v3651_v26, 0.0004427343 }
 0x504   : > { %v3535_v21 = vand.u32 2147483647, %v7091_v38  ;;  %v3644_v48 = vsel %vm3643_vm8, %v3641_v63, %v3638_v23  ;;  %v3519_v2 = vmax.f32 %v7091_v38, 0.0 }
 0x505   : > { %v3740_v7 = vadd.f32 %v3644_v48, %v3516_v9  ;;  %v3650_v6 = vmul.f32 %v4212_v49, %v3649_v12 }
 0x506   : > { %v3551_v50 = vsub.f32 0.0, %v3535_v21 }
 0x507   : > { %4086 = vmatmul.msk.f32.gmra.mxu2 %vm2919_vm13, %v3740_v7 }
 0x508   : > { %v4216_v36 = vpop.eup %4215  ;;  %v3575_v18 = vmul.f32 1.442695, %v3551_v50 }
 0x509   : > { %v4218_v19 = vpop.eup %4217  ;;  %v3490_v46 = vpop.f32.mrf.mxu0  ;;  %v3654_v52 = vadd.f32 1.0, %v4216_v36  ;;  %v3657_v56 = vmul.f32 -0.5, %v4216_v36  ;;  %v3660_v4 = vand.u32 2147483647, %v4216_v36 }
 0x50a   : > { %4219 = vpow2.f32 %v3575_v18  ;;  %v7097_v55 = vadd.f32 %v7057_v17, %v3490_v46  ;;  %v3647_v24 = vmul.f32 0.6931472, %v4218_v19 }
 0x50b   : > { %4221 = vlog2.f32 %v3654_v52  ;;  %v3658_v39 = vadd.f32 1.0, %v3657_v56  ;;  %vm3661_vm1 = vcmp.lt.f32.partialorder %v3660_v4, 0.0004427343 }
 0x50c   : > { %v3536_v60 = vand.u32 2147483647, %v7097_v55  ;;  %v3653_v59 = vsel %vm3652_vm14, %v3650_v6, %v3647_v24  ;;  %v3520_v38 = vmax.f32 %v7097_v55, 0.0 }
 0x50d   : > { %v3741_v31 = vadd.f32 %v3653_v59, %v3517_v32  ;;  %v3659_v28 = vmul.f32 %v4216_v36, %v3658_v39 }
 0x50e   : > { %v3552_v44 = vsub.f32 0.0, %v3536_v60 }
 0x50f   : > { %4087 = vmatmul.msk.f32.gmra.mxu2 %vm2919_vm13, %v3741_v31 }
 0x510   : > { %v4220_v51 = vpop.eup %4219  ;;  %v3577_v1 = vmul.f32 1.442695, %v3552_v44 }
 0x511   : > { %v4222_v22 = vpop.eup %4221  ;;  %v3493_v29 = vpop.f32.mrf.mxu0  ;;  %v3663_v57 = vadd.f32 1.0, %v4220_v51  ;;  %v3666_v42 = vmul.f32 -0.5, %v4220_v51  ;;  %v3669_v58 = vand.u32 2147483647, %v4220_v51 }
 0x512   : > { %4223 = vpow2.f32 %v3577_v1  ;;  %v3494_v27 = vadd.f32 %v7057_v17, %v3493_v29  ;;  %v3656_v30 = vmul.f32 0.6931472, %v4222_v22 }
 0x513   : > { %4225 = vlog2.f32 %v3663_v57  ;;  %v3667_v10 = vadd.f32 1.0, %v3666_v42  ;;  %vm3670_vm4 = vcmp.lt.f32.partialorder %v3669_v58, 0.0004427343 }
 0x514   : > { %v3537_v5 = vand.u32 2147483647, %v3494_v27  ;;  %v3662_v45 = vsel %vm3661_vm1, %v3659_v28, %v3656_v30  ;;  %v3521_v46 = vmax.f32 %v3494_v27, 0.0 }
 0x515   : > { %v3742_v34 = vadd.f32 %v3662_v45, %v3518_v35  ;;  %v3668_v8 = vmul.f32 %v4220_v51, %v3667_v10 }
 0x516   : > { %v3553_v25 = vsub.f32 0.0, %v3537_v5 }
 0x517   : > { %4088 = vmatmul.msk.f32.gmra.mxu2 %vm2919_vm13, %v3742_v34 }
 0x518   : > { %v4224_v40 = vpop.eup %4223  ;;  %v3579_v62 = vmul.f32 1.442695, %v3553_v25 }
 0x519   : > { %v4226_v43 = vpop.eup %4225  ;;  %v3496_v37 = vpop.f32.mrf.mxu0  ;;  %v3672_v20 = vadd.f32 1.0, %v4224_v40  ;;  %v3675_v33 = vmul.f32 -0.5, %v4224_v40  ;;  %v3678_v49 = vand.u32 2147483647, %v4224_v40 }
 0x51a   : > { %4227 = vpow2.f32 %v3579_v62  ;;  %v3497_v41 = vadd.f32 %v7057_v17, %v3496_v37  ;;  %v3665_v13 = vmul.f32 0.6931472, %v4226_v43 }
 0x51b   : > { %4229 = vlog2.f32 %v3672_v20  ;;  %v3676_v61 = vadd.f32 1.0, %v3675_v33  ;;  %vm3679_vm5 = vcmp.lt.f32.partialorder %v3678_v49, 0.0004427343 }
 0x51c   : > { %v3538_v0 = vand.u32 2147483647, %v3497_v41  ;;  %v3671_v14 = vsel %vm3670_vm4, %v3668_v8, %v3665_v13  ;;  %v3522_v51 = vmax.f32 %v3497_v41, 0.0 }
 0x51d   : > { %v3743_v53 = vadd.f32 %v3671_v14, %v3519_v2  ;;  %v3677_v23 = vmul.f32 %v4224_v40, %v3676_v61 }
 0x51e   : > { %v3554_v47 = vsub.f32 0.0, %v3538_v0 }
 0x51f   : > { %4089 = vmatmul.msk.f32.gmra.mxu2 %vm2919_vm13, %v3743_v53 }
 0x520   : > { %v4228_v16 = vpop.eup %4227  ;;  %v3581_v54 = vmul.f32 1.442695, %v3554_v47 }
 0x521   : > { %v4230_v11 = vpop.eup %4229  ;;  %v3681_v15 = vadd.f32 1.0, %v4228_v16  ;;  %v3684_v63 = vmul.f32 -0.5, %v4228_v16  ;;  %v3687_v7 = vand.u32 2147483647, %v4228_v16 }
 0x522   : > { %4231 = vpow2.f32 %v3581_v54  ;;  %v3674_v3 = vmul.f32 0.6931472, %v4230_v11 }
 0x523   : > { %4233 = vlog2.f32 %v3681_v15  ;;  %v3685_v48 = vadd.f32 1.0, %v3684_v63  ;;  %vm3688_vm6 = vcmp.lt.f32.partialorder %v3687_v7, 0.0004427343 }
 0x524   : > { %v3680_v9 = vsel %vm3679_vm5, %v3677_v23, %v3674_v3 }
 0x525   : > { %v3744_v21 = vadd.f32 %v3680_v9, %v3520_v38  ;;  %v3686_v18 = vmul.f32 %v4228_v16, %v3685_v48 }
 0x527   : > { %4090 = vmatmul.msk.f32.gmra.mxu2 %vm2919_vm13, %v3744_v21 }
 0x528   : > { %v4232_v12 = vpop.eup %4231 }
 0x529   : > { %v4234_v50 = vpop.eup %4233  ;;  %v3690_v26 = vadd.f32 1.0, %v4232_v12  ;;  %v3693_v19 = vmul.f32 -0.5, %v4232_v12  ;;  %v3499_v6 = vpop.f32.mrf.mxu0  ;;  %v3696_v60 = vand.u32 2147483647, %v4232_v12 }
 0x52a   : > { %v3683_v36 = vmul.f32 0.6931472, %v4234_v50  ;;  %v3500_v52 = vadd.f32 %v7057_v17, %v3499_v6 }
 0x52b   : > { %4235 = vlog2.f32 %v3690_v26  ;;  %v3694_v32 = vadd.f32 1.0, %v3693_v19  ;;  %vm3697_vm7 = vcmp.lt.f32.partialorder %v3696_v60, 0.0004427343 }
 0x52c   : > { %v3689_v55 = vsel %vm3688_vm6, %v3686_v18, %v3683_v36  ;;  %v3539_v56 = vand.u32 2147483647, %v3500_v52  ;;  %v3523_v0 = vmax.f32 %v3500_v52, 0.0 }
 0x52d   : > { %v3745_v24 = vadd.f32 %v3689_v55, %v3521_v46  ;;  %v3695_v4 = vmul.f32 %v4232_v12, %v3694_v32 }
 0x52e   : > { %v3555_v59 = vsub.f32 0.0, %v3539_v56 }
 0x52f   : > { %4091 = vmatmul.msk.f32.gmra.mxu2 %vm2919_vm13, %v3745_v24 }
 0x530   : > { %v3583_v44 = vmul.f32 1.442695, %v3555_v59 }
 0x531   : > { %v4236_v31 = vpop.eup %4235  ;;  %v3502_v1 = vpop.f32.mrf.mxu0 }
 0x532   : > { %v3692_v39 = vmul.f32 0.6931472, %v4236_v31  ;;  %4237 = vpow2.f32 %v3583_v44  ;;  %v3503_v22 = vadd.f32 %v7057_v17, %v3502_v1 }
 0x534   : > { %v3698_v29 = vsel %vm3697_vm7, %v3695_v4, %v3692_v39  ;;  %v3540_v42 = vand.u32 2147483647, %v3503_v22  ;;  %v3524_v38 = vmax.f32 %v3503_v22, 0.0  ;;  %v4124_v4 = vld [vmem:[%s7132_s1 + $0xf0] ss:$0 sm:$0xff] }
 0x535   : > { %v3746_v57 = vadd.f32 %v3698_v29, %v3522_v51 }
 0x536   : > { %v3556_v27 = vsub.f32 0.0, %v3540_v42 }
 0x537   : > { %4092 = vmatmul.msk.f32.gmra.mxu2 %vm2919_vm13, %v3746_v57 }
 0x538   : > { %v4238_v30 = vpop.eup %4237  ;;  %v3585_v28 = vmul.f32 1.442695, %v3556_v27 }
 0x539   : > { %v3505_v35 = vpop.f32.mrf.mxu0  ;;  %v3699_v5 = vadd.f32 1.0, %v4238_v30  ;;  %v3702_v45 = vmul.f32 -0.5, %v4238_v30  ;;  %v3705_v40 = vand.u32 2147483647, %v4238_v30 }
 0x53a   : > { %4239 = vpow2.f32 %v3585_v28  ;;  %v3506_v34 = vadd.f32 %v7057_v17, %v3505_v35 }
 0x53b   : > { %4241 = vlog2.f32 %v3699_v5  ;;  %v3703_v25 = vadd.f32 1.0, %v3702_v45  ;;  %vm3706_vm2 = vcmp.lt.f32.partialorder %v3705_v40, 0.0004427343 }
 0x53c   : > { %v3541_v10 = vand.u32 2147483647, %v3506_v34  ;;  %v3525_v46 = vmax.f32 %v3506_v34, 0.0 }
 0x53d   : > { %v3704_v20 = vmul.f32 %v4238_v30, %v3703_v25 }
 0x53e   : > { %v3557_v58 = vsub.f32 0.0, %v3541_v10 }
 0x540   : > { %v4240_v62 = vpop.eup %4239  ;;  %v3587_v43 = vmul.f32 1.442695, %v3557_v58 }
 0x541   : > { %v4242_v37 = vpop.eup %4241  ;;  %v3508_v8 = vpop.f32.mrf.mxu0  ;;  %v3708_v41 = vadd.f32 1.0, %v4240_v62  ;;  %v3711_v2 = vmul.f32 -0.5, %v4240_v62  ;;  %v3714_v16 = vand.u32 2147483647, %v4240_v62 }
 0x542   : > { %4243 = vpow2.f32 %v3587_v43  ;;  %v3509_v13 = vadd.f32 %v7057_v17, %v3508_v8  ;;  %v3701_v33 = vmul.f32 0.6931472, %v4242_v37 }
 0x543   : > { %4245 = vlog2.f32 %v3708_v41  ;;  %v3712_v49 = vadd.f32 1.0, %v3711_v2  ;;  %vm3715_vm3 = vcmp.lt.f32.partialorder %v3714_v16, 0.0004427343 }
 0x544   : > { %v3542_v14 = vand.u32 2147483647, %v3509_v13  ;;  %v3707_v53 = vsel %vm3706_vm2, %v3704_v20, %v3701_v33  ;;  %v3526_v59 = vmax.f32 %v3509_v13, 0.0 }
 0x545   : > { %v3747_v47 = vadd.f32 %v3707_v53, %v3523_v0  ;;  %v3713_v17 = vmul.f32 %v4240_v62, %v3712_v49 }
 0x546   : > { %v3558_v61 = vsub.f32 0.0, %v3542_v14 }
 0x547   : > { %4093 = vmatmul.msk.f32.gmra.mxu2 %vm2919_vm13, %v3747_v47 }
 0x548   : > { %v4244_v54 = vpop.eup %4243  ;;  %v3589_v11 = vmul.f32 1.442695, %v3558_v61 }
 0x549   : > { %v4246_v15 = vpop.eup %4245  ;;  %v3717_v3 = vadd.f32 1.0, %v4244_v54  ;;  %v3720_v63 = vmul.f32 -0.5, %v4244_v54  ;;  %v3723_v7 = vand.u32 2147483647, %v4244_v54 }
 0x54a   : > { %4247 = vpow2.f32 %v3589_v11  ;;  %v3710_v23 = vmul.f32 0.6931472, %v4246_v15 }
 0x54b   : > { %4249 = vlog2.f32 %v3717_v3  ;;  %v3721_v48 = vadd.f32 1.0, %v3720_v63  ;;  %vm3724_vm11 = vcmp.lt.f32.partialorder %v3723_v7, 0.0004427343 }
 0x54c   : > { %v3716_v9 = vsel %vm3715_vm3, %v3713_v17, %v3710_v23 }
 0x54d   : > { %v3748_v21 = vadd.f32 %v3716_v9, %v3524_v38  ;;  %v3722_v18 = vmul.f32 %v4244_v54, %v3721_v48 }
 0x54f   : > { %4094 = vmatmul.msk.f32.gmra.mxu2 %vm2919_vm13, %v3748_v21 }
 0x550   : > { %v4248_v12 = vpop.eup %4247 }
 0x551   : > { %v4250_v50 = vpop.eup %4249  ;;  %v3726_v26 = vadd.f32 1.0, %v4248_v12  ;;  %v3729_v19 = vmul.f32 -0.5, %v4248_v12  ;;  %v3732_v24 = vand.u32 2147483647, %v4248_v12 }
 0x552   : > { %v3719_v36 = vmul.f32 0.6931472, %v4250_v50 }
 0x553   : > { %4251 = vlog2.f32 %v3726_v26  ;;  %v3730_v55 = vadd.f32 1.0, %v3729_v19  ;;  %vm3733_vm15 = vcmp.lt.f32.partialorder %v3732_v24, 0.0004427343 }
 0x554   : > { %v3725_v6 = vsel %vm3724_vm11, %v3722_v18, %v3719_v36 }
 0x555   : > { %v3749_v52 = vadd.f32 %v3725_v6, %v3525_v46  ;;  %v3731_v60 = vmul.f32 %v4248_v12, %v3730_v55 }
 0x557   : > { %4095 = vmatmul.msk.f32.gmra.mxu2 %vm2919_vm13, %v3749_v52 }
 0x559   : > { %v4252_v56 = vpop.eup %4251 }
 0x55a   : > { %v3728_v32 = vmul.f32 0.6931472, %v4252_v56 }
 0x55c   : > { %v3734_v31 = vsel %vm3733_vm15, %v3731_v60, %v3728_v32 }
 0x55d   : > { %v3750_v44 = vadd.f32 %v3734_v31, %v3526_v59 }
 0x55f   : > { %4096 = vmatmul.msk.f32.gmra.mxu2 %vm2919_vm13, %v3750_v44 }
 0x562   : > { %v3822_v39 = vpop.f32.mrf.mxu2 }
 0x563   : > { %v3823_v1 = vadd.f32 %v4124_v4, %v3822_v39 }
 0x56a   : > { %v3825_v51 = vpop.f32.mrf.mxu2 }
 0x56b   : > { %v3826_v22 = vadd.f32 %v4124_v4, %v3825_v51 }
 0x56d   : > { %v3870_v29 = vadd.f32 %v3826_v22, %v3823_v1 }
 0x572   : > { %v3828_v57 = vpop.f32.mrf.mxu2 }
 0x573   : > { %v3829_v42 = vadd.f32 %v4124_v4, %v3828_v57 }
 0x575   : > { %v3871_v27 = vadd.f32 %v3870_v29, %v3829_v42 }
 0x57a   : > { %v3831_v30 = vpop.f32.mrf.mxu2 }
 0x57b   : > { %v3832_v28 = vadd.f32 %v4124_v4, %v3831_v30 }
 0x57d   : > { %v3872_v35 = vadd.f32 %v3871_v27, %v3832_v28 }
 0x582   : > { %v3834_v5 = vpop.f32.mrf.mxu2 }
 0x583   : > { %v3835_v45 = vadd.f32 %v4124_v4, %v3834_v5 }
 0x585   : > { %v3873_v34 = vadd.f32 %v3872_v35, %v3835_v45 }
 0x58a   : > { %v3837_v10 = vpop.f32.mrf.mxu2 }
 0x58b   : > { %v3838_v20 = vadd.f32 %v4124_v4, %v3837_v10 }
 0x58d   : > { %v3874_v13 = vadd.f32 %v3873_v34, %v3838_v20 }
 0x592   : > { %v3840_v25 = vpop.f32.mrf.mxu2 }
 0x593   : > { %v3841_v41 = vadd.f32 %v4124_v4, %v3840_v25 }
 0x595   : > { %v3875_v0 = vadd.f32 %v3874_v13, %v3841_v41 }
 0x59a   : > { %v3843_v58 = vpop.f32.mrf.mxu2 }
 0x59b   : > { %v3844_v33 = vadd.f32 %v4124_v4, %v3843_v58 }
 0x59d   : > { %v3876_v53 = vadd.f32 %v3875_v0, %v3844_v33 }
 0x5a2   : > { %v3846_v40 = vpop.f32.mrf.mxu2 }
 0x5a3   : > { %v3847_v14 = vadd.f32 %v4124_v4, %v3846_v40 }
 0x5a5   : > { %v3877_v61 = vadd.f32 %v3876_v53, %v3847_v14 }
 0x5aa   : > { %v3849_v62 = vpop.f32.mrf.mxu2 }
 0x5ab   : > { %v3850_v47 = vadd.f32 %v4124_v4, %v3849_v62 }
 0x5ad   : > { %v3878_v16 = vadd.f32 %v3877_v61, %v3850_v47 }
 0x5b2   : > { %v3852_v43 = vpop.f32.mrf.mxu2 }
 0x5b3   : > { %v3853_v49 = vadd.f32 %v4124_v4, %v3852_v43 }
 0x5b5   : > { %v3879_v15 = vadd.f32 %v3878_v16, %v3853_v49 }
 0x5ba   : > { %v3855_v37 = vpop.f32.mrf.mxu2 }
 0x5bb   : > { %v3856_v54 = vadd.f32 %v4124_v4, %v3855_v37 }
 0x5bd   : > { %v3880_v23 = vadd.f32 %v3879_v15, %v3856_v54 }
 0x5ca   : > { %v3858_v8 = vpop.f32.mrf.mxu2 }
 0x5cb   : > { %v3859_v3 = vadd.f32 %v4124_v4, %v3858_v8 }
 0x5cd   : > { %v3881_v63 = vadd.f32 %v3880_v23, %v3859_v3 }
 0x5d2   : > { %v3861_v2 = vpop.f32.mrf.mxu2 }
 0x5d3   : > { %v3862_v17 = vadd.f32 %v4124_v4, %v3861_v2 }
 0x5d5   : > { %v3882_v9 = vadd.f32 %v3881_v63, %v3862_v17 }
 0x5da   : > { %v3864_v11 = vpop.f32.mrf.mxu2 }
 0x5db   : > { %v3865_v38 = vadd.f32 %v4124_v4, %v3864_v11 }
 0x5dd   : > { %v3883_v48 = vadd.f32 %v3882_v9, %v3865_v38 }
 0x5e2   : > { %v3867_v21 = vpop.f32.mrf.mxu2 }
 0x5e3   : > { %v3868_v7 = vadd.f32 %v4124_v4, %v3867_v21 }
 0x5e5   : > { %v3884_v12 = vadd.f32 %v3883_v48, %v3868_v7 }
 0x5e7   : > { %v3885_v50 = vrot.slane %v3884_v12, 4 }
 0x5e9   : > { %v3886_v26 = vadd.f32 %v3885_v50, %v3884_v12 }
 0x5eb   : > { %v3887_v36 = vrot.slane %v3886_v26, 2 }
 0x5ed   : > { %v3888_v18 = vadd.f32 %v3887_v36, %v3886_v26 }
 0x5ef   : > { %v3889_v19 = vrot.slane %v3888_v18, 1 }
 0x5f1   : > { %v3890_v46 = vadd.f32 %v3889_v19, %v3888_v18 }
 0x5f3   : > { %3891 = vst [vmem:[%s143_s29] sm:$0xff] %v3890_v46 }
 0x5f4 PF: > { %s12_s9 = sadd.s32 1, %s4259_s9  }
 0x5f5   : > { %p9_p5 = scmp.ge.s32.totalorder %s12_s9, 4  }
 0x5f7   :  { %11 = sbr.rel (!%p9_p5) target bundleno = 1 (0x1), region = 58 }

</bundles_post_ra>
